<compile_context>
chip_gen: v7x
topology: tpu7x:2x2x1
jax: 0.10.0
libtpu: 0.0.40
codegen_flags: <defaults>
</compile_context>

<pallas_src>
import jax
import jax.numpy as jnp
from jax.experimental import pallas as pl
from jax.experimental.pallas import tpu as pltpu

_CHUNK = 1024  # columns of the input processed per swish chunk


def _swish(x):
    # x * sigmoid(x) with sigmoid(x) = 0.5 * (tanh(x/2) + 1): single EUP push.
    return x * (0.5 * jnp.tanh(x * 0.5) + 0.5)


def predictor_fc6_kernel(photo_ref, sketch_ref, w1_hbm, b1_ref, w2_ref, b2_ref,
                         out_ref, w1_vmem, hs_vmem, dma_sem):
    """Single-step kernel; W1 is DMA'd manually so compute hides under it."""
    B, kh = photo_ref.shape
    n_chunks = kh // _CHUNK

    # Kick off both K-halves of the bf16 W1 HBM->VMEM transfer immediately.
    cp0 = pltpu.make_async_copy(w1_hbm.at[0], w1_vmem.at[0], dma_sem.at[0])
    cp1 = pltpu.make_async_copy(w1_hbm.at[1], w1_vmem.at[1], dma_sem.at[1])
    cp0.start()
    cp1.start()

    # swish(photo) -> bf16, chunked over K (runs under the W1 DMAs).
    for c in range(n_chunks):
        x = photo_ref[:, c * _CHUNK:(c + 1) * _CHUNK]
        hs_vmem[0, :, c * _CHUNK:(c + 1) * _CHUNK] = _swish(x).astype(jnp.bfloat16)

    cp0.wait()
    z1 = jnp.dot(hs_vmem[0], w1_vmem[0], preferred_element_type=jnp.float32)

    # swish(sketch) while the second half of W1 is still in flight.
    for c in range(n_chunks):
        x = sketch_ref[:, c * _CHUNK:(c + 1) * _CHUNK]
        hs_vmem[1, :, c * _CHUNK:(c + 1) * _CHUNK] = _swish(x).astype(jnp.bfloat16)

    cp1.wait()
    z1 = z1 + jnp.dot(hs_vmem[1], w1_vmem[1], preferred_element_type=jnp.float32)
    z1 = z1 + b1_ref[...]

    a1 = _swish(z1)                                       # Swish()
    # TODO(synk): nn.Dropout() is identity in eval/inference mode; training-mode
    # stochastic masking is not implemented here.

    # Second Linear (H -> 1): VPU multiply + lane reduction, W2 as a (1, H) row.
    out_ref[...] = (jnp.sum(a1 * w2_ref[...], axis=-1, keepdims=True)
                    + b2_ref[0])


def predictor_fc6(photo, sketch, w1, b1, w2, b2):
    """photo, sketch: (B, 4096) float32.  Returns (B, 1) float32."""
    B, kh = photo.shape
    K, H = w1.shape
    assert K == 2 * kh
    assert sketch.shape == (B, kh)
    assert kh % _CHUNK == 0

    # Stream W1 as bf16 (in production, pre-materialize the bf16 copy once).
    # Reshape to (2, kh, H) so each K-half is a leading-axis slab for the DMA.
    w1_bf16 = w1.astype(jnp.bfloat16).reshape(2, kh, H)
    b1_2d = b1.reshape(1, H).astype(jnp.float32)
    w2_row = w2.reshape(1, H).astype(jnp.float32)          # (H,1) -> (1,H) row
    b2_1d = b2.reshape(1).astype(jnp.float32)

    w1_bytes = K * H * 2
    cost = pl.CostEstimate(
        flops=2 * B * K * H + 2 * B * H,
        transcendentals=B * K + B * H,
        bytes_accessed=w1_bytes + 2 * B * kh * 4 + 2 * H * 4 + 4 + B * 4,
    )

    return pl.pallas_call(
        predictor_fc6_kernel,
        out_shape=jax.ShapeDtypeStruct((B, 1), jnp.float32),
        grid_spec=pltpu.PrefetchScalarGridSpec(
            num_scalar_prefetch=0,
            grid=(1,),
            in_specs=[
                pl.BlockSpec((B, kh), lambda i: (0, 0)),            # photo
                pl.BlockSpec((B, kh), lambda i: (0, 0)),            # sketch
                pl.BlockSpec(memory_space=pl.ANY),                  # W1 (manual DMA)
                pl.BlockSpec((1, H), lambda i: (0, 0)),             # b1
                pl.BlockSpec((1, H), lambda i: (0, 0)),             # W2 as a row
                pl.BlockSpec(memory_space=pltpu.MemorySpace.SMEM),  # b2 scalar
            ],
            out_specs=pl.BlockSpec((B, 1), lambda i: (0, 0)),
            scratch_shapes=[
                pltpu.VMEM((2, kh, H), jnp.bfloat16),   # W1 landing buffer
                pltpu.VMEM((2, B, kh), jnp.bfloat16),   # swish(inputs) in bf16
                pltpu.SemaphoreType.DMA((2,)),
            ],
        ),
        compiler_params=pltpu.CompilerParams(
            dimension_semantics=("arbitrary",)),
        cost_estimate=cost,
    )(photo, sketch, w1_bf16, b1_2d, w2_row, b2_1d)


def init_params(key, in_dim=4096 * 2, hiddens_dim=128):
    """Deterministic PyTorch-style Linear init: U(-1/sqrt(fan_in), 1/sqrt(fan_in))."""
    k1, k2, k3, k4 = jax.random.split(key, 4)
    bound1 = 1.0 / jnp.sqrt(in_dim)
    bound2 = 1.0 / jnp.sqrt(hiddens_dim)
    w1 = jax.random.uniform(k1, (in_dim, hiddens_dim), jnp.float32, -bound1, bound1)
    b1 = jax.random.uniform(k2, (hiddens_dim,), jnp.float32, -bound1, bound1)
    w2 = jax.random.uniform(k3, (hiddens_dim, 1), jnp.float32, -bound2, bound2)
    b2 = jax.random.uniform(k4, (1,), jnp.float32, -bound2, bound2)
    return w1, b1, w2, b2


def reference_f32(photo, sketch, w1, b1, w2, b2):
    h = jnp.concatenate([photo, sketch], axis=1)
    hs = h * jax.nn.sigmoid(h)
    z1 = hs @ w1 + b1
    a1 = z1 * jax.nn.sigmoid(z1)
    return a1 @ w2 + b2


def reference_bf16(photo, sketch, w1, b1, w2, b2):
    # Matched precision: bf16 W1 / bf16 activations at the MXU, f32 accumulation.
    h = jnp.concatenate([photo, sketch], axis=1)
    hs = (h * jax.nn.sigmoid(h)).astype(jnp.bfloat16)
    z1 = jnp.dot(hs, w1.astype(jnp.bfloat16),
                 preferred_element_type=jnp.float32) + b1
    a1 = z1 * jax.nn.sigmoid(z1)
    return a1 @ w2 + b2


if __name__ == "__main__":
    B = 8
    HIDDENS = 128
    key = jax.random.PRNGKey(0)
    kp, ks, kw = jax.random.split(key, 3)

    photo = jax.random.normal(kp, (B, 4096), jnp.float32)
    sketch = jax.random.normal(ks, (B, 4096), jnp.float32)
    w1, b1, w2, b2 = init_params(kw, in_dim=4096 * 2, hiddens_dim=HIDDENS)

    out = predictor_fc6(photo, sketch, w1, b1, w2, b2)
    out = jax.block_until_ready(out)

    ref_bf = reference_bf16(photo, sketch, w1, b1, w2, b2)
    ref_32 = reference_f32(photo, sketch, w1, b1, w2, b2)

    assert out.shape == (B, 1)
    # Tight check vs. matched-precision (bf16-weight) reference.
    assert jnp.allclose(out, ref_bf, atol=5e-3, rtol=5e-3)
    # Relaxed check vs. the exact f32 PyTorch-equivalent reference
    # (bf16 W1 streaming trades exact parity for ~2x HBM bandwidth).
    assert jnp.allclose(out, ref_32, atol=3e-2, rtol=3e-2)

    print("KERNEL_OK")
</pallas_src>

<mosaic_0001>
module attributes {stable_mosaic.version = 11 : i64} {
  func.func @predictor_fc6_kernel(%arg0: i32, %arg1: memref<8x4096xf32, #tpu.memory_space<vmem>>, %arg2: memref<8x4096xf32, #tpu.memory_space<vmem>>, %arg3: memref<2x4096x128xbf16, #tpu.memory_space<any>>, %arg4: memref<1x128xf32, #tpu.memory_space<vmem>>, %arg5: memref<1x128xf32, #tpu.memory_space<vmem>>, %arg6: memref<1xf32, #tpu.memory_space<smem>>, %arg7: memref<8x1xf32, #tpu.memory_space<vmem>>, %arg8: memref<2x4096x128xbf16, #tpu.memory_space<vmem>>, %arg9: memref<2x8x4096xbf16, #tpu.memory_space<vmem>>, %arg10: memref<2x!tpu.dma_semaphore, #tpu.memory_space<semaphore_mem>>) attributes {dimension_semantics = [#tpu.dimension_semantics<arbitrary>], iteration_bounds = array<i64: 1>, scalar_prefetch = 0 : i64, scratch_operands = 3 : i64, tpu.core_type = #tpu.core_type<tc>, window_params = [{pipeline_mode = #tpu.pipeline_mode<synchronous>, transform_indices = @transform_0, window_bounds = array<i64: 8, 4096>}, {pipeline_mode = #tpu.pipeline_mode<synchronous>, transform_indices = @transform_1, window_bounds = array<i64: 8, 4096>}, {}, {pipeline_mode = #tpu.pipeline_mode<synchronous>, transform_indices = @transform_3, window_bounds = array<i64: 1, 128>}, {pipeline_mode = #tpu.pipeline_mode<synchronous>, transform_indices = @transform_4, window_bounds = array<i64: 1, 128>}, {transform_indices = @transform_5, window_bounds = array<i64: 1>}, {pipeline_mode = #tpu.pipeline_mode<synchronous>, transform_indices = @transform_6, window_bounds = array<i64: 8, 1>}]} {
    %c0_i32 = arith.constant 0 : i32
    %c0_i32_0 = arith.constant 0 : i32
    %c0_i32_1 = arith.constant 0 : i32
    %c0_i32_2 = arith.constant 0 : i32
    %c0_i32_3 = arith.constant 0 : i32
    %0 = tpu.memref_slice %arg3[%c0_i32, %c0_i32_2, %c0_i32_3] : memref<2x4096x128xbf16, #tpu.memory_space<any>> -> memref<1x4096x128xbf16, #tpu.memory_space<any>>
    %1 = tpu.memref_squeeze %0 : memref<1x4096x128xbf16, #tpu.memory_space<any>> -> memref<4096x128xbf16, #tpu.memory_space<any>>
    %c0_i32_4 = arith.constant 0 : i32
    %c0_i32_5 = arith.constant 0 : i32
    %2 = tpu.memref_slice %arg8[%c0_i32_0, %c0_i32_4, %c0_i32_5] : memref<2x4096x128xbf16, #tpu.memory_space<vmem>> -> memref<1x4096x128xbf16, #tpu.memory_space<vmem>>
    %3 = tpu.memref_squeeze %2 : memref<1x4096x128xbf16, #tpu.memory_space<vmem>> -> memref<4096x128xbf16, #tpu.memory_space<vmem>>
    %4 = tpu.memref_slice %arg10[%c0_i32_1] : memref<2x!tpu.dma_semaphore, #tpu.memory_space<semaphore_mem>> -> memref<1x!tpu.dma_semaphore, #tpu.memory_space<semaphore_mem>>
    %5 = tpu.memref_squeeze %4 : memref<1x!tpu.dma_semaphore, #tpu.memory_space<semaphore_mem>> -> memref<!tpu.dma_semaphore, #tpu.memory_space<semaphore_mem>>
    tpu.enqueue_dma source(%1 : memref<4096x128xbf16, #tpu.memory_space<any>>) target(%3 : memref<4096x128xbf16, #tpu.memory_space<vmem>>) target_semaphore(%5 : memref<!tpu.dma_semaphore, #tpu.memory_space<semaphore_mem>>)
    %c1_i32 = arith.constant 1 : i32
    %c1_i32_6 = arith.constant 1 : i32
    %c1_i32_7 = arith.constant 1 : i32
    %c0_i32_8 = arith.constant 0 : i32
    %c0_i32_9 = arith.constant 0 : i32
    %6 = tpu.memref_slice %arg3[%c1_i32, %c0_i32_8, %c0_i32_9] : memref<2x4096x128xbf16, #tpu.memory_space<any>> -> memref<1x4096x128xbf16, #tpu.memory_space<any>>
    %7 = tpu.memref_squeeze %6 : memref<1x4096x128xbf16, #tpu.memory_space<any>> -> memref<4096x128xbf16, #tpu.memory_space<any>>
    %c0_i32_10 = arith.constant 0 : i32
    %c0_i32_11 = arith.constant 0 : i32
    %8 = tpu.memref_slice %arg8[%c1_i32_6, %c0_i32_10, %c0_i32_11] : memref<2x4096x128xbf16, #tpu.memory_space<vmem>> -> memref<1x4096x128xbf16, #tpu.memory_space<vmem>>
    %9 = tpu.memref_squeeze %8 : memref<1x4096x128xbf16, #tpu.memory_space<vmem>> -> memref<4096x128xbf16, #tpu.memory_space<vmem>>
    %10 = tpu.memref_slice %arg10[%c1_i32_7] : memref<2x!tpu.dma_semaphore, #tpu.memory_space<semaphore_mem>> -> memref<1x!tpu.dma_semaphore, #tpu.memory_space<semaphore_mem>>
    %11 = tpu.memref_squeeze %10 : memref<1x!tpu.dma_semaphore, #tpu.memory_space<semaphore_mem>> -> memref<!tpu.dma_semaphore, #tpu.memory_space<semaphore_mem>>
    tpu.enqueue_dma source(%7 : memref<4096x128xbf16, #tpu.memory_space<any>>) target(%9 : memref<4096x128xbf16, #tpu.memory_space<vmem>>) target_semaphore(%11 : memref<!tpu.dma_semaphore, #tpu.memory_space<semaphore_mem>>)
    %c0 = arith.constant 0 : index
    %c0_12 = arith.constant 0 : index
    %12 = vector.load %arg1[%c0, %c0_12] : memref<8x4096xf32, #tpu.memory_space<vmem>>, vector<8x1024xf32>
    %cst = arith.constant 5.000000e-01 : f32
    %13 = vector.broadcast %cst : f32 to vector<8x1024xf32>
    %14 = arith.mulf %12, %13 : vector<8x1024xf32>
    %15 = math.tanh %14 : vector<8x1024xf32>
    %cst_13 = arith.constant 5.000000e-01 : f32
    %16 = vector.broadcast %cst_13 : f32 to vector<8x1024xf32>
    %17 = arith.mulf %16, %15 : vector<8x1024xf32>
    %cst_14 = arith.constant 5.000000e-01 : f32
    %18 = vector.broadcast %cst_14 : f32 to vector<8x1024xf32>
    %19 = arith.addf %17, %18 : vector<8x1024xf32>
    %20 = arith.mulf %12, %19 : vector<8x1024xf32>
    %21 = arith.truncf %20 : vector<8x1024xf32> to vector<8x1024xbf16>
    %c0_15 = arith.constant 0 : index
    %c0_16 = arith.constant 0 : index
    %c0_17 = arith.constant 0 : index
    %22 = vector.load %arg9[%c0_15, %c0_16, %c0_17] : memref<2x8x4096xbf16, #tpu.memory_space<vmem>>, vector<1x8x1024xbf16>
    %23 = vector.shape_cast %22 : vector<1x8x1024xbf16> to vector<8x1024xbf16>
    %24 = vector.shape_cast %21 : vector<8x1024xbf16> to vector<1x8x1024xbf16>
    tpu.vector_store %arg9[%c0_15, %c0_16, %c0_17], %24 {strides = array<i32>} : memref<2x8x4096xbf16, #tpu.memory_space<vmem>>, vector<1x8x1024xbf16>,
    %c0_18 = arith.constant 0 : index
    %c1024 = arith.constant 1024 : index
    %25 = vector.load %arg1[%c0_18, %c1024] : memref<8x4096xf32, #tpu.memory_space<vmem>>, vector<8x1024xf32>
    %cst_19 = arith.constant 5.000000e-01 : f32
    %26 = vector.broadcast %cst_19 : f32 to vector<8x1024xf32>
    %27 = arith.mulf %25, %26 : vector<8x1024xf32>
    %28 = math.tanh %27 : vector<8x1024xf32>
    %cst_20 = arith.constant 5.000000e-01 : f32
    %29 = vector.broadcast %cst_20 : f32 to vector<8x1024xf32>
    %30 = arith.mulf %29, %28 : vector<8x1024xf32>
    %cst_21 = arith.constant 5.000000e-01 : f32
    %31 = vector.broadcast %cst_21 : f32 to vector<8x1024xf32>
    %32 = arith.addf %30, %31 : vector<8x1024xf32>
    %33 = arith.mulf %25, %32 : vector<8x1024xf32>
    %34 = arith.truncf %33 : vector<8x1024xf32> to vector<8x1024xbf16>
    %c0_22 = arith.constant 0 : index
    %c0_23 = arith.constant 0 : index
    %c1024_24 = arith.constant 1024 : index
    %35 = vector.load %arg9[%c0_22, %c0_23, %c1024_24] : memref<2x8x4096xbf16, #tpu.memory_space<vmem>>, vector<1x8x1024xbf16>
    %36 = vector.shape_cast %35 : vector<1x8x1024xbf16> to vector<8x1024xbf16>
    %37 = vector.shape_cast %34 : vector<8x1024xbf16> to vector<1x8x1024xbf16>
    tpu.vector_store %arg9[%c0_22, %c0_23, %c1024_24], %37 {strides = array<i32>} : memref<2x8x4096xbf16, #tpu.memory_space<vmem>>, vector<1x8x1024xbf16>,
    %c0_25 = arith.constant 0 : index
    %c2048 = arith.constant 2048 : index
    %38 = vector.load %arg1[%c0_25, %c2048] : memref<8x4096xf32, #tpu.memory_space<vmem>>, vector<8x1024xf32>
    %cst_26 = arith.constant 5.000000e-01 : f32
    %39 = vector.broadcast %cst_26 : f32 to vector<8x1024xf32>
    %40 = arith.mulf %38, %39 : vector<8x1024xf32>
    %41 = math.tanh %40 : vector<8x1024xf32>
    %cst_27 = arith.constant 5.000000e-01 : f32
    %42 = vector.broadcast %cst_27 : f32 to vector<8x1024xf32>
    %43 = arith.mulf %42, %41 : vector<8x1024xf32>
    %cst_28 = arith.constant 5.000000e-01 : f32
    %44 = vector.broadcast %cst_28 : f32 to vector<8x1024xf32>
    %45 = arith.addf %43, %44 : vector<8x1024xf32>
    %46 = arith.mulf %38, %45 : vector<8x1024xf32>
    %47 = arith.truncf %46 : vector<8x1024xf32> to vector<8x1024xbf16>
    %c0_29 = arith.constant 0 : index
    %c0_30 = arith.constant 0 : index
    %c2048_31 = arith.constant 2048 : index
    %48 = vector.load %arg9[%c0_29, %c0_30, %c2048_31] : memref<2x8x4096xbf16, #tpu.memory_space<vmem>>, vector<1x8x1024xbf16>
    %49 = vector.shape_cast %48 : vector<1x8x1024xbf16> to vector<8x1024xbf16>
    %50 = vector.shape_cast %47 : vector<8x1024xbf16> to vector<1x8x1024xbf16>
    tpu.vector_store %arg9[%c0_29, %c0_30, %c2048_31], %50 {strides = array<i32>} : memref<2x8x4096xbf16, #tpu.memory_space<vmem>>, vector<1x8x1024xbf16>,
    %c0_32 = arith.constant 0 : index
    %c3072 = arith.constant 3072 : index
    %51 = vector.load %arg1[%c0_32, %c3072] : memref<8x4096xf32, #tpu.memory_space<vmem>>, vector<8x1024xf32>
    %cst_33 = arith.constant 5.000000e-01 : f32
    %52 = vector.broadcast %cst_33 : f32 to vector<8x1024xf32>
    %53 = arith.mulf %51, %52 : vector<8x1024xf32>
    %54 = math.tanh %53 : vector<8x1024xf32>
    %cst_34 = arith.constant 5.000000e-01 : f32
    %55 = vector.broadcast %cst_34 : f32 to vector<8x1024xf32>
    %56 = arith.mulf %55, %54 : vector<8x1024xf32>
    %cst_35 = arith.constant 5.000000e-01 : f32
    %57 = vector.broadcast %cst_35 : f32 to vector<8x1024xf32>
    %58 = arith.addf %56, %57 : vector<8x1024xf32>
    %59 = arith.mulf %51, %58 : vector<8x1024xf32>
    %60 = arith.truncf %59 : vector<8x1024xf32> to vector<8x1024xbf16>
    %c0_36 = arith.constant 0 : index
    %c0_37 = arith.constant 0 : index
    %c3072_38 = arith.constant 3072 : index
    %61 = vector.load %arg9[%c0_36, %c0_37, %c3072_38] : memref<2x8x4096xbf16, #tpu.memory_space<vmem>>, vector<1x8x1024xbf16>
    %62 = vector.shape_cast %61 : vector<1x8x1024xbf16> to vector<8x1024xbf16>
    %63 = vector.shape_cast %60 : vector<8x1024xbf16> to vector<1x8x1024xbf16>
    tpu.vector_store %arg9[%c0_36, %c0_37, %c3072_38], %63 {strides = array<i32>} : memref<2x8x4096xbf16, #tpu.memory_space<vmem>>, vector<1x8x1024xbf16>,
    %c0_i32_39 = arith.constant 0 : i32
    %c0_i32_40 = arith.constant 0 : i32
    %c0_i32_41 = arith.constant 0 : i32
    %c0_i32_42 = arith.constant 0 : i32
    %c0_i32_43 = arith.constant 0 : i32
    %64 = tpu.memref_slice %arg3[%c0_i32_39, %c0_i32_42, %c0_i32_43] : memref<2x4096x128xbf16, #tpu.memory_space<any>> -> memref<1x4096x128xbf16, #tpu.memory_space<any>>
    %65 = tpu.memref_squeeze %64 : memref<1x4096x128xbf16, #tpu.memory_space<any>> -> memref<4096x128xbf16, #tpu.memory_space<any>>
    %c0_i32_44 = arith.constant 0 : i32
    %c0_i32_45 = arith.constant 0 : i32
    %66 = tpu.memref_slice %arg8[%c0_i32_40, %c0_i32_44, %c0_i32_45] : memref<2x4096x128xbf16, #tpu.memory_space<vmem>> -> memref<1x4096x128xbf16, #tpu.memory_space<vmem>>
    %67 = tpu.memref_squeeze %66 : memref<1x4096x128xbf16, #tpu.memory_space<vmem>> -> memref<4096x128xbf16, #tpu.memory_space<vmem>>
    %68 = tpu.memref_slice %arg10[%c0_i32_41] : memref<2x!tpu.dma_semaphore, #tpu.memory_space<semaphore_mem>> -> memref<1x!tpu.dma_semaphore, #tpu.memory_space<semaphore_mem>>
    %69 = tpu.memref_squeeze %68 : memref<1x!tpu.dma_semaphore, #tpu.memory_space<semaphore_mem>> -> memref<!tpu.dma_semaphore, #tpu.memory_space<semaphore_mem>>
    tpu.wait_dma2 semaphore(%69 : memref<!tpu.dma_semaphore, #tpu.memory_space<semaphore_mem>>) src(%65 : memref<4096x128xbf16, #tpu.memory_space<any>>) dst(%67 : memref<4096x128xbf16, #tpu.memory_space<vmem>>)
    %c0_46 = arith.constant 0 : index
    %c0_47 = arith.constant 0 : index
    %c0_48 = arith.constant 0 : index
    %70 = vector.load %arg9[%c0_46, %c0_47, %c0_48] : memref<2x8x4096xbf16, #tpu.memory_space<vmem>>, vector<1x8x4096xbf16>
    %71 = vector.shape_cast %70 : vector<1x8x4096xbf16> to vector<8x4096xbf16>
    %c0_49 = arith.constant 0 : index
    %c0_50 = arith.constant 0 : index
    %c0_51 = arith.constant 0 : index
    %72 = vector.load %arg8[%c0_49, %c0_50, %c0_51] : memref<2x4096x128xbf16, #tpu.memory_space<vmem>>, vector<1x4096x128xbf16>
    %73 = vector.shape_cast %72 : vector<1x4096x128xbf16> to vector<4096x128xbf16>
    %cst_52 = arith.constant dense<0.000000e+00> : vector<8x128xf32>
    %74 = tpu.matmul %71, %73, %cst_52 {dimension_numbers = #tpu.dot_dimension_numbers<[1], [0], [0], [1], [0, 0, 1, 1], [], []>} : vector<8x4096xbf16>, vector<4096x128xbf16>, vector<8x128xf32> -> vector<8x128xf32>
    %c0_53 = arith.constant 0 : index
    %c0_54 = arith.constant 0 : index
    %75 = vector.load %arg2[%c0_53, %c0_54] : memref<8x4096xf32, #tpu.memory_space<vmem>>, vector<8x1024xf32>
    %cst_55 = arith.constant 5.000000e-01 : f32
    %76 = vector.broadcast %cst_55 : f32 to vector<8x1024xf32>
    %77 = arith.mulf %75, %76 : vector<8x1024xf32>
    %78 = math.tanh %77 : vector<8x1024xf32>
    %cst_56 = arith.constant 5.000000e-01 : f32
    %79 = vector.broadcast %cst_56 : f32 to vector<8x1024xf32>
    %80 = arith.mulf %79, %78 : vector<8x1024xf32>
    %cst_57 = arith.constant 5.000000e-01 : f32
    %81 = vector.broadcast %cst_57 : f32 to vector<8x1024xf32>
    %82 = arith.addf %80, %81 : vector<8x1024xf32>
    %83 = arith.mulf %75, %82 : vector<8x1024xf32>
    %84 = arith.truncf %83 : vector<8x1024xf32> to vector<8x1024xbf16>
    %c1 = arith.constant 1 : index
    %c0_58 = arith.constant 0 : index
    %c0_59 = arith.constant 0 : index
    %85 = vector.load %arg9[%c1, %c0_58, %c0_59] : memref<2x8x4096xbf16, #tpu.memory_space<vmem>>, vector<1x8x1024xbf16>
    %86 = vector.shape_cast %85 : vector<1x8x1024xbf16> to vector<8x1024xbf16>
    %87 = vector.shape_cast %84 : vector<8x1024xbf16> to vector<1x8x1024xbf16>
    tpu.vector_store %arg9[%c1, %c0_58, %c0_59], %87 {strides = array<i32>} : memref<2x8x4096xbf16, #tpu.memory_space<vmem>>, vector<1x8x1024xbf16>,
    %c0_60 = arith.constant 0 : index
    %c1024_61 = arith.constant 1024 : index
    %88 = vector.load %arg2[%c0_60, %c1024_61] : memref<8x4096xf32, #tpu.memory_space<vmem>>, vector<8x1024xf32>
    %cst_62 = arith.constant 5.000000e-01 : f32
    %89 = vector.broadcast %cst_62 : f32 to vector<8x1024xf32>
    %90 = arith.mulf %88, %89 : vector<8x1024xf32>
    %91 = math.tanh %90 : vector<8x1024xf32>
    %cst_63 = arith.constant 5.000000e-01 : f32
    %92 = vector.broadcast %cst_63 : f32 to vector<8x1024xf32>
    %93 = arith.mulf %92, %91 : vector<8x1024xf32>
    %cst_64 = arith.constant 5.000000e-01 : f32
    %94 = vector.broadcast %cst_64 : f32 to vector<8x1024xf32>
    %95 = arith.addf %93, %94 : vector<8x1024xf32>
    %96 = arith.mulf %88, %95 : vector<8x1024xf32>
    %97 = arith.truncf %96 : vector<8x1024xf32> to vector<8x1024xbf16>
    %c1_65 = arith.constant 1 : index
    %c0_66 = arith.constant 0 : index
    %c1024_67 = arith.constant 1024 : index
    %98 = vector.load %arg9[%c1_65, %c0_66, %c1024_67] : memref<2x8x4096xbf16, #tpu.memory_space<vmem>>, vector<1x8x1024xbf16>
    %99 = vector.shape_cast %98 : vector<1x8x1024xbf16> to vector<8x1024xbf16>
    %100 = vector.shape_cast %97 : vector<8x1024xbf16> to vector<1x8x1024xbf16>
    tpu.vector_store %arg9[%c1_65, %c0_66, %c1024_67], %100 {strides = array<i32>} : memref<2x8x4096xbf16, #tpu.memory_space<vmem>>, vector<1x8x1024xbf16>,
    %c0_68 = arith.constant 0 : index
    %c2048_69 = arith.constant 2048 : index
    %101 = vector.load %arg2[%c0_68, %c2048_69] : memref<8x4096xf32, #tpu.memory_space<vmem>>, vector<8x1024xf32>
    %cst_70 = arith.constant 5.000000e-01 : f32
    %102 = vector.broadcast %cst_70 : f32 to vector<8x1024xf32>
    %103 = arith.mulf %101, %102 : vector<8x1024xf32>
    %104 = math.tanh %103 : vector<8x1024xf32>
    %cst_71 = arith.constant 5.000000e-01 : f32
    %105 = vector.broadcast %cst_71 : f32 to vector<8x1024xf32>
    %106 = arith.mulf %105, %104 : vector<8x1024xf32>
    %cst_72 = arith.constant 5.000000e-01 : f32
    %107 = vector.broadcast %cst_72 : f32 to vector<8x1024xf32>
    %108 = arith.addf %106, %107 : vector<8x1024xf32>
    %109 = arith.mulf %101, %108 : vector<8x1024xf32>
    %110 = arith.truncf %109 : vector<8x1024xf32> to vector<8x1024xbf16>
    %c1_73 = arith.constant 1 : index
    %c0_74 = arith.constant 0 : index
    %c2048_75 = arith.constant 2048 : index
    %111 = vector.load %arg9[%c1_73, %c0_74, %c2048_75] : memref<2x8x4096xbf16, #tpu.memory_space<vmem>>, vector<1x8x1024xbf16>
    %112 = vector.shape_cast %111 : vector<1x8x1024xbf16> to vector<8x1024xbf16>
    %113 = vector.shape_cast %110 : vector<8x1024xbf16> to vector<1x8x1024xbf16>
    tpu.vector_store %arg9[%c1_73, %c0_74, %c2048_75], %113 {strides = array<i32>} : memref<2x8x4096xbf16, #tpu.memory_space<vmem>>, vector<1x8x1024xbf16>,
    %c0_76 = arith.constant 0 : index
    %c3072_77 = arith.constant 3072 : index
    %114 = vector.load %arg2[%c0_76, %c3072_77] : memref<8x4096xf32, #tpu.memory_space<vmem>>, vector<8x1024xf32>
    %cst_78 = arith.constant 5.000000e-01 : f32
    %115 = vector.broadcast %cst_78 : f32 to vector<8x1024xf32>
    %116 = arith.mulf %114, %115 : vector<8x1024xf32>
    %117 = math.tanh %116 : vector<8x1024xf32>
    %cst_79 = arith.constant 5.000000e-01 : f32
    %118 = vector.broadcast %cst_79 : f32 to vector<8x1024xf32>
    %119 = arith.mulf %118, %117 : vector<8x1024xf32>
    %cst_80 = arith.constant 5.000000e-01 : f32
    %120 = vector.broadcast %cst_80 : f32 to vector<8x1024xf32>
    %121 = arith.addf %119, %120 : vector<8x1024xf32>
    %122 = arith.mulf %114, %121 : vector<8x1024xf32>
    %123 = arith.truncf %122 : vector<8x1024xf32> to vector<8x1024xbf16>
    %c1_81 = arith.constant 1 : index
    %c0_82 = arith.constant 0 : index
    %c3072_83 = arith.constant 3072 : index
    %124 = vector.load %arg9[%c1_81, %c0_82, %c3072_83] : memref<2x8x4096xbf16, #tpu.memory_space<vmem>>, vector<1x8x1024xbf16>
    %125 = vector.shape_cast %124 : vector<1x8x1024xbf16> to vector<8x1024xbf16>
    %126 = vector.shape_cast %123 : vector<8x1024xbf16> to vector<1x8x1024xbf16>
    tpu.vector_store %arg9[%c1_81, %c0_82, %c3072_83], %126 {strides = array<i32>} : memref<2x8x4096xbf16, #tpu.memory_space<vmem>>, vector<1x8x1024xbf16>,
    %c1_i32_84 = arith.constant 1 : i32
    %c1_i32_85 = arith.constant 1 : i32
    %c1_i32_86 = arith.constant 1 : i32
    %c0_i32_87 = arith.constant 0 : i32
    %c0_i32_88 = arith.constant 0 : i32
    %127 = tpu.memref_slice %arg3[%c1_i32_84, %c0_i32_87, %c0_i32_88] : memref<2x4096x128xbf16, #tpu.memory_space<any>> -> memref<1x4096x128xbf16, #tpu.memory_space<any>>
    %128 = tpu.memref_squeeze %127 : memref<1x4096x128xbf16, #tpu.memory_space<any>> -> memref<4096x128xbf16, #tpu.memory_space<any>>
    %c0_i32_89 = arith.constant 0 : i32
    %c0_i32_90 = arith.constant 0 : i32
    %129 = tpu.memref_slice %arg8[%c1_i32_85, %c0_i32_89, %c0_i32_90] : memref<2x4096x128xbf16, #tpu.memory_space<vmem>> -> memref<1x4096x128xbf16, #tpu.memory_space<vmem>>
    %130 = tpu.memref_squeeze %129 : memref<1x4096x128xbf16, #tpu.memory_space<vmem>> -> memref<4096x128xbf16, #tpu.memory_space<vmem>>
    %131 = tpu.memref_slice %arg10[%c1_i32_86] : memref<2x!tpu.dma_semaphore, #tpu.memory_space<semaphore_mem>> -> memref<1x!tpu.dma_semaphore, #tpu.memory_space<semaphore_mem>>
    %132 = tpu.memref_squeeze %131 : memref<1x!tpu.dma_semaphore, #tpu.memory_space<semaphore_mem>> -> memref<!tpu.dma_semaphore, #tpu.memory_space<semaphore_mem>>
    tpu.wait_dma2 semaphore(%132 : memref<!tpu.dma_semaphore, #tpu.memory_space<semaphore_mem>>) src(%128 : memref<4096x128xbf16, #tpu.memory_space<any>>) dst(%130 : memref<4096x128xbf16, #tpu.memory_space<vmem>>)
    %c1_91 = arith.constant 1 : index
    %c0_92 = arith.constant 0 : index
    %c0_93 = arith.constant 0 : index
    %133 = vector.load %arg9[%c1_91, %c0_92, %c0_93] : memref<2x8x4096xbf16, #tpu.memory_space<vmem>>, vector<1x8x4096xbf16>
    %134 = vector.shape_cast %133 : vector<1x8x4096xbf16> to vector<8x4096xbf16>
    %c1_94 = arith.constant 1 : index
    %c0_95 = arith.constant 0 : index
    %c0_96 = arith.constant 0 : index
    %135 = vector.load %arg8[%c1_94, %c0_95, %c0_96] : memref<2x4096x128xbf16, #tpu.memory_space<vmem>>, vector<1x4096x128xbf16>
    %136 = vector.shape_cast %135 : vector<1x4096x128xbf16> to vector<4096x128xbf16>
    %cst_97 = arith.constant dense<0.000000e+00> : vector<8x128xf32>
    %137 = tpu.matmul %134, %136, %cst_97 {dimension_numbers = #tpu.dot_dimension_numbers<[1], [0], [0], [1], [0, 0, 1, 1], [], []>} : vector<8x4096xbf16>, vector<4096x128xbf16>, vector<8x128xf32> -> vector<8x128xf32>
    %138 = arith.addf %74, %137 : vector<8x128xf32>
    %c0_98 = arith.constant 0 : index
    %c0_99 = arith.constant 0 : index
    %139 = vector.load %arg4[%c0_98, %c0_99] : memref<1x128xf32, #tpu.memory_space<vmem>>, vector<1x128xf32>
    %140 = vector.broadcast %139 : vector<1x128xf32> to vector<8x128xf32>
    %141 = arith.addf %138, %140 : vector<8x128xf32>
    %cst_100 = arith.constant 5.000000e-01 : f32
    %142 = vector.broadcast %cst_100 : f32 to vector<8x128xf32>
    %143 = arith.mulf %141, %142 : vector<8x128xf32>
    %144 = math.tanh %143 : vector<8x128xf32>
    %cst_101 = arith.constant 5.000000e-01 : f32
    %145 = vector.broadcast %cst_101 : f32 to vector<8x128xf32>
    %146 = arith.mulf %145, %144 : vector<8x128xf32>
    %cst_102 = arith.constant 5.000000e-01 : f32
    %147 = vector.broadcast %cst_102 : f32 to vector<8x128xf32>
    %148 = arith.addf %146, %147 : vector<8x128xf32>
    %149 = arith.mulf %141, %148 : vector<8x128xf32>
    %c0_103 = arith.constant 0 : index
    %c0_104 = arith.constant 0 : index
    %150 = vector.load %arg5[%c0_103, %c0_104] : memref<1x128xf32, #tpu.memory_space<vmem>>, vector<1x128xf32>
    %151 = vector.broadcast %150 : vector<1x128xf32> to vector<8x128xf32>
    %152 = arith.mulf %149, %151 : vector<8x128xf32>
    %cst_105 = arith.constant dense<0.000000e+00> : vector<8xf32>
    %153 = vector.multi_reduction <add>, %152, %cst_105 [1] : vector<8x128xf32> to vector<8xf32>
    %154 = vector.shape_cast %153 : vector<8xf32> to vector<8x1xf32>
    %c0_106 = arith.constant 0 : index
    %155 = memref.load %arg6[%c0_106] : memref<1xf32, #tpu.memory_space<smem>>
    %156 = vector.broadcast %155 : f32 to vector<8x1xf32>
    %157 = arith.addf %154, %156 : vector<8x1xf32>
    %c0_107 = arith.constant 0 : index
    %c0_108 = arith.constant 0 : index
    %158 = vector.load %arg7[%c0_107, %c0_108] : memref<8x1xf32, #tpu.memory_space<vmem>>, vector<8x1xf32>
    tpu.vector_store %arg7[%c0_107, %c0_108], %157 {strides = array<i32>} : memref<8x1xf32, #tpu.memory_space<vmem>>, vector<8x1xf32>,
    return
  }
  func.func @transform_0(%arg0: i32) -> (i32, i32) {
    %c0_i32 = arith.constant 0 : i32
    %c0_i32_0 = arith.constant 0 : i32
    %c0_i32_1 = arith.constant 0 : i32
    return %c0_i32, %c0_i32_0 : i32, i32
  }
  func.func @transform_1(%arg0: i32) -> (i32, i32) {
    %c0_i32 = arith.constant 0 : i32
    %c0_i32_0 = arith.constant 0 : i32
    %c0_i32_1 = arith.constant 0 : i32
    return %c0_i32, %c0_i32_0 : i32, i32
  }
  func.func @transform_3(%arg0: i32) -> (i32, i32) {
    %c0_i32 = arith.constant 0 : i32
    %c0_i32_0 = arith.constant 0 : i32
    %c0_i32_1 = arith.constant 0 : i32
    return %c0_i32, %c0_i32_0 : i32, i32
  }
  func.func @transform_4(%arg0: i32) -> (i32, i32) {
    %c0_i32 = arith.constant 0 : i32
    %c0_i32_0 = arith.constant 0 : i32
    %c0_i32_1 = arith.constant 0 : i32
    return %c0_i32, %c0_i32_0 : i32, i32
  }
  func.func @transform_5(%arg0: i32) -> i32 {
    %c0_i32 = arith.constant 0 : i32
    %c0_i32_0 = arith.constant 0 : i32
    return %c0_i32 : i32
  }
  func.func @transform_6(%arg0: i32) -> (i32, i32) {
    %c0_i32 = arith.constant 0 : i32
    %c0_i32_0 = arith.constant 0 : i32
    %c0_i32_1 = arith.constant 0 : i32
    return %c0_i32, %c0_i32_0 : i32, i32
  }
}

</mosaic_0001>

<bundles_post_ra>
// kernel: tpu_custom_call.1
= control target key start
LH: loop header
LB: loop body
LE: loop exit
PB: predicated region body
PF: predicated region fallthrough
CT: control target
= control target key end

     0   :  { %12 = vsyncpa [#allocation7], 0  ;;  %s5537_s0 = inlined_call_operand.hbm [shape: f32[8,4096], index: 0, kind: input, shape index: {}]   ;;  %s5538_s1 = inlined_call_operand.hbm [shape: f32[8,4096], index: 1, kind: input, shape index: {}]   ;;  %s5539_s2 = inlined_call_operand.hbm [shape: bf16[2,4096,128], index: 2, kind: input, shape index: {}]   ;;  %s5540_s3 = inlined_call_operand.hbm [shape: f32[1,128], index: 3, kind: input, shape index: {}]   ;;  %s5541_s4 = inlined_call_operand.hbm [shape: f32[1,128], index: 4, kind: input, shape index: {}]   ;;  %s5542_s5 = inlined_call_operand.<no memory space> [shape: f32[1], index: 5, kind: input, shape index: {}]   ;;  %s5543_s6 = inlined_call_operand.vmem [shape: f32[8,1], index: 6, kind: output, shape index: {}]  }
   0x1   :  { %13 = vsyncpa [#allocation9], 0 }
   0x2   :  { %14 = vsyncpa [#allocation12], 0  ;;  %s4051_s21 = smov [#allocation8]   ;;  %s4052_s23 = smov [#allocation6]  }
   0x3   :  { %s31_s22 = sshll.u32 %s4051_s21, 4  ;;  %s21_s24 = sshll.u32 %s4052_s23, 4  ;;  %s32_s22 = int_to_ptr.vmem [resolvable:$true] %s31_s22  ;;  %s22_s24 = int_to_ptr.vmem [resolvable:$true] %s21_s24 }
   0x4   :  { %s3906_s27 = scalar_lea.hbm %s5538_s1, 4096 }
   0x5   :  { %p3907_p0 = scmp.ne.s32.totalorder %s5538_s1, %s3906_s27  ;;  %p3910_p1 = scmp.lt.u32.totalorder %s3906_s27, %s5538_s1 }
   0x7   :  { %p3912_p2 = pnand %p3910_p1, %p3907_p0 }
   0x9   :  { %3915 = shalt.err (!%p3912_p2)
}
   0xa   :  { %s3916_s8 = scalar_lea.vmem %s32_s22, 4096  ;;  %p3921_p4 = scmp.lt.s32.totalorder %s32_s22, %s32_s22 }
   0xb   :  { %p3917_p3 = scmp.ne.s32.totalorder %s32_s22, %s3916_s8  ;;  %p3922_p5 = scmp.lt.s32.totalorder %s3916_s8, %s3916_s8 }
   0xd   :  { %p3923_p6 = por %p3922_p5, %p3921_p4 }
   0xf   :  { %p3924_p7 = pnand %p3923_p6, %p3917_p3 }
  0x11   :  { %3927 = shalt.err (!%p3924_p7)
}
  0x12   :  { %34 = dma.hbm_to_vmem [thread:$0]  %s5538_s1, 4096, %s32_s22, [#allocation9]  }
  0x13   :  { %s3928_s13 = scalar_lea.hbm %s5537_s0, 4096 }
  0x14   :  { %p3929_p8 = scmp.ne.s32.totalorder %s5537_s0, %s3928_s13  ;;  %p3932_p9 = scmp.lt.u32.totalorder %s3928_s13, %s5537_s0 }
  0x16   :  { %p3934_p10 = pnand %p3932_p9, %p3929_p8 }
  0x18   :  { %3937 = shalt.err (!%p3934_p10)
}
  0x19   :  { %s3938_s18 = scalar_lea.vmem %s22_s24, 4096  ;;  %p3943_p12 = scmp.lt.s32.totalorder %s22_s24, %s22_s24 }
  0x1a   :  { %p3939_p11 = scmp.ne.s32.totalorder %s22_s24, %s3938_s18  ;;  %p3944_p13 = scmp.lt.s32.totalorder %s3938_s18, %s3938_s18 }
  0x1c   :  { %p3945_p0 = por %p3944_p13, %p3943_p12 }
  0x1e   :  { %p3946_p1 = pnand %p3945_p0, %p3939_p11 }
  0x20   :  { %3949 = shalt.err (!%p3946_p1)
}
  0x21   :  { %24 = dma.hbm_to_vmem [thread:$0]  %s5537_s0, 4096, %s22_s24, [#allocation7]  }
  0x22   :  { %s4053_s20 = smov [#allocation10]   ;;  %s4054_s22 = smov [#allocation11]  }
  0x23   :  { %s41_s21 = sshll.u32 %s4053_s20, 4  ;;  %s51_s23 = sshll.u32 %s4054_s22, 4  ;;  %s42_s21 = int_to_ptr.vmem [resolvable:$true] %s41_s21  ;;  %s52_s23 = int_to_ptr.vmem [resolvable:$true] %s51_s23 }
  0x24   :  { %s3950_s27 = scalar_lea.hbm %s5540_s3, 16 }
  0x25   :  { %p3951_p2 = scmp.ne.s32.totalorder %s5540_s3, %s3950_s27  ;;  %p3954_p3 = scmp.lt.u32.totalorder %s3950_s27, %s5540_s3 }
  0x27   :  { %p3956_p4 = pnand %p3954_p3, %p3951_p2 }
  0x29   :  { %3959 = shalt.err (!%p3956_p4)
}
  0x2a   :  { %s3960_s0 = scalar_lea.vmem %s42_s21, 16  ;;  %s3964_s24 = scalar_lea.vmem %s42_s21, 32 }
  0x2b   :  { %p3961_p5 = scmp.ne.s32.totalorder %s42_s21, %s3960_s0  ;;  %p3965_p6 = scmp.lt.s32.totalorder %s42_s21, %s42_s21 }
  0x2c   :  { %p3966_p7 = scmp.lt.s32.totalorder %s3964_s24, %s3960_s0 }
  0x2e   :  { %p3967_p8 = por %p3966_p7, %p3965_p6 }
  0x30   :  { %p3968_p9 = pnand %p3967_p8, %p3961_p5 }
  0x32   :  { %3971 = shalt.err (!%p3968_p9)
}
  0x33   :  { %44 = dma.hbm_to_vmem [thread:$0]  %s5540_s3, 16, %s42_s21, [#allocation9]  }
  0x34   :  { %s3972_s12 = scalar_lea.hbm %s5541_s4, 16 }
  0x35   :  { %p3973_p10 = scmp.ne.s32.totalorder %s5541_s4, %s3972_s12  ;;  %p3976_p11 = scmp.lt.u32.totalorder %s3972_s12, %s5541_s4 }
  0x37   :  { %p3978_p12 = pnand %p3976_p11, %p3973_p10 }
  0x39   :  { %3981 = shalt.err (!%p3978_p12)
}
  0x3a   :  { %s3982_s17 = scalar_lea.vmem %s52_s23, 16  ;;  %s3986_s18 = scalar_lea.vmem %s52_s23, 32 }
  0x3b   :  { %p3983_p13 = scmp.ne.s32.totalorder %s52_s23, %s3982_s17  ;;  %p3987_p0 = scmp.lt.s32.totalorder %s52_s23, %s52_s23 }
  0x3c   :  { %p3988_p1 = scmp.lt.s32.totalorder %s3986_s18, %s3982_s17 }
  0x3e   :  { %p3989_p2 = por %p3988_p1, %p3987_p0 }
  0x40   :  { %p3990_p3 = pnand %p3989_p2, %p3983_p13 }
  0x42   :  { %3993 = shalt.err (!%p3990_p3)
}
  0x43   :  { %54 = dma.hbm_to_vmem [thread:$0]  %s5541_s4, 16, %s52_s23, [#allocation12]  }
  0x44   :  { %4041 = dma.done.wait [#allocation7], 4096  }
  0x45   :  { %4042 = vsyncadd [#allocation7], 4294963200 }
  0x46   :  { %4043 = dma.done.wait [#allocation9], 4112  }
  0x47   :  { %4044 = vsyncadd [#allocation9], 4294963184 }
  0x48   :  { %4045 = dma.done.wait [#allocation12], 16  }
  0x49   :  { %4046 = vsyncadd [#allocation12], 4294967280  ;;  %s4143_s21 = scalar_lea.hbm %s5539_s2, 32768  ;;  %s4055_s22 = smov [#allocation2]  }
  0x4a   :  { %s77_s25 = sshll.u32 %s4055_s22, 4  ;;  %s4056_s4 = smov [#allocation2 + $0x800]   ;;  %s4145_s25 = int_to_ptr.vmem [resolvable:$true] %s77_s25 }
  0x4b   :  { %s91_s23 = sshll.u32 %s4056_s4, 4  ;;  %p3995_p4 = scmp.ne.s32.totalorder %s5539_s2, %s4143_s21  ;;  %s92_s23 = int_to_ptr.vmem [resolvable:$true] %s91_s23 }
  0x4c   :  { %s3996_s30 = scalar_lea.hbm %s5539_s2, 65536  ;;  %p3998_p6 = scmp.lt.u32.totalorder %s4143_s21, %s5539_s2 }
  0x4d   :  { %p3997_p5 = scmp.lt.u32.totalorder %s3996_s30, %s4143_s21 }
  0x4f   :  { %p3999_p7 = por %p3998_p6, %p3997_p5 }
  0x51   :  { %p4000_p8 = pnand %p3999_p7, %p3995_p4 }
  0x53   :  { %4003 = shalt.err (!%p4000_p8)  }
  0x54   :  { %s4004_s9 = scalar_lea.vmem %s4145_s25, 32768  ;;  %s4008_s10 = scalar_lea.vmem %s4145_s25, 65536 }
  0x55   :  { %p4005_p9 = scmp.ne.s32.totalorder %s4145_s25, %s4004_s9  ;;  %p4009_p10 = scmp.lt.s32.totalorder %s4145_s25, %s4145_s25 }
  0x56   :  { %p4010_p11 = scmp.lt.s32.totalorder %s4008_s10, %s4004_s9 }
  0x58   :  { %p4011_p12 = por %p4010_p11, %p4009_p10 }
  0x5a   :  { %p4012_p13 = pnand %p4011_p12, %p4005_p9 }
  0x5c   :  { %4015 = shalt.err (!%p4012_p13)  }
  0x5d   :  { %80 = dma.hbm_to_vmem [thread:$0]  %s5539_s2, 32768, %s4145_s25, [#allocation4] }
  0x5e   :  { %p4017_p0 = scmp.ne.s32.totalorder %s4143_s21, %s3996_s30  ;;  %p4020_p1 = scmp.lt.u32.totalorder %s3996_s30, %s3996_s30 }
  0x60   :  { %p4021_p2 = por %p4020_p1, %p3998_p6 }
  0x62   :  { %p4023_p3 = por %p4021_p2, %p3997_p5 }
  0x64   :  { %p4024_p4 = pnand %p4023_p3, %p4017_p0 }
  0x66   :  { %4027 = shalt.err (!%p4024_p4)  }
  0x67   :  { %s4028_s15 = scalar_lea.vmem %s92_s23, 32768  ;;  %p4033_p8 = scmp.lt.s32.totalorder %s92_s23, %s4145_s25 }
  0x68   :  { %p4029_p7 = scmp.ne.s32.totalorder %s92_s23, %s4028_s15  ;;  %p4034_p9 = scmp.lt.s32.totalorder %s4008_s10, %s4028_s15 }
  0x6a   :  { %p4035_p10 = por %p4034_p9, %p4033_p8 }
  0x6c   :  { %p4036_p11 = pnand %p4035_p10, %p4029_p7 }
  0x6e   :  { %4039 = shalt.err (!%p4036_p11)  }
  0x6f   :  { %94 = dma.hbm_to_vmem [thread:$0]  %s4143_s21, 32768, %s92_s23, [#allocation4 + $0x1]  ;;  %v4185_v0 = vld [vmem:[#allocation6] sm:$0xff]  ;;  %v4187_v1 = vld [vmem:[#allocation6 + $0x8] sm:$0xff]  ;;  %v4189_v2 = vld [vmem:[#allocation6 + $0x10] sm:$0xff] }
  0x70   :  { %v4191_v3 = vld [vmem:[#allocation6 + $0x18] sm:$0xff]  ;;  %v4193_v4 = vld [vmem:[#allocation6 + $0x20] sm:$0xff]  ;;  %v4195_v5 = vld [vmem:[#allocation6 + $0x28] sm:$0xff]  ;;  %v103_v6 = vmul.f32 0.5, %v4185_v0  ;;  %v104_v7 = vmul.f32 0.5, %v4187_v1  ;;  %v105_v8 = vmul.f32 0.5, %v4189_v2 }
  0x71   :  { %v4200_v9 = vld [vmem:[#allocation6 + $0x30] sm:$0xff]  ;;  %v106_v10 = vmul.f32 0.5, %v4191_v3  ;;  %v4203_v11 = vld [vmem:[#allocation6 + $0x38] sm:$0xff]  ;;  %v107_v12 = vmul.f32 0.5, %v4193_v4  ;;  %v108_v13 = vmul.f32 0.5, %v4195_v5  ;;  %v4207_v14 = vld [vmem:[#allocation6 + $0x40] sm:$0xff] }
  0x72   :  { %3776 = vtanh.f32 %v103_v6  ;;  %v109_v15 = vmul.f32 0.5, %v4200_v9  ;;  %v4210_v16 = vld [vmem:[#allocation6 + $0x48] sm:$0xff]  ;;  %v4212_v17 = vld [vmem:[#allocation6 + $0x50] sm:$0xff]  ;;  %v110_v18 = vmul.f32 0.5, %v4203_v11  ;;  %v4215_v19 = vld [vmem:[#allocation6 + $0x58] sm:$0xff]  ;;  %v187_v24 = vmul.f32 0.5, %v4207_v14 }
  0x73   :  { %3778 = vtanh.f32 %v104_v7  ;;  %v4217_v20 = vld [vmem:[#allocation6 + $0x60] sm:$0xff]  ;;  %v4219_v21 = vld [vmem:[#allocation6 + $0x68] sm:$0xff]  ;;  %v4221_v22 = vld [vmem:[#allocation6 + $0x70] sm:$0xff]  ;;  %v188_v26 = vmul.f32 0.5, %v4210_v16  ;;  %v189_v27 = vmul.f32 0.5, %v4212_v17  ;;  %v190_v31 = vmul.f32 0.5, %v4215_v19 }
  0x74   :  { %3780 = vtanh.f32 %v105_v8  ;;  %v4223_v23 = vld [vmem:[#allocation6 + $0x78] sm:$0xff]  ;;  %v4226_v25 = vld [vmem:[#allocation6 + $0x80] sm:$0xff]  ;;  %v4230_v28 = vld [vmem:[#allocation6 + $0x88] sm:$0xff]  ;;  %v191_v32 = vmul.f32 0.5, %v4217_v20  ;;  %v192_v33 = vmul.f32 0.5, %v4219_v21  ;;  %v193_v37 = vmul.f32 0.5, %v4221_v22 }
  0x75   :  { %3782 = vtanh.f32 %v106_v10  ;;  %v4232_v29 = vld [vmem:[#allocation6 + $0x90] sm:$0xff]  ;;  %v4234_v30 = vld [vmem:[#allocation6 + $0x98] sm:$0xff]  ;;  %v4239_v34 = vld [vmem:[#allocation6 + $0xa0] sm:$0xff]  ;;  %v194_v38 = vmul.f32 0.5, %v4223_v23  ;;  %v271_v40 = vmul.f32 0.5, %v4226_v25  ;;  %v272_v43 = vmul.f32 0.5, %v4230_v28 }
  0x76   :  { %3784 = vtanh.f32 %v107_v12  ;;  %v4241_v35 = vld [vmem:[#allocation6 + $0xa8] sm:$0xff]  ;;  %v4243_v36 = vld [vmem:[#allocation6 + $0xb0] sm:$0xff]  ;;  %v4247_v39 = vld [vmem:[#allocation6 + $0xb8] sm:$0xff]  ;;  %v273_v44 = vmul.f32 0.5, %v4232_v29  ;;  %v274_v45 = vmul.f32 0.5, %v4234_v30  ;;  %v275_v48 = vmul.f32 0.5, %v4239_v34 }
  0x77   :  { %3786 = vtanh.f32 %v108_v13  ;;  %v4250_v41 = vld [vmem:[#allocation6 + $0xc0] sm:$0xff]  ;;  %v4252_v42 = vld [vmem:[#allocation6 + $0xc8] sm:$0xff]  ;;  %v4257_v46 = vld [vmem:[#allocation6 + $0xd0] sm:$0xff]  ;;  %v4263_v49 = vmul.f32 0.5, %v4241_v35  ;;  %v4266_v50 = vmul.f32 0.5, %v4243_v36  ;;  %v4273_v54 = vmul.f32 0.5, %v4247_v39 }
  0x78   :  { %3788 = vtanh.f32 %v109_v15  ;;  %v4259_v47 = vld [vmem:[#allocation6 + $0xd8] sm:$0xff]  ;;  %v4268_v51 = vld [vmem:[#allocation6 + $0xe0] sm:$0xff]  ;;  %v4270_v52 = vld [vmem:[#allocation6 + $0xe8] sm:$0xff]  ;;  %v4278_v56 = vmul.f32 0.5, %v4250_v41  ;;  %v4281_v57 = vmul.f32 0.5, %v4252_v42  ;;  %v4286_v61 = vmul.f32 0.5, %v4257_v46 }
  0x79   :  { %3790 = vtanh.f32 %v110_v18  ;;  %5550 = vst [vmem:[#allocation24_spill] sm:$0xff] %v4270_v52  ;;  %v4275_v55 = vld [vmem:[#allocation6 + $0xf0] sm:$0xff]  ;;  %v4283_v60 = vld [vmem:[#allocation6 + $0xf8] sm:$0xff]  ;;  %v4289_v62 = vmul.f32 0.5, %v4259_v47  ;;  %v4292_v7 = vmul.f32 0.5, %v4268_v51  ;;  %v4295_v8 = vmul.f32 0.5, %v4270_v52 }
  0x7a   :  { %3792 = vtanh.f32 %v187_v24  ;;  %5551 = vst [vmem:[#allocation25_spill] sm:$0xff] %v4275_v55  ;;  %5552 = vst [vmem:[#allocation26_spill] sm:$0xff] %v4283_v60  ;;  %v4298_v15 = vmul.f32 0.5, %v4275_v55 }
  0x7b   :  { %3794 = vtanh.f32 %v188_v26 }
  0x7c   :  { %v3777_v53 = vpop.eup %3776  ;;  %3796 = vtanh.f32 %v189_v27  ;;  %v4301_v27 = vmul.f32 0.5, %v4283_v60 }
  0x7d   :  { %v3779_v58 = vpop.eup %3778  ;;  %v119_v59 = vmul.f32 0.5, %v3777_v53  ;;  %3798 = vtanh.f32 %v190_v31 }
  0x7e   :  { %v3781_v63 = vpop.eup %3780  ;;  %v120_v6 = vmul.f32 0.5, %v3779_v58  ;;  %3800 = vtanh.f32 %v191_v32 }
  0x7f   :  { %v3783_v10 = vpop.eup %3782  ;;  %v121_v12 = vmul.f32 0.5, %v3781_v63  ;;  %v127_v13 = vadd.f32 0.5, %v119_v59  ;;  %3802 = vtanh.f32 %v192_v33 }
  0x80   :  { %v3785_v18 = vpop.eup %3784  ;;  %v122_v24 = vmul.f32 0.5, %v3783_v10  ;;  %v128_v26 = vadd.f32 0.5, %v120_v6  ;;  %3804 = vtanh.f32 %v193_v37 }
  0x81   :  { %v3787_v31 = vpop.eup %3786  ;;  %v123_v32 = vmul.f32 0.5, %v3785_v18  ;;  %v129_v53 = vadd.f32 0.5, %v121_v12  ;;  %v4304_v58 = vmul.f32 %v127_v13, %v4185_v0  ;;  %3806 = vtanh.f32 %v194_v38 }
  0x82   :  { %v3789_v63 = vpop.eup %3788  ;;  %v124_v59 = vmul.f32 0.5, %v3787_v31  ;;  %v130_v33 = vadd.f32 0.5, %v122_v24  ;;  %v4307_v55 = vmul.f32 %v128_v26, %v4187_v1  ;;  %3808 = vtanh.f32 %v271_v40 }
  0x83   :  { %5553 = vst [vmem:[#allocation27_spill] sm:$0xff] %v4304_v58  ;;  %v3791_v10 = vpop.eup %3790  ;;  %v125_v6 = vmul.f32 0.5, %v3789_v63  ;;  %v131_v37 = vadd.f32 0.5, %v123_v32  ;;  %v4310_v60 = vmul.f32 %v129_v53, %v4189_v2  ;;  %3810 = vtanh.f32 %v272_v43 }
  0x84   :  { %5554 = vst [vmem:[#allocation28_spill] sm:$0xff] %v4307_v55  ;;  %v3793_v18 = vpop.eup %3792  ;;  %v126_v12 = vmul.f32 0.5, %v3791_v10  ;;  %v132_v52 = vadd.f32 0.5, %v124_v59  ;;  %v4313_v0 = vmul.f32 %v130_v33, %v4191_v3  ;;  %3812 = vtanh.f32 %v273_v44 }
  0x85   :  { %5555 = vst [vmem:[#allocation29_spill] sm:$0xff] %v4310_v60  ;;  %v3795_v38 = vpop.eup %3794  ;;  %v133_v13 = vadd.f32 0.5, %v125_v6  ;;  %v4316_v1 = vmul.f32 %v131_v37, %v4193_v4  ;;  %v203_v40 = vmul.f32 0.5, %v3793_v18  ;;  %3814 = vtanh.f32 %v274_v45 }
  0x86   :  { %5556 = vst [vmem:[#allocation30_spill] sm:$0xff] %v4313_v0  ;;  %v3797_v24 = vpop.eup %3796  ;;  %v134_v26 = vadd.f32 0.5, %v126_v12  ;;  %v4319_v2 = vmul.f32 %v132_v52, %v4195_v5  ;;  %v204_v43 = vmul.f32 0.5, %v3795_v38  ;;  %3816 = vtanh.f32 %v275_v48 }
  0x87   :  { %5557 = vst [vmem:[#allocation31_spill] sm:$0xff] %v4316_v1  ;;  %v3799_v31 = vpop.eup %3798  ;;  %v4322_v32 = vmul.f32 %v133_v13, %v4200_v9  ;;  %v205_v3 = vmul.f32 0.5, %v3797_v24  ;;  %v211_v44 = vadd.f32 0.5, %v203_v40  ;;  %3818 = vtanh.f32 %v4263_v49 }
  0x88   :  { %5558 = vst [vmem:[#allocation32_spill] sm:$0xff] %v4319_v2  ;;  %v3801_v53 = vpop.eup %3800  ;;  %v4326_v4 = vmul.f32 %v134_v26, %v4203_v11  ;;  %v206_v45 = vmul.f32 0.5, %v3799_v31  ;;  %v212_v63 = vadd.f32 0.5, %v204_v43  ;;  %3820 = vtanh.f32 %v4266_v50 }
  0x89   :  { %5559 = vst [vmem:[#allocation33_spill] sm:$0xff] %v4322_v32  ;;  %v3803_v5 = vpop.eup %3802  ;;  %v207_v52 = vmul.f32 0.5, %v3801_v53  ;;  %v213_v59 = vadd.f32 0.5, %v205_v3  ;;  %v4330_v48 = vmul.f32 %v211_v44, %v4207_v14  ;;  %3822 = vtanh.f32 %v4273_v54 }
  0x8a   :  { %5560 = vst [vmem:[#allocation34_spill] sm:$0xff] %v4326_v4  ;;  %v3805_v9 = vpop.eup %3804  ;;  %v208_v33 = vmul.f32 0.5, %v3803_v5  ;;  %v214_v10 = vadd.f32 0.5, %v206_v45  ;;  %v4334_v49 = vmul.f32 %v212_v63, %v4210_v16  ;;  %3824 = vtanh.f32 %v4278_v56 }
  0x8b   :  { %5561 = vst [vmem:[#allocation35_spill] sm:$0xff] %v4330_v48  ;;  %v3807_v11 = vpop.eup %3806  ;;  %v209_v6 = vmul.f32 0.5, %v3805_v9  ;;  %v215_v37 = vadd.f32 0.5, %v207_v52  ;;  %v4338_v50 = vmul.f32 %v213_v59, %v4212_v17  ;;  %3826 = vtanh.f32 %v4281_v57 }
  0x8c   :  { %5562 = vst [vmem:[#allocation36_spill] sm:$0xff] %v4334_v49  ;;  %v3809_v14 = vpop.eup %3808  ;;  %v210_v18 = vmul.f32 0.5, %v3807_v11  ;;  %v216_v12 = vadd.f32 0.5, %v208_v33  ;;  %v4342_v54 = vmul.f32 %v214_v10, %v4215_v19  ;;  %3828 = vtanh.f32 %v4286_v61 }
  0x8d   :  { %5563 = vst [vmem:[#allocation37_spill] sm:$0xff] %v4338_v50  ;;  %v3811_v16 = vpop.eup %3810  ;;  %v217_v38 = vadd.f32 0.5, %v209_v6  ;;  %v4346_v56 = vmul.f32 %v215_v37, %v4217_v20  ;;  %v287_v13 = vmul.f32 0.5, %v3809_v14  ;;  %3830 = vtanh.f32 %v4289_v62 }
  0x8e   :  { %5564 = vst [vmem:[#allocation38_spill] sm:$0xff] %v4342_v54  ;;  %v3813_v17 = vpop.eup %3812  ;;  %v218_v40 = vadd.f32 0.5, %v210_v18  ;;  %v4350_v57 = vmul.f32 %v216_v12, %v4219_v21  ;;  %v288_v24 = vmul.f32 0.5, %v3811_v16  ;;  %3832 = vtanh.f32 %v4292_v7 }
  0x8f   :  { %5565 = vst [vmem:[#allocation39_spill] sm:$0xff] %v4346_v56  ;;  %v3815_v19 = vpop.eup %3814  ;;  %v4354_v26 = vmul.f32 %v217_v38, %v4221_v22  ;;  %v289_v61 = vmul.f32 0.5, %v3813_v17  ;;  %v295_v43 = vadd.f32 0.5, %v287_v13  ;;  %3834 = vtanh.f32 %v4295_v8 }
  0x90   :  { %5566 = vst [vmem:[#allocation40_spill] sm:$0xff] %v4350_v57  ;;  %v3817_v20 = vpop.eup %3816  ;;  %v4358_v31 = vmul.f32 %v218_v40, %v4223_v23  ;;  %v290_v62 = vmul.f32 0.5, %v3815_v19  ;;  %v296_v3 = vadd.f32 0.5, %v288_v24  ;;  %3836 = vtanh.f32 %v4298_v15 }
  0x91   :  { %5567 = vst [vmem:[#allocation41_spill] sm:$0xff] %v4354_v26  ;;  %v3819_v21 = vpop.eup %3818  ;;  %v291_v44 = vmul.f32 0.5, %v3817_v20  ;;  %v297_v53 = vadd.f32 0.5, %v289_v61  ;;  %v4362_v7 = vmul.f32 %v295_v43, %v4226_v25  ;;  %3838 = vtanh.f32 %v4301_v27 }
  0x92   :  { %5568 = vst [vmem:[#allocation42_spill] sm:$0xff] %v4358_v31  ;;  %v3821_v22 = vpop.eup %3820  ;;  %v292_v45 = vmul.f32 0.5, %v3819_v21  ;;  %v298_v63 = vadd.f32 0.5, %v290_v62  ;;  %v4366_v8 = vmul.f32 %v296_v3, %v4230_v28 }
  0x93   :  { %5569 = vst [vmem:[#allocation43_spill] sm:$0xff] %v4362_v7  ;;  %v3823_v23 = vpop.eup %3822  ;;  %v293_v5 = vmul.f32 0.5, %v3821_v22  ;;  %v299_v52 = vadd.f32 0.5, %v291_v44  ;;  %v4369_v59 = vmul.f32 %v297_v53, %v4232_v29 }
  0x94   :  { %5570 = vst [vmem:[#allocation44_spill] sm:$0xff] %v4366_v8  ;;  %v3825_v15 = vpop.eup %3824  ;;  %v294_v9 = vmul.f32 0.5, %v3823_v23  ;;  %v300_v33 = vadd.f32 0.5, %v292_v45  ;;  %v4372_v25 = vmul.f32 %v298_v63, %v4234_v30  ;;  %v5582_v23 = vld [vmem:[#allocation24_spill] sm:$0xff] }
  0x95   :  { %5571 = vst [vmem:[#allocation45_spill] sm:$0xff] %v4369_v59  ;;  %v3827_v10 = vpop.eup %3826  ;;  %v301_v27 = vadd.f32 0.5, %v293_v5  ;;  %v4375_v11 = vmul.f32 %v299_v52, %v4239_v34  ;;  %v371_v6 = vmul.f32 0.5, %v3825_v15  ;;  %v5586_v15 = vld [vmem:[#allocation26_spill] sm:$0xff] }
  0x96   :  { %5572 = vst [vmem:[#allocation46_spill] sm:$0xff] %v4372_v25  ;;  %v3829_v28 = vpop.eup %3828  ;;  %v302_v37 = vadd.f32 0.5, %v294_v9  ;;  %v4378_v14 = vmul.f32 %v300_v33, %v4241_v35  ;;  %v372_v18 = vmul.f32 0.5, %v3827_v10 }
  0x97   :  { %5573 = vst [vmem:[#allocation47_spill] sm:$0xff] %v4375_v11  ;;  %v3831_v29 = vpop.eup %3830  ;;  %v4381_v12 = vmul.f32 %v301_v27, %v4243_v36  ;;  %v373_v16 = vmul.f32 0.5, %v3829_v28  ;;  %v379_v38 = vadd.f32 0.5, %v371_v6 }
  0x98   :  { %5574 = vst [vmem:[#allocation48_spill] sm:$0xff] %v4378_v14  ;;  %v3833_v30 = vpop.eup %3832  ;;  %v4384_v13 = vmul.f32 %v302_v37, %v4247_v39  ;;  %v374_v17 = vmul.f32 0.5, %v3831_v29  ;;  %v380_v34 = vadd.f32 0.5, %v372_v18 }
  0x99   :  { %5575 = vst [vmem:[#allocation49_spill] sm:$0xff] %v4381_v12  ;;  %v3835_v40 = vpop.eup %3834  ;;  %v375_v24 = vmul.f32 0.5, %v3833_v30  ;;  %v381_v19 = vadd.f32 0.5, %v373_v16  ;;  %v4387_v61 = vmul.f32 %v379_v38, %v4250_v41 }
  0x9a   :  { %5576 = vst [vmem:[#allocation50_spill] sm:$0xff] %v4384_v13  ;;  %v3837_v35 = vpop.eup %3836  ;;  %v376_v43 = vmul.f32 0.5, %v3835_v40  ;;  %v382_v20 = vadd.f32 0.5, %v374_v17  ;;  %v4390_v36 = vmul.f32 %v380_v34, %v4252_v42  ;;  %v5584_v42 = vld [vmem:[#allocation25_spill] sm:$0xff] }
  0x9b   :  { %5577 = vst [vmem:[#allocation51_spill] sm:$0xff] %v4387_v61  ;;  %v3839_v62 = vpop.eup %3838  ;;  %v377_v3 = vmul.f32 0.5, %v3837_v35  ;;  %v383_v21 = vadd.f32 0.5, %v375_v24  ;;  %v4393_v39 = vmul.f32 %v381_v19, %v4257_v46 }
  0x9c   :  { %5578 = vst [vmem:[#allocation52_spill] sm:$0xff] %v4390_v36  ;;  %v378_v44 = vmul.f32 0.5, %v3839_v62  ;;  %v384_v53 = vadd.f32 0.5, %v376_v43  ;;  %v4396_v22 = vmul.f32 %v382_v20, %v4259_v47 }
  0x9d   :  { %5579 = vst [vmem:[#allocation53_spill] sm:$0xff] %v4393_v39  ;;  %v385_v45 = vadd.f32 0.5, %v377_v3  ;;  %v4399_v41 = vmul.f32 %v383_v21, %v4268_v51 }
  0x9e   :  { %5580 = vst [vmem:[#allocation54_spill] sm:$0xff] %v4396_v22  ;;  %v386_v63 = vadd.f32 0.5, %v378_v44  ;;  %v4402_v5 = vmul.f32 %v384_v53, %v5582_v23 }
  0x9f   :  { %5581 = vst [vmem:[#allocation55_spill] sm:$0xff] %v4399_v41  ;;  %v4405_v52 = vmul.f32 %v385_v45, %v5584_v42 }
  0xa0   :  { %5583 = vst [vmem:[#allocation24_spill] sm:$0xff] %v4402_v5  ;;  %v4408_v9 = vmul.f32 %v386_v63, %v5586_v15 }
  0xa1   :  { %5585 = vst [vmem:[#allocation25_spill] sm:$0xff] %v4405_v52 }
  0xa2   :  { %5587 = vst [vmem:[#allocation26_spill] sm:$0xff] %v4408_v9 }
  0xa3   :  { %4047 = dma.done.wait [#allocation4], 32768 }
  0xa4   :  { %4048 = vsyncadd [#allocation4], 4294934528  ;;  %v4410_v46 = vld [vmem:[#allocation2] sm:$0xff]  ;;  %v4412_v47 = vld [vmem:[#allocation2 + $0x8] sm:$0xff] }
  0xa5   :  { %5588 = vst [vmem:[#allocation56_spill] sm:$0xff] %v4410_v46  ;;  %5589 = vst [vmem:[#allocation57_spill] sm:$0xff] %v4412_v47  ;;  %v4414_v33 = vld [vmem:[#allocation2 + $0x10] sm:$0xff]  ;;  %v4416_v51 = vld [vmem:[#allocation2 + $0x18] sm:$0xff] }
  0xa6   :  { %5590 = vst [vmem:[#allocation58_spill] sm:$0xff] %v4414_v33  ;;  %5591 = vst [vmem:[#allocation59_spill] sm:$0xff] %v4416_v51  ;;  %v4418_v10 = vld [vmem:[#allocation2 + $0x20] sm:$0xff]  ;;  %v4420_v27 = vld [vmem:[#allocation2 + $0x28] sm:$0xff] }
  0xa7   :  { %5592 = vst [vmem:[#allocation60_spill] sm:$0xff] %v4418_v10  ;;  %5593 = vst [vmem:[#allocation61_spill] sm:$0xff] %v4420_v27  ;;  %v4422_v6 = vld [vmem:[#allocation2 + $0x30] sm:$0xff]  ;;  %v4424_v28 = vld [vmem:[#allocation2 + $0x38] sm:$0xff] }
  0xa8   :  { %5594 = vst [vmem:[#allocation62_spill] sm:$0xff] %v4422_v6  ;;  %5595 = vst [vmem:[#allocation63_spill] sm:$0xff] %v4424_v28  ;;  %v4426_v37 = vld [vmem:[#allocation2 + $0x40] sm:$0xff]  ;;  %v4428_v18 = vld [vmem:[#allocation2 + $0x48] sm:$0xff] }
  0xa9   :  { %5596 = vst [vmem:[#allocation64_spill] sm:$0xff] %v4426_v37  ;;  %5597 = vst [vmem:[#allocation65_spill] sm:$0xff] %v4428_v18  ;;  %v4430_v29 = vld [vmem:[#allocation2 + $0x50] sm:$0xff]  ;;  %v4432_v16 = vld [vmem:[#allocation2 + $0x58] sm:$0xff] }
  0xaa   :  { %5598 = vst [vmem:[#allocation66_spill] sm:$0xff] %v4430_v29  ;;  %5599 = vst [vmem:[#allocation67_spill] sm:$0xff] %v4432_v16  ;;  %v4434_v38 = vld [vmem:[#allocation2 + $0x60] sm:$0xff]  ;;  %v4436_v30 = vld [vmem:[#allocation2 + $0x68] sm:$0xff] }
  0xab   :  { %5600 = vst [vmem:[#allocation68_spill] sm:$0xff] %v4434_v38  ;;  %5601 = vst [vmem:[#allocation69_spill] sm:$0xff] %v4436_v30  ;;  %v4438_v17 = vld [vmem:[#allocation2 + $0x70] sm:$0xff]  ;;  %v4440_v34 = vld [vmem:[#allocation2 + $0x78] sm:$0xff] }
  0xac   :  { %5602 = vst [vmem:[#allocation70_spill] sm:$0xff] %v4438_v17  ;;  %5603 = vst [vmem:[#allocation71_spill] sm:$0xff] %v4440_v34  ;;  %v4442_v40 = vld [vmem:[#allocation2 + $0x80] sm:$0xff]  ;;  %v4444_v24 = vld [vmem:[#allocation2 + $0x88] sm:$0xff] }
  0xad   :  { %5604 = vst [vmem:[#allocation72_spill] sm:$0xff] %v4442_v40  ;;  %5605 = vst [vmem:[#allocation73_spill] sm:$0xff] %v4444_v24  ;;  %v4446_v19 = vld [vmem:[#allocation2 + $0x90] sm:$0xff]  ;;  %v4448_v35 = vld [vmem:[#allocation2 + $0x98] sm:$0xff] }
  0xae   :  { %5606 = vst [vmem:[#allocation74_spill] sm:$0xff] %v4446_v19  ;;  %5607 = vst [vmem:[#allocation75_spill] sm:$0xff] %v4448_v35  ;;  %v4450_v43 = vld [vmem:[#allocation2 + $0xa0] sm:$0xff]  ;;  %v4452_v20 = vld [vmem:[#allocation2 + $0xa8] sm:$0xff] }
  0xaf   :  { %5608 = vst [vmem:[#allocation76_spill] sm:$0xff] %v4450_v43  ;;  %5609 = vst [vmem:[#allocation77_spill] sm:$0xff] %v4452_v20  ;;  %v4454_v62 = vld [vmem:[#allocation2 + $0xb0] sm:$0xff]  ;;  %v4456_v3 = vld [vmem:[#allocation2 + $0xb8] sm:$0xff] }
  0xb0   :  { %5610 = vst [vmem:[#allocation78_spill] sm:$0xff] %v4454_v62  ;;  %5611 = vst [vmem:[#allocation79_spill] sm:$0xff] %v4456_v3  ;;  %v4458_v21 = vld [vmem:[#allocation2 + $0xc0] sm:$0xff]  ;;  %v4460_v44 = vld [vmem:[#allocation2 + $0xc8] sm:$0xff] }
  0xb1   :  { %5612 = vst [vmem:[#allocation80_spill] sm:$0xff] %v4458_v21  ;;  %5613 = vst [vmem:[#allocation81_spill] sm:$0xff] %v4460_v44  ;;  %v4462_v53 = vld [vmem:[#allocation2 + $0xd0] sm:$0xff]  ;;  %v4464_v45 = vld [vmem:[#allocation2 + $0xd8] sm:$0xff] }
  0xb2   :  { %5614 = vst [vmem:[#allocation82_spill] sm:$0xff] %v4462_v53  ;;  %5615 = vst [vmem:[#allocation83_spill] sm:$0xff] %v4464_v45  ;;  %v4466_v63 = vld [vmem:[#allocation2 + $0xe0] sm:$0xff]  ;;  %v4468_v23 = vld [vmem:[#allocation2 + $0xe8] sm:$0xff] }
  0xb3   :  { %5616 = vst [vmem:[#allocation84_spill] sm:$0xff] %v4466_v63  ;;  %5617 = vst [vmem:[#allocation85_spill] sm:$0xff] %v4468_v23  ;;  %v4470_v42 = vld [vmem:[#allocation2 + $0xf0] sm:$0xff]  ;;  %v4472_v15 = vld [vmem:[#allocation2 + $0xf8] sm:$0xff] }
  0xb4   :  { %5618 = vst [vmem:[#allocation86_spill] sm:$0xff] %v4470_v42  ;;  %5619 = vst [vmem:[#allocation87_spill] sm:$0xff] %v4472_v15  ;;  %v4474_v52 = vld [vmem:[#allocation2 + $0x100] sm:$0xff]  ;;  %v4476_v41 = vld [vmem:[#allocation2 + $0x108] sm:$0xff] }
  0xb5   :  { %5620 = vst [vmem:[#allocation88_spill] sm:$0xff] %v4474_v52  ;;  %5621 = vst [vmem:[#allocation89_spill] sm:$0xff] %v4476_v41  ;;  %v4478_v9 = vld [vmem:[#allocation2 + $0x110] sm:$0xff]  ;;  %v4480_v5 = vld [vmem:[#allocation2 + $0x118] sm:$0xff] }
  0xb6   :  { %5622 = vst [vmem:[#allocation90_spill] sm:$0xff] %v4478_v9  ;;  %5623 = vst [vmem:[#allocation91_spill] sm:$0xff] %v4480_v5  ;;  %v4482_v39 = vld [vmem:[#allocation2 + $0x120] sm:$0xff]  ;;  %v4484_v61 = vld [vmem:[#allocation2 + $0x128] sm:$0xff] }
  0xb7   :  { %5624 = vst [vmem:[#allocation92_spill] sm:$0xff] %v4482_v39  ;;  %5625 = vst [vmem:[#allocation93_spill] sm:$0xff] %v4484_v61  ;;  %v4486_v22 = vld [vmem:[#allocation2 + $0x130] sm:$0xff]  ;;  %v4488_v36 = vld [vmem:[#allocation2 + $0x138] sm:$0xff] }
  0xb8   :  { %5626 = vst [vmem:[#allocation94_spill] sm:$0xff] %v4486_v22  ;;  %5627 = vst [vmem:[#allocation95_spill] sm:$0xff] %v4488_v36  ;;  %v4490_v12 = vld [vmem:[#allocation2 + $0x140] sm:$0xff]  ;;  %v4492_v11 = vld [vmem:[#allocation2 + $0x148] sm:$0xff] }
  0xb9   :  { %5628 = vst [vmem:[#allocation96_spill] sm:$0xff] %v4490_v12  ;;  %5629 = vst [vmem:[#allocation97_spill] sm:$0xff] %v4492_v11  ;;  %v4494_v13 = vld [vmem:[#allocation2 + $0x150] sm:$0xff]  ;;  %v4496_v14 = vld [vmem:[#allocation2 + $0x158] sm:$0xff] }
  0xba   :  { %5630 = vst [vmem:[#allocation98_spill] sm:$0xff] %v4494_v13  ;;  %5631 = vst [vmem:[#allocation99_spill] sm:$0xff] %v4496_v14  ;;  %v4498_v59 = vld [vmem:[#allocation2 + $0x160] sm:$0xff]  ;;  %v4500_v7 = vld [vmem:[#allocation2 + $0x168] sm:$0xff] }
  0xbb   :  { %5632 = vst [vmem:[#allocation100_spill] sm:$0xff] %v4498_v59  ;;  %5633 = vst [vmem:[#allocation101_spill] sm:$0xff] %v4500_v7  ;;  %v4502_v25 = vld [vmem:[#allocation2 + $0x170] sm:$0xff]  ;;  %v4504_v8 = vld [vmem:[#allocation2 + $0x178] sm:$0xff] }
  0xbc   :  { %5634 = vst [vmem:[#allocation102_spill] sm:$0xff] %v4502_v25  ;;  %5635 = vst [vmem:[#allocation103_spill] sm:$0xff] %v4504_v8  ;;  %v4506_v26 = vld [vmem:[#allocation2 + $0x180] sm:$0xff]  ;;  %v4508_v56 = vld [vmem:[#allocation2 + $0x188] sm:$0xff] }
  0xbd   :  { %5636 = vst [vmem:[#allocation104_spill] sm:$0xff] %v4506_v26  ;;  %5637 = vst [vmem:[#allocation105_spill] sm:$0xff] %v4508_v56  ;;  %v4510_v31 = vld [vmem:[#allocation2 + $0x190] sm:$0xff]  ;;  %v4512_v57 = vld [vmem:[#allocation2 + $0x198] sm:$0xff] }
  0xbe   :  { %5638 = vst [vmem:[#allocation106_spill] sm:$0xff] %v4510_v31  ;;  %5639 = vst [vmem:[#allocation107_spill] sm:$0xff] %v4512_v57  ;;  %v4514_v50 = vld [vmem:[#allocation2 + $0x1a0] sm:$0xff]  ;;  %v4516_v48 = vld [vmem:[#allocation2 + $0x1a8] sm:$0xff] }
  0xbf   :  { %5640 = vst [vmem:[#allocation108_spill] sm:$0xff] %v4514_v50  ;;  %5641 = vst [vmem:[#allocation109_spill] sm:$0xff] %v4516_v48  ;;  %v4518_v54 = vld [vmem:[#allocation2 + $0x1b0] sm:$0xff]  ;;  %v4520_v49 = vld [vmem:[#allocation2 + $0x1b8] sm:$0xff] }
  0xc0   :  { %5642 = vst [vmem:[#allocation110_spill] sm:$0xff] %v4518_v54  ;;  %5643 = vst [vmem:[#allocation111_spill] sm:$0xff] %v4520_v49  ;;  %v4522_v36 = vld [vmem:[#allocation2 + $0x1c0] sm:$0xff]  ;;  %v4524_v32 = vld [vmem:[#allocation2 + $0x1c8] sm:$0xff] }
  0xc1   :  { %5644 = vst [vmem:[#allocation112_spill] sm:$0xff] %v4522_v36  ;;  %5645 = vst [vmem:[#allocation113_spill] sm:$0xff] %v4524_v32  ;;  %v4526_v1 = vld [vmem:[#allocation2 + $0x1d0] sm:$0xff]  ;;  %v4528_v8 = vld [vmem:[#allocation2 + $0x1d8] sm:$0xff] }
  0xc2   :  { %5646 = vst [vmem:[#allocation114_spill] sm:$0xff] %v4526_v1  ;;  %5647 = vst [vmem:[#allocation115_spill] sm:$0xff] %v4528_v8  ;;  %v4530_v22 = vld [vmem:[#allocation2 + $0x1e0] sm:$0xff]  ;;  %v4532_v25 = vld [vmem:[#allocation2 + $0x1e8] sm:$0xff] }
  0xc3   :  { %5648 = vst [vmem:[#allocation116_spill] sm:$0xff] %v4530_v22  ;;  %5649 = vst [vmem:[#allocation117_spill] sm:$0xff] %v4532_v25  ;;  %v4534_v61 = vld [vmem:[#allocation2 + $0x1f0] sm:$0xff]  ;;  %v4536_v7 = vld [vmem:[#allocation2 + $0x1f8] sm:$0xff] }
  0xc4   :  { %5650 = vst [vmem:[#allocation118_spill] sm:$0xff] %v4534_v61  ;;  %5651 = vst [vmem:[#allocation119_spill] sm:$0xff] %v4536_v7  ;;  %v4538_v48 = vld [vmem:[#allocation2 + $0x200] sm:$0xff]  ;;  %v4540_v54 = vld [vmem:[#allocation2 + $0x208] sm:$0xff] }
  0xc5   :  { %5652 = vst [vmem:[#allocation120_spill] sm:$0xff] %v4538_v48  ;;  %5653 = vst [vmem:[#allocation121_spill] sm:$0xff] %v4540_v54  ;;  %v4542_v49 = vld [vmem:[#allocation2 + $0x210] sm:$0xff]  ;;  %v4544_v50 = vld [vmem:[#allocation2 + $0x218] sm:$0xff] }
  0xc6   :  { %5654 = vst [vmem:[#allocation122_spill] sm:$0xff] %v4542_v49  ;;  %5655 = vst [vmem:[#allocation123_spill] sm:$0xff] %v4544_v50  ;;  %v4546_v39 = vld [vmem:[#allocation2 + $0x220] sm:$0xff]  ;;  %v4548_v59 = vld [vmem:[#allocation2 + $0x228] sm:$0xff] }
  0xc7   :  { %5656 = vst [vmem:[#allocation124_spill] sm:$0xff] %v4546_v39  ;;  %5657 = vst [vmem:[#allocation125_spill] sm:$0xff] %v4548_v59  ;;  %v4550_v57 = vld [vmem:[#allocation2 + $0x230] sm:$0xff]  ;;  %v4552_v22 = vld [vmem:[#allocation2 + $0x238] sm:$0xff] }
  0xc8   :  { %5658 = vst [vmem:[#allocation126_spill] sm:$0xff] %v4550_v57  ;;  %5659 = vst [vmem:[#allocation127_spill] sm:$0xff] %v4552_v22  ;;  %v4554_v25 = vld [vmem:[#allocation2 + $0x240] sm:$0xff]  ;;  %v4556_v61 = vld [vmem:[#allocation2 + $0x248] sm:$0xff] }
  0xc9   :  { %5660 = vst [vmem:[#allocation128_spill] sm:$0xff] %v4554_v25  ;;  %5661 = vst [vmem:[#allocation129_spill] sm:$0xff] %v4556_v61  ;;  %v4558_v7 = vld [vmem:[#allocation2 + $0x250] sm:$0xff]  ;;  %v4560_v48 = vld [vmem:[#allocation2 + $0x258] sm:$0xff] }
  0xca   :  { %5662 = vst [vmem:[#allocation130_spill] sm:$0xff] %v4558_v7  ;;  %5663 = vst [vmem:[#allocation131_spill] sm:$0xff] %v4560_v48  ;;  %v4562_v54 = vld [vmem:[#allocation2 + $0x260] sm:$0xff]  ;;  %v4564_v49 = vld [vmem:[#allocation2 + $0x268] sm:$0xff] }
  0xcb   :  { %5664 = vst [vmem:[#allocation132_spill] sm:$0xff] %v4562_v54  ;;  %5665 = vst [vmem:[#allocation133_spill] sm:$0xff] %v4564_v49  ;;  %v4566_v50 = vld [vmem:[#allocation2 + $0x270] sm:$0xff]  ;;  %v4568_v39 = vld [vmem:[#allocation2 + $0x278] sm:$0xff] }
  0xcc   :  { %5666 = vst [vmem:[#allocation134_spill] sm:$0xff] %v4566_v50  ;;  %5667 = vst [vmem:[#allocation135_spill] sm:$0xff] %v4568_v39  ;;  %v4570_v59 = vld [vmem:[#allocation2 + $0x280] sm:$0xff]  ;;  %v4572_v57 = vld [vmem:[#allocation2 + $0x288] sm:$0xff] }
  0xcd   :  { %5668 = vst [vmem:[#allocation136_spill] sm:$0xff] %v4570_v59  ;;  %5669 = vst [vmem:[#allocation137_spill] sm:$0xff] %v4572_v57  ;;  %v4574_v22 = vld [vmem:[#allocation2 + $0x290] sm:$0xff]  ;;  %v4576_v25 = vld [vmem:[#allocation2 + $0x298] sm:$0xff] }
  0xce   :  { %5670 = vst [vmem:[#allocation138_spill] sm:$0xff] %v4574_v22  ;;  %5671 = vst [vmem:[#allocation139_spill] sm:$0xff] %v4576_v25  ;;  %v4578_v61 = vld [vmem:[#allocation2 + $0x2a0] sm:$0xff]  ;;  %v4580_v7 = vld [vmem:[#allocation2 + $0x2a8] sm:$0xff] }
  0xcf   :  { %5672 = vst [vmem:[#allocation140_spill] sm:$0xff] %v4578_v61  ;;  %5673 = vst [vmem:[#allocation141_spill] sm:$0xff] %v4580_v7  ;;  %v4582_v48 = vld [vmem:[#allocation2 + $0x2b0] sm:$0xff]  ;;  %v4584_v54 = vld [vmem:[#allocation2 + $0x2b8] sm:$0xff] }
  0xd0   :  { %5674 = vst [vmem:[#allocation142_spill] sm:$0xff] %v4582_v48  ;;  %5675 = vst [vmem:[#allocation143_spill] sm:$0xff] %v4584_v54  ;;  %v4586_v49 = vld [vmem:[#allocation2 + $0x2c0] sm:$0xff]  ;;  %v4588_v50 = vld [vmem:[#allocation2 + $0x2c8] sm:$0xff] }
  0xd1   :  { %5676 = vst [vmem:[#allocation144_spill] sm:$0xff] %v4586_v49  ;;  %5677 = vst [vmem:[#allocation145_spill] sm:$0xff] %v4588_v50  ;;  %v4590_v39 = vld [vmem:[#allocation2 + $0x2d0] sm:$0xff]  ;;  %v4592_v59 = vld [vmem:[#allocation2 + $0x2d8] sm:$0xff] }
  0xd2   :  { %5678 = vst [vmem:[#allocation146_spill] sm:$0xff] %v4590_v39  ;;  %5679 = vst [vmem:[#allocation147_spill] sm:$0xff] %v4592_v59  ;;  %v4594_v57 = vld [vmem:[#allocation2 + $0x2e0] sm:$0xff]  ;;  %v4596_v22 = vld [vmem:[#allocation2 + $0x2e8] sm:$0xff] }
  0xd3   :  { %5680 = vst [vmem:[#allocation148_spill] sm:$0xff] %v4594_v57  ;;  %5681 = vst [vmem:[#allocation149_spill] sm:$0xff] %v4596_v22  ;;  %v4598_v25 = vld [vmem:[#allocation2 + $0x2f0] sm:$0xff]  ;;  %v4600_v61 = vld [vmem:[#allocation2 + $0x2f8] sm:$0xff] }
  0xd4   :  { %5682 = vst [vmem:[#allocation150_spill] sm:$0xff] %v4598_v25  ;;  %5683 = vst [vmem:[#allocation151_spill] sm:$0xff] %v4600_v61  ;;  %v4602_v7 = vld [vmem:[#allocation2 + $0x300] sm:$0xff]  ;;  %v4604_v48 = vld [vmem:[#allocation2 + $0x308] sm:$0xff] }
  0xd5   :  { %5684 = vst [vmem:[#allocation152_spill] sm:$0xff] %v4602_v7  ;;  %5685 = vst [vmem:[#allocation153_spill] sm:$0xff] %v4604_v48  ;;  %v4606_v54 = vld [vmem:[#allocation2 + $0x310] sm:$0xff]  ;;  %v4608_v49 = vld [vmem:[#allocation2 + $0x318] sm:$0xff] }
  0xd6   :  { %5686 = vst [vmem:[#allocation154_spill] sm:$0xff] %v4606_v54  ;;  %5687 = vst [vmem:[#allocation155_spill] sm:$0xff] %v4608_v49  ;;  %v4610_v50 = vld [vmem:[#allocation2 + $0x320] sm:$0xff]  ;;  %v4612_v39 = vld [vmem:[#allocation2 + $0x328] sm:$0xff] }
  0xd7   :  { %5688 = vst [vmem:[#allocation156_spill] sm:$0xff] %v4610_v50  ;;  %5689 = vst [vmem:[#allocation157_spill] sm:$0xff] %v4612_v39  ;;  %v4614_v59 = vld [vmem:[#allocation2 + $0x330] sm:$0xff]  ;;  %v4616_v57 = vld [vmem:[#allocation2 + $0x338] sm:$0xff] }
  0xd8   :  { %5690 = vst [vmem:[#allocation158_spill] sm:$0xff] %v4614_v59  ;;  %5691 = vst [vmem:[#allocation159_spill] sm:$0xff] %v4616_v57  ;;  %v4618_v22 = vld [vmem:[#allocation2 + $0x340] sm:$0xff]  ;;  %v4620_v25 = vld [vmem:[#allocation2 + $0x348] sm:$0xff] }
  0xd9   :  { %5692 = vst [vmem:[#allocation160_spill] sm:$0xff] %v4618_v22  ;;  %5693 = vst [vmem:[#allocation161_spill] sm:$0xff] %v4620_v25  ;;  %v4622_v61 = vld [vmem:[#allocation2 + $0x350] sm:$0xff]  ;;  %v4624_v7 = vld [vmem:[#allocation2 + $0x358] sm:$0xff] }
  0xda   :  { %5694 = vst [vmem:[#allocation162_spill] sm:$0xff] %v4622_v61  ;;  %5695 = vst [vmem:[#allocation163_spill] sm:$0xff] %v4624_v7  ;;  %v4626_v48 = vld [vmem:[#allocation2 + $0x360] sm:$0xff]  ;;  %v4628_v54 = vld [vmem:[#allocation2 + $0x368] sm:$0xff] }
  0xdb   :  { %5696 = vst [vmem:[#allocation164_spill] sm:$0xff] %v4626_v48  ;;  %5697 = vst [vmem:[#allocation165_spill] sm:$0xff] %v4628_v54  ;;  %v4630_v49 = vld [vmem:[#allocation2 + $0x370] sm:$0xff]  ;;  %v4632_v50 = vld [vmem:[#allocation2 + $0x378] sm:$0xff] }
  0xdc   :  { %5698 = vst [vmem:[#allocation166_spill] sm:$0xff] %v4630_v49  ;;  %5699 = vst [vmem:[#allocation167_spill] sm:$0xff] %v4632_v50  ;;  %v4634_v39 = vld [vmem:[#allocation2 + $0x380] sm:$0xff]  ;;  %v4636_v59 = vld [vmem:[#allocation2 + $0x388] sm:$0xff] }
  0xdd   :  { %5700 = vst [vmem:[#allocation168_spill] sm:$0xff] %v4634_v39  ;;  %5701 = vst [vmem:[#allocation169_spill] sm:$0xff] %v4636_v59  ;;  %v4638_v57 = vld [vmem:[#allocation2 + $0x390] sm:$0xff]  ;;  %v4640_v22 = vld [vmem:[#allocation2 + $0x398] sm:$0xff] }
  0xde   :  { %5702 = vst [vmem:[#allocation170_spill] sm:$0xff] %v4638_v57  ;;  %5703 = vst [vmem:[#allocation171_spill] sm:$0xff] %v4640_v22  ;;  %v4642_v25 = vld [vmem:[#allocation2 + $0x3a0] sm:$0xff]  ;;  %v4644_v61 = vld [vmem:[#allocation2 + $0x3a8] sm:$0xff] }
  0xdf   :  { %5704 = vst [vmem:[#allocation172_spill] sm:$0xff] %v4642_v25  ;;  %5705 = vst [vmem:[#allocation173_spill] sm:$0xff] %v4644_v61  ;;  %v4646_v7 = vld [vmem:[#allocation2 + $0x3b0] sm:$0xff]  ;;  %v4648_v48 = vld [vmem:[#allocation2 + $0x3b8] sm:$0xff] }
  0xe0   :  { %5706 = vst [vmem:[#allocation174_spill] sm:$0xff] %v4646_v7  ;;  %5707 = vst [vmem:[#allocation175_spill] sm:$0xff] %v4648_v48  ;;  %v4650_v54 = vld [vmem:[#allocation2 + $0x3c0] sm:$0xff]  ;;  %v4652_v49 = vld [vmem:[#allocation2 + $0x3c8] sm:$0xff] }
  0xe1   :  { %5708 = vst [vmem:[#allocation176_spill] sm:$0xff] %v4650_v54  ;;  %5709 = vst [vmem:[#allocation177_spill] sm:$0xff] %v4652_v49  ;;  %v4654_v50 = vld [vmem:[#allocation2 + $0x3d0] sm:$0xff]  ;;  %v4656_v39 = vld [vmem:[#allocation2 + $0x3d8] sm:$0xff] }
  0xe2   :  { %5710 = vst [vmem:[#allocation178_spill] sm:$0xff] %v4654_v50  ;;  %5711 = vst [vmem:[#allocation179_spill] sm:$0xff] %v4656_v39  ;;  %v4658_v59 = vld [vmem:[#allocation2 + $0x3e0] sm:$0xff]  ;;  %v4660_v57 = vld [vmem:[#allocation2 + $0x3e8] sm:$0xff] }
  0xe3   :  { %5712 = vst [vmem:[#allocation180_spill] sm:$0xff] %v4658_v59  ;;  %5713 = vst [vmem:[#allocation181_spill] sm:$0xff] %v4660_v57  ;;  %v4662_v22 = vld [vmem:[#allocation2 + $0x3f0] sm:$0xff]  ;;  %v4664_v25 = vld [vmem:[#allocation2 + $0x3f8] sm:$0xff] }
  0xe4   :  { %5714 = vst [vmem:[#allocation182_spill] sm:$0xff] %v4662_v22  ;;  %5715 = vst [vmem:[#allocation183_spill] sm:$0xff] %v4664_v25  ;;  %v4666_v61 = vld [vmem:[#allocation2 + $0x400] sm:$0xff]  ;;  %v4668_v7 = vld [vmem:[#allocation2 + $0x408] sm:$0xff] }
  0xe5   :  { %5716 = vst [vmem:[#allocation184_spill] sm:$0xff] %v4666_v61  ;;  %5717 = vst [vmem:[#allocation185_spill] sm:$0xff] %v4668_v7  ;;  %v4670_v48 = vld [vmem:[#allocation2 + $0x410] sm:$0xff]  ;;  %v4672_v54 = vld [vmem:[#allocation2 + $0x418] sm:$0xff] }
  0xe6   :  { %5718 = vst [vmem:[#allocation186_spill] sm:$0xff] %v4670_v48  ;;  %5719 = vst [vmem:[#allocation187_spill] sm:$0xff] %v4672_v54  ;;  %v4674_v49 = vld [vmem:[#allocation2 + $0x420] sm:$0xff]  ;;  %v4676_v50 = vld [vmem:[#allocation2 + $0x428] sm:$0xff] }
  0xe7   :  { %5720 = vst [vmem:[#allocation188_spill] sm:$0xff] %v4674_v49  ;;  %5721 = vst [vmem:[#allocation189_spill] sm:$0xff] %v4676_v50  ;;  %v4678_v39 = vld [vmem:[#allocation2 + $0x430] sm:$0xff]  ;;  %v4680_v59 = vld [vmem:[#allocation2 + $0x438] sm:$0xff] }
  0xe8   :  { %5722 = vst [vmem:[#allocation190_spill] sm:$0xff] %v4678_v39  ;;  %5723 = vst [vmem:[#allocation191_spill] sm:$0xff] %v4680_v59  ;;  %v4682_v57 = vld [vmem:[#allocation2 + $0x440] sm:$0xff]  ;;  %v4684_v22 = vld [vmem:[#allocation2 + $0x448] sm:$0xff] }
  0xe9   :  { %5724 = vst [vmem:[#allocation192_spill] sm:$0xff] %v4682_v57  ;;  %5725 = vst [vmem:[#allocation193_spill] sm:$0xff] %v4684_v22  ;;  %v4686_v25 = vld [vmem:[#allocation2 + $0x450] sm:$0xff]  ;;  %v4688_v61 = vld [vmem:[#allocation2 + $0x458] sm:$0xff] }
  0xea   :  { %5726 = vst [vmem:[#allocation194_spill] sm:$0xff] %v4686_v25  ;;  %5727 = vst [vmem:[#allocation195_spill] sm:$0xff] %v4688_v61  ;;  %v4690_v7 = vld [vmem:[#allocation2 + $0x460] sm:$0xff]  ;;  %v4692_v48 = vld [vmem:[#allocation2 + $0x468] sm:$0xff] }
  0xeb   :  { %5728 = vst [vmem:[#allocation196_spill] sm:$0xff] %v4690_v7  ;;  %5729 = vst [vmem:[#allocation197_spill] sm:$0xff] %v4692_v48  ;;  %v4694_v54 = vld [vmem:[#allocation2 + $0x470] sm:$0xff]  ;;  %v4696_v49 = vld [vmem:[#allocation2 + $0x478] sm:$0xff] }
  0xec   :  { %5730 = vst [vmem:[#allocation198_spill] sm:$0xff] %v4694_v54  ;;  %5731 = vst [vmem:[#allocation199_spill] sm:$0xff] %v4696_v49  ;;  %v4698_v50 = vld [vmem:[#allocation2 + $0x480] sm:$0xff]  ;;  %v4700_v39 = vld [vmem:[#allocation2 + $0x488] sm:$0xff] }
  0xed   :  { %5732 = vst [vmem:[#allocation200_spill] sm:$0xff] %v4698_v50  ;;  %5733 = vst [vmem:[#allocation201_spill] sm:$0xff] %v4700_v39  ;;  %v4702_v59 = vld [vmem:[#allocation2 + $0x490] sm:$0xff]  ;;  %v4704_v57 = vld [vmem:[#allocation2 + $0x498] sm:$0xff] }
  0xee   :  { %5734 = vst [vmem:[#allocation202_spill] sm:$0xff] %v4702_v59  ;;  %5735 = vst [vmem:[#allocation203_spill] sm:$0xff] %v4704_v57  ;;  %v4706_v22 = vld [vmem:[#allocation2 + $0x4a0] sm:$0xff]  ;;  %v4708_v25 = vld [vmem:[#allocation2 + $0x4a8] sm:$0xff] }
  0xef   :  { %5736 = vst [vmem:[#allocation204_spill] sm:$0xff] %v4706_v22  ;;  %5737 = vst [vmem:[#allocation205_spill] sm:$0xff] %v4708_v25  ;;  %v4710_v61 = vld [vmem:[#allocation2 + $0x4b0] sm:$0xff]  ;;  %v4712_v7 = vld [vmem:[#allocation2 + $0x4b8] sm:$0xff] }
  0xf0   :  { %5738 = vst [vmem:[#allocation206_spill] sm:$0xff] %v4710_v61  ;;  %5739 = vst [vmem:[#allocation207_spill] sm:$0xff] %v4712_v7  ;;  %v4714_v48 = vld [vmem:[#allocation2 + $0x4c0] sm:$0xff]  ;;  %v4716_v54 = vld [vmem:[#allocation2 + $0x4c8] sm:$0xff] }
  0xf1   :  { %5740 = vst [vmem:[#allocation208_spill] sm:$0xff] %v4714_v48  ;;  %5741 = vst [vmem:[#allocation209_spill] sm:$0xff] %v4716_v54  ;;  %v4718_v49 = vld [vmem:[#allocation2 + $0x4d0] sm:$0xff]  ;;  %v4720_v50 = vld [vmem:[#allocation2 + $0x4d8] sm:$0xff] }
  0xf2   :  { %5742 = vst [vmem:[#allocation210_spill] sm:$0xff] %v4718_v49  ;;  %5743 = vst [vmem:[#allocation211_spill] sm:$0xff] %v4720_v50  ;;  %v4722_v39 = vld [vmem:[#allocation2 + $0x4e0] sm:$0xff]  ;;  %v4724_v59 = vld [vmem:[#allocation2 + $0x4e8] sm:$0xff] }
  0xf3   :  { %5744 = vst [vmem:[#allocation212_spill] sm:$0xff] %v4722_v39  ;;  %5745 = vst [vmem:[#allocation213_spill] sm:$0xff] %v4724_v59  ;;  %v4726_v57 = vld [vmem:[#allocation2 + $0x4f0] sm:$0xff]  ;;  %v4728_v22 = vld [vmem:[#allocation2 + $0x4f8] sm:$0xff] }
  0xf4   :  { %5746 = vst [vmem:[#allocation214_spill] sm:$0xff] %v4726_v57  ;;  %5747 = vst [vmem:[#allocation215_spill] sm:$0xff] %v4728_v22  ;;  %v4730_v25 = vld [vmem:[#allocation2 + $0x500] sm:$0xff]  ;;  %v4732_v61 = vld [vmem:[#allocation2 + $0x508] sm:$0xff] }
  0xf5   :  { %5748 = vst [vmem:[#allocation216_spill] sm:$0xff] %v4730_v25  ;;  %5749 = vst [vmem:[#allocation217_spill] sm:$0xff] %v4732_v61  ;;  %v4734_v7 = vld [vmem:[#allocation2 + $0x510] sm:$0xff]  ;;  %v4736_v48 = vld [vmem:[#allocation2 + $0x518] sm:$0xff] }
  0xf6   :  { %5750 = vst [vmem:[#allocation218_spill] sm:$0xff] %v4734_v7  ;;  %5751 = vst [vmem:[#allocation219_spill] sm:$0xff] %v4736_v48  ;;  %v4738_v54 = vld [vmem:[#allocation2 + $0x520] sm:$0xff]  ;;  %v4740_v49 = vld [vmem:[#allocation2 + $0x528] sm:$0xff] }
  0xf7   :  { %5752 = vst [vmem:[#allocation220_spill] sm:$0xff] %v4738_v54  ;;  %5753 = vst [vmem:[#allocation221_spill] sm:$0xff] %v4740_v49  ;;  %v4742_v50 = vld [vmem:[#allocation2 + $0x530] sm:$0xff]  ;;  %v4744_v39 = vld [vmem:[#allocation2 + $0x538] sm:$0xff] }
  0xf8   :  { %5754 = vst [vmem:[#allocation222_spill] sm:$0xff] %v4742_v50  ;;  %5755 = vst [vmem:[#allocation223_spill] sm:$0xff] %v4744_v39  ;;  %v4746_v59 = vld [vmem:[#allocation2 + $0x540] sm:$0xff]  ;;  %v4748_v57 = vld [vmem:[#allocation2 + $0x548] sm:$0xff] }
  0xf9   :  { %5756 = vst [vmem:[#allocation224_spill] sm:$0xff] %v4746_v59  ;;  %5757 = vst [vmem:[#allocation225_spill] sm:$0xff] %v4748_v57  ;;  %v4750_v22 = vld [vmem:[#allocation2 + $0x550] sm:$0xff]  ;;  %v4752_v25 = vld [vmem:[#allocation2 + $0x558] sm:$0xff] }
  0xfa   :  { %5758 = vst [vmem:[#allocation226_spill] sm:$0xff] %v4750_v22  ;;  %5759 = vst [vmem:[#allocation227_spill] sm:$0xff] %v4752_v25  ;;  %v4754_v61 = vld [vmem:[#allocation2 + $0x560] sm:$0xff]  ;;  %v4756_v7 = vld [vmem:[#allocation2 + $0x568] sm:$0xff] }
  0xfb   :  { %5760 = vst [vmem:[#allocation228_spill] sm:$0xff] %v4754_v61  ;;  %5761 = vst [vmem:[#allocation229_spill] sm:$0xff] %v4756_v7  ;;  %v4758_v48 = vld [vmem:[#allocation2 + $0x570] sm:$0xff]  ;;  %v4760_v54 = vld [vmem:[#allocation2 + $0x578] sm:$0xff] }
  0xfc   :  { %5762 = vst [vmem:[#allocation230_spill] sm:$0xff] %v4758_v48  ;;  %5763 = vst [vmem:[#allocation231_spill] sm:$0xff] %v4760_v54  ;;  %v4762_v49 = vld [vmem:[#allocation2 + $0x580] sm:$0xff]  ;;  %v4764_v50 = vld [vmem:[#allocation2 + $0x588] sm:$0xff] }
  0xfd   :  { %5764 = vst [vmem:[#allocation232_spill] sm:$0xff] %v4762_v49  ;;  %5765 = vst [vmem:[#allocation233_spill] sm:$0xff] %v4764_v50  ;;  %v4766_v39 = vld [vmem:[#allocation2 + $0x590] sm:$0xff]  ;;  %v4768_v59 = vld [vmem:[#allocation2 + $0x598] sm:$0xff] }
  0xfe   :  { %5766 = vst [vmem:[#allocation234_spill] sm:$0xff] %v4766_v39  ;;  %5767 = vst [vmem:[#allocation235_spill] sm:$0xff] %v4768_v59  ;;  %v4770_v57 = vld [vmem:[#allocation2 + $0x5a0] sm:$0xff]  ;;  %v4772_v22 = vld [vmem:[#allocation2 + $0x5a8] sm:$0xff] }
  0xff   :  { %5768 = vst [vmem:[#allocation236_spill] sm:$0xff] %v4770_v57  ;;  %5769 = vst [vmem:[#allocation237_spill] sm:$0xff] %v4772_v22  ;;  %v4774_v25 = vld [vmem:[#allocation2 + $0x5b0] sm:$0xff]  ;;  %v4776_v61 = vld [vmem:[#allocation2 + $0x5b8] sm:$0xff] }
 0x100   :  { %5770 = vst [vmem:[#allocation238_spill] sm:$0xff] %v4774_v25  ;;  %5771 = vst [vmem:[#allocation239_spill] sm:$0xff] %v4776_v61  ;;  %v4778_v7 = vld [vmem:[#allocation2 + $0x5c0] sm:$0xff]  ;;  %v4780_v48 = vld [vmem:[#allocation2 + $0x5c8] sm:$0xff] }
 0x101   :  { %5772 = vst [vmem:[#allocation240_spill] sm:$0xff] %v4778_v7  ;;  %5773 = vst [vmem:[#allocation241_spill] sm:$0xff] %v4780_v48  ;;  %v4782_v54 = vld [vmem:[#allocation2 + $0x5d0] sm:$0xff]  ;;  %v4784_v49 = vld [vmem:[#allocation2 + $0x5d8] sm:$0xff] }
 0x102   :  { %5774 = vst [vmem:[#allocation242_spill] sm:$0xff] %v4782_v54  ;;  %5775 = vst [vmem:[#allocation243_spill] sm:$0xff] %v4784_v49  ;;  %v4786_v50 = vld [vmem:[#allocation2 + $0x5e0] sm:$0xff]  ;;  %v4788_v39 = vld [vmem:[#allocation2 + $0x5e8] sm:$0xff] }
 0x103   :  { %5776 = vst [vmem:[#allocation244_spill] sm:$0xff] %v4786_v50  ;;  %5777 = vst [vmem:[#allocation245_spill] sm:$0xff] %v4788_v39  ;;  %v4790_v59 = vld [vmem:[#allocation2 + $0x5f0] sm:$0xff]  ;;  %v4792_v57 = vld [vmem:[#allocation2 + $0x5f8] sm:$0xff] }
 0x104   :  { %5778 = vst [vmem:[#allocation246_spill] sm:$0xff] %v4790_v59  ;;  %5779 = vst [vmem:[#allocation247_spill] sm:$0xff] %v4792_v57  ;;  %v4794_v22 = vld [vmem:[#allocation2 + $0x600] sm:$0xff]  ;;  %v4796_v25 = vld [vmem:[#allocation2 + $0x608] sm:$0xff] }
 0x105   :  { %5780 = vst [vmem:[#allocation248_spill] sm:$0xff] %v4794_v22  ;;  %5781 = vst [vmem:[#allocation249_spill] sm:$0xff] %v4796_v25  ;;  %v4798_v61 = vld [vmem:[#allocation2 + $0x610] sm:$0xff]  ;;  %v4800_v7 = vld [vmem:[#allocation2 + $0x618] sm:$0xff] }
 0x106   :  { %5782 = vst [vmem:[#allocation250_spill] sm:$0xff] %v4798_v61  ;;  %5783 = vst [vmem:[#allocation251_spill] sm:$0xff] %v4800_v7  ;;  %v4802_v48 = vld [vmem:[#allocation2 + $0x620] sm:$0xff]  ;;  %v4804_v54 = vld [vmem:[#allocation2 + $0x628] sm:$0xff] }
 0x107   :  { %5784 = vst [vmem:[#allocation252_spill] sm:$0xff] %v4802_v48  ;;  %5785 = vst [vmem:[#allocation253_spill] sm:$0xff] %v4804_v54  ;;  %v4806_v49 = vld [vmem:[#allocation2 + $0x630] sm:$0xff]  ;;  %v4808_v50 = vld [vmem:[#allocation2 + $0x638] sm:$0xff] }
 0x108   :  { %5786 = vst [vmem:[#allocation254_spill] sm:$0xff] %v4806_v49  ;;  %5787 = vst [vmem:[#allocation255_spill] sm:$0xff] %v4808_v50  ;;  %v4810_v39 = vld [vmem:[#allocation2 + $0x640] sm:$0xff]  ;;  %v4812_v59 = vld [vmem:[#allocation2 + $0x648] sm:$0xff] }
 0x109   :  { %5788 = vst [vmem:[#allocation256_spill] sm:$0xff] %v4810_v39  ;;  %5789 = vst [vmem:[#allocation257_spill] sm:$0xff] %v4812_v59  ;;  %v4814_v57 = vld [vmem:[#allocation2 + $0x650] sm:$0xff]  ;;  %v4816_v22 = vld [vmem:[#allocation2 + $0x658] sm:$0xff] }
 0x10a   :  { %5790 = vst [vmem:[#allocation258_spill] sm:$0xff] %v4814_v57  ;;  %5791 = vst [vmem:[#allocation259_spill] sm:$0xff] %v4816_v22  ;;  %v4818_v25 = vld [vmem:[#allocation2 + $0x660] sm:$0xff]  ;;  %v4820_v61 = vld [vmem:[#allocation2 + $0x668] sm:$0xff] }
 0x10b   :  { %5792 = vst [vmem:[#allocation260_spill] sm:$0xff] %v4818_v25  ;;  %5793 = vst [vmem:[#allocation261_spill] sm:$0xff] %v4820_v61  ;;  %v4822_v7 = vld [vmem:[#allocation2 + $0x670] sm:$0xff]  ;;  %v4824_v48 = vld [vmem:[#allocation2 + $0x678] sm:$0xff] }
 0x10c   :  { %5794 = vst [vmem:[#allocation262_spill] sm:$0xff] %v4822_v7  ;;  %5795 = vst [vmem:[#allocation263_spill] sm:$0xff] %v4824_v48  ;;  %v4826_v54 = vld [vmem:[#allocation2 + $0x680] sm:$0xff]  ;;  %v4828_v49 = vld [vmem:[#allocation2 + $0x688] sm:$0xff] }
 0x10d   :  { %5796 = vst [vmem:[#allocation264_spill] sm:$0xff] %v4826_v54  ;;  %5797 = vst [vmem:[#allocation265_spill] sm:$0xff] %v4828_v49  ;;  %v4830_v50 = vld [vmem:[#allocation2 + $0x690] sm:$0xff]  ;;  %v4832_v39 = vld [vmem:[#allocation2 + $0x698] sm:$0xff] }
 0x10e   :  { %5798 = vst [vmem:[#allocation266_spill] sm:$0xff] %v4830_v50  ;;  %5799 = vst [vmem:[#allocation267_spill] sm:$0xff] %v4832_v39  ;;  %v4834_v59 = vld [vmem:[#allocation2 + $0x6a0] sm:$0xff]  ;;  %v4836_v57 = vld [vmem:[#allocation2 + $0x6a8] sm:$0xff] }
 0x10f   :  { %5800 = vst [vmem:[#allocation268_spill] sm:$0xff] %v4834_v59  ;;  %5801 = vst [vmem:[#allocation269_spill] sm:$0xff] %v4836_v57  ;;  %v4838_v22 = vld [vmem:[#allocation2 + $0x6b0] sm:$0xff]  ;;  %v4840_v25 = vld [vmem:[#allocation2 + $0x6b8] sm:$0xff] }
 0x110   :  { %5802 = vst [vmem:[#allocation270_spill] sm:$0xff] %v4838_v22  ;;  %5803 = vst [vmem:[#allocation271_spill] sm:$0xff] %v4840_v25  ;;  %v4842_v61 = vld [vmem:[#allocation2 + $0x6c0] sm:$0xff]  ;;  %v4844_v7 = vld [vmem:[#allocation2 + $0x6c8] sm:$0xff] }
 0x111   :  { %5804 = vst [vmem:[#allocation272_spill] sm:$0xff] %v4842_v61  ;;  %5805 = vst [vmem:[#allocation273_spill] sm:$0xff] %v4844_v7  ;;  %v4846_v48 = vld [vmem:[#allocation2 + $0x6d0] sm:$0xff]  ;;  %v4848_v54 = vld [vmem:[#allocation2 + $0x6d8] sm:$0xff] }
 0x112   :  { %5806 = vst [vmem:[#allocation274_spill] sm:$0xff] %v4846_v48  ;;  %5807 = vst [vmem:[#allocation275_spill] sm:$0xff] %v4848_v54  ;;  %v4850_v49 = vld [vmem:[#allocation2 + $0x6e0] sm:$0xff]  ;;  %v4852_v50 = vld [vmem:[#allocation2 + $0x6e8] sm:$0xff] }
 0x113   :  { %5808 = vst [vmem:[#allocation276_spill] sm:$0xff] %v4850_v49  ;;  %5809 = vst [vmem:[#allocation277_spill] sm:$0xff] %v4852_v50  ;;  %v4854_v39 = vld [vmem:[#allocation2 + $0x6f0] sm:$0xff]  ;;  %v4856_v59 = vld [vmem:[#allocation2 + $0x6f8] sm:$0xff] }
 0x114   :  { %5810 = vst [vmem:[#allocation278_spill] sm:$0xff] %v4854_v39  ;;  %5811 = vst [vmem:[#allocation279_spill] sm:$0xff] %v4856_v59  ;;  %v4858_v57 = vld [vmem:[#allocation2 + $0x700] sm:$0xff]  ;;  %v4860_v22 = vld [vmem:[#allocation2 + $0x708] sm:$0xff] }
 0x115   :  { %5812 = vst [vmem:[#allocation280_spill] sm:$0xff] %v4858_v57  ;;  %5813 = vst [vmem:[#allocation281_spill] sm:$0xff] %v4860_v22  ;;  %v4862_v25 = vld [vmem:[#allocation2 + $0x710] sm:$0xff]  ;;  %v4864_v61 = vld [vmem:[#allocation2 + $0x718] sm:$0xff] }
 0x116   :  { %5814 = vst [vmem:[#allocation282_spill] sm:$0xff] %v4862_v25  ;;  %5815 = vst [vmem:[#allocation283_spill] sm:$0xff] %v4864_v61  ;;  %v4866_v7 = vld [vmem:[#allocation2 + $0x720] sm:$0xff]  ;;  %v4868_v48 = vld [vmem:[#allocation2 + $0x728] sm:$0xff] }
 0x117   :  { %5816 = vst [vmem:[#allocation284_spill] sm:$0xff] %v4866_v7  ;;  %5817 = vst [vmem:[#allocation285_spill] sm:$0xff] %v4868_v48  ;;  %v4870_v54 = vld [vmem:[#allocation2 + $0x730] sm:$0xff]  ;;  %v4872_v49 = vld [vmem:[#allocation2 + $0x738] sm:$0xff] }
 0x118   :  { %5818 = vst [vmem:[#allocation286_spill] sm:$0xff] %v4870_v54  ;;  %5819 = vst [vmem:[#allocation287_spill] sm:$0xff] %v4872_v49  ;;  %v4874_v50 = vld [vmem:[#allocation2 + $0x740] sm:$0xff]  ;;  %v4876_v39 = vld [vmem:[#allocation2 + $0x748] sm:$0xff] }
 0x119   :  { %5820 = vst [vmem:[#allocation288_spill] sm:$0xff] %v4874_v50  ;;  %5821 = vst [vmem:[#allocation289_spill] sm:$0xff] %v4876_v39  ;;  %v4878_v59 = vld [vmem:[#allocation2 + $0x750] sm:$0xff]  ;;  %v4880_v57 = vld [vmem:[#allocation2 + $0x758] sm:$0xff] }
 0x11a   :  { %5822 = vst [vmem:[#allocation290_spill] sm:$0xff] %v4878_v59  ;;  %5823 = vst [vmem:[#allocation291_spill] sm:$0xff] %v4880_v57  ;;  %v4882_v22 = vld [vmem:[#allocation2 + $0x760] sm:$0xff]  ;;  %v4884_v25 = vld [vmem:[#allocation2 + $0x768] sm:$0xff] }
 0x11b   :  { %5824 = vst [vmem:[#allocation292_spill] sm:$0xff] %v4882_v22  ;;  %5825 = vst [vmem:[#allocation293_spill] sm:$0xff] %v4884_v25  ;;  %v4886_v61 = vld [vmem:[#allocation2 + $0x770] sm:$0xff]  ;;  %v4888_v7 = vld [vmem:[#allocation2 + $0x778] sm:$0xff] }
 0x11c   :  { %5826 = vst [vmem:[#allocation294_spill] sm:$0xff] %v4886_v61  ;;  %5827 = vst [vmem:[#allocation295_spill] sm:$0xff] %v4888_v7  ;;  %v4890_v48 = vld [vmem:[#allocation2 + $0x780] sm:$0xff]  ;;  %v4892_v54 = vld [vmem:[#allocation2 + $0x788] sm:$0xff] }
 0x11d   :  { %5828 = vst [vmem:[#allocation296_spill] sm:$0xff] %v4890_v48  ;;  %5829 = vst [vmem:[#allocation297_spill] sm:$0xff] %v4892_v54  ;;  %v4894_v49 = vld [vmem:[#allocation2 + $0x790] sm:$0xff]  ;;  %v4896_v50 = vld [vmem:[#allocation2 + $0x798] sm:$0xff] }
 0x11e   :  { %5830 = vst [vmem:[#allocation298_spill] sm:$0xff] %v4894_v49  ;;  %5831 = vst [vmem:[#allocation299_spill] sm:$0xff] %v4896_v50  ;;  %v4898_v39 = vld [vmem:[#allocation2 + $0x7a0] sm:$0xff]  ;;  %v4900_v59 = vld [vmem:[#allocation2 + $0x7a8] sm:$0xff] }
 0x11f   :  { %5832 = vst [vmem:[#allocation300_spill] sm:$0xff] %v4898_v39  ;;  %5833 = vst [vmem:[#allocation301_spill] sm:$0xff] %v4900_v59  ;;  %v4902_v57 = vld [vmem:[#allocation2 + $0x7b0] sm:$0xff]  ;;  %v4904_v22 = vld [vmem:[#allocation2 + $0x7b8] sm:$0xff] }
 0x120   :  { %5834 = vst [vmem:[#allocation302_spill] sm:$0xff] %v4902_v57  ;;  %5835 = vst [vmem:[#allocation303_spill] sm:$0xff] %v4904_v22  ;;  %v4906_v25 = vld [vmem:[#allocation2 + $0x7c0] sm:$0xff]  ;;  %v4908_v61 = vld [vmem:[#allocation2 + $0x7c8] sm:$0xff] }
 0x121   :  { %5836 = vst [vmem:[#allocation304_spill] sm:$0xff] %v4906_v25  ;;  %5837 = vst [vmem:[#allocation305_spill] sm:$0xff] %v4908_v61  ;;  %v4910_v7 = vld [vmem:[#allocation2 + $0x7d0] sm:$0xff]  ;;  %v4912_v48 = vld [vmem:[#allocation2 + $0x7d8] sm:$0xff] }
 0x122   :  { %5838 = vst [vmem:[#allocation306_spill] sm:$0xff] %v4910_v7  ;;  %5839 = vst [vmem:[#allocation307_spill] sm:$0xff] %v4912_v48  ;;  %v4914_v54 = vld [vmem:[#allocation2 + $0x7e0] sm:$0xff]  ;;  %v4916_v49 = vld [vmem:[#allocation2 + $0x7e8] sm:$0xff] }
 0x123   :  { %5840 = vst [vmem:[#allocation308_spill] sm:$0xff] %v4914_v54  ;;  %5841 = vst [vmem:[#allocation309_spill] sm:$0xff] %v4916_v49  ;;  %v4918_v50 = vld [vmem:[#allocation2 + $0x7f0] sm:$0xff]  ;;  %v4920_v39 = vld [vmem:[#allocation2 + $0x7f8] sm:$0xff] }
 0x124   :  { %5842 = vst [vmem:[#allocation310_spill] sm:$0xff] %v4918_v50  ;;  %5843 = vst [vmem:[#allocation311_spill] sm:$0xff] %v4920_v39  ;;  %v4922_v59 = vld [vmem:[#allocation8] sm:$0xff]  ;;  %v4924_v57 = vld [vmem:[#allocation8 + $0x8] sm:$0xff] }
 0x125   :  { %v4926_v22 = vld [vmem:[#allocation8 + $0x10] sm:$0xff]  ;;  %v4928_v25 = vld [vmem:[#allocation8 + $0x18] sm:$0xff]  ;;  %v4930_v61 = vld [vmem:[#allocation8 + $0x20] sm:$0xff]  ;;  %v715_v48 = vmul.f32 0.5, %v4922_v59  ;;  %v716_v54 = vmul.f32 0.5, %v4924_v57 }
 0x126   :  { %v4934_v7 = vld [vmem:[#allocation8 + $0x28] sm:$0xff]  ;;  %v4936_v49 = vld [vmem:[#allocation8 + $0x30] sm:$0xff]  ;;  %v717_v39 = vmul.f32 0.5, %v4926_v22  ;;  %v718_v50 = vmul.f32 0.5, %v4928_v25  ;;  %v4940_v5 = vld [vmem:[#allocation8 + $0x38] sm:$0xff]  ;;  %v719_v8 = vmul.f32 0.5, %v4930_v61 }
 0x127   :  { %3840 = vtanh.f32 %v715_v48  ;;  %v720_v14 = vmul.f32 0.5, %v4934_v7  ;;  %v4944_v31 = vld [vmem:[#allocation8 + $0x40] sm:$0xff]  ;;  %v721_v9 = vmul.f32 0.5, %v4936_v49  ;;  %v4947_v1 = vld [vmem:[#allocation8 + $0x48] sm:$0xff]  ;;  %v4949_v13 = vld [vmem:[#allocation8 + $0x50] sm:$0xff]  ;;  %v722_v56 = vmul.f32 0.5, %v4940_v5 }
 0x128   :  { %3842 = vtanh.f32 %v716_v54  ;;  %v4952_v41 = vld [vmem:[#allocation8 + $0x58] sm:$0xff]  ;;  %v4954_v32 = vld [vmem:[#allocation8 + $0x60] sm:$0xff]  ;;  %v4956_v48 = vld [vmem:[#allocation8 + $0x68] sm:$0xff]  ;;  %v801_v52 = vmul.f32 0.5, %v4947_v1 }
 0x129   :  { %3844 = vtanh.f32 %v717_v39  ;;  %v4958_v54 = vld [vmem:[#allocation8 + $0x70] sm:$0xff]  ;;  %v4960_v11 = vld [vmem:[#allocation8 + $0x78] sm:$0xff]  ;;  %v800_v39 = vmul.f32 0.5, %v4944_v31  ;;  %v4963_v26 = vld [vmem:[#allocation8 + $0x80] sm:$0xff]  ;;  %v804_v12 = vmul.f32 0.5, %v4954_v32  ;;  %v805_v3 = vmul.f32 0.5, %v4956_v48 }
 0x12a   :  { %3846 = vtanh.f32 %v718_v50  ;;  %v802_v50 = vmul.f32 0.5, %v4949_v13  ;;  %v4967_v4 = vld [vmem:[#allocation8 + $0x88] sm:$0xff]  ;;  %v4969_v2 = vld [vmem:[#allocation8 + $0x90] sm:$0xff]  ;;  %v4971_v36 = vld [vmem:[#allocation8 + $0x98] sm:$0xff]  ;;  %v806_v58 = vmul.f32 0.5, %v4958_v54  ;;  %v807_v15 = vmul.f32 0.5, %v4960_v11 }
 0x12b   :  { %3848 = vtanh.f32 %v719_v8  ;;  %v803_v8 = vmul.f32 0.5, %v4952_v41  ;;  %v4976_v28 = vld [vmem:[#allocation8 + $0xa0] sm:$0xff]  ;;  %v4980_v60 = vld [vmem:[#allocation8 + $0xb0] sm:$0xff]  ;;  %v4984_v34 = vld [vmem:[#allocation8 + $0xb8] sm:$0xff]  ;;  %v885_v42 = vmul.f32 0.5, %v4967_v4  ;;  %v886_v17 = vmul.f32 0.5, %v4969_v2 }
 0x12c   :  { %3850 = vtanh.f32 %v720_v14  ;;  %v4978_v14 = vld [vmem:[#allocation8 + $0xa8] sm:$0xff]  ;;  %v4987_v62 = vld [vmem:[#allocation8 + $0xc0] sm:$0xff]  ;;  %v887_v20 = vmul.f32 0.5, %v4971_v36  ;;  %v4996_v27 = vld [vmem:[#allocation8 + $0xd8] sm:$0xff]  ;;  %v888_v23 = vmul.f32 0.5, %v4976_v28  ;;  %v5003_v43 = vmul.f32 0.5, %v4980_v60 }
 0x12d   :  { %3852 = vtanh.f32 %v721_v9  ;;  %v884_v9 = vmul.f32 0.5, %v4963_v26  ;;  %v4989_v6 = vld [vmem:[#allocation8 + $0xc8] sm:$0xff]  ;;  %v5000_v30 = vmul.f32 0.5, %v4978_v14  ;;  %v5010_v38 = vmul.f32 0.5, %v4984_v34  ;;  %v5012_v35 = vld [vmem:[#allocation8 + $0xf0] sm:$0xff]  ;;  %v5020_v19 = vld [vmem:[#allocation8 + $0xf8] sm:$0xff] }
 0x12e   :  { %3854 = vtanh.f32 %v722_v56  ;;  %v4994_v56 = vld [vmem:[#allocation8 + $0xd0] sm:$0xff]  ;;  %v5007_v10 = vld [vmem:[#allocation8 + $0xe8] sm:$0xff]  ;;  %5845 = vst [vmem:[#allocation313_spill] sm:$0xff] %v5012_v35  ;;  %v5018_v51 = vmul.f32 0.5, %v4989_v6  ;;  %5846 = vst [vmem:[#allocation314_spill] sm:$0xff] %v5020_v19  ;;  %v5035_v18 = vmul.f32 0.5, %v5012_v35 }
 0x12f   :  { %3856 = vtanh.f32 %v800_v39  ;;  %v5005_v39 = vld [vmem:[#allocation8 + $0xe0] sm:$0xff]  ;;  %5844 = vst [vmem:[#allocation312_spill] sm:$0xff] %v5007_v10  ;;  %v5023_v33 = vmul.f32 0.5, %v4994_v56  ;;  %v5032_v47 = vmul.f32 0.5, %v5007_v10 }
 0x130   :  { %3858 = vtanh.f32 %v801_v52  ;;  %v5015_v52 = vmul.f32 0.5, %v4987_v62  ;;  %v5029_v24 = vmul.f32 0.5, %v5005_v39 }
 0x131   :  { %v3841_v63 = vpop.eup %3840  ;;  %3860 = vtanh.f32 %v802_v50  ;;  %v5026_v50 = vmul.f32 0.5, %v4996_v27 }
 0x132   :  { %v3843_v45 = vpop.eup %3842  ;;  %v731_v16 = vmul.f32 0.5, %v3841_v63  ;;  %3862 = vtanh.f32 %v803_v8 }
 0x133   :  { %v3845_v53 = vpop.eup %3844  ;;  %v732_v29 = vmul.f32 0.5, %v3843_v45  ;;  %3864 = vtanh.f32 %v804_v12  ;;  %v5038_v45 = vmul.f32 0.5, %v5020_v19 }
 0x134   :  { %v3847_v44 = vpop.eup %3846  ;;  %v733_v63 = vmul.f32 0.5, %v3845_v53  ;;  %v739_v8 = vadd.f32 0.5, %v731_v16  ;;  %3866 = vtanh.f32 %v805_v3 }
 0x135   :  { %v3849_v40 = vpop.eup %3848  ;;  %v734_v46 = vmul.f32 0.5, %v3847_v44  ;;  %v740_v0 = vadd.f32 0.5, %v732_v29  ;;  %3868 = vtanh.f32 %v806_v58 }
 0x136   :  { %v3851_v12 = vpop.eup %3850  ;;  %v735_v55 = vmul.f32 0.5, %v3849_v40  ;;  %v741_v21 = vadd.f32 0.5, %v733_v63  ;;  %v5041_v37 = vmul.f32 %v739_v8, %v4922_v59  ;;  %3870 = vtanh.f32 %v807_v15 }
 0x137   :  { %v3853_v53 = vpop.eup %3852  ;;  %v736_v16 = vmul.f32 0.5, %v3851_v12  ;;  %v742_v3 = vadd.f32 0.5, %v734_v46  ;;  %v5044_v35 = vmul.f32 %v740_v0, %v4924_v57  ;;  %3872 = vtanh.f32 %v884_v9 }
 0x138   :  { %v3855_v44 = vpop.eup %3854  ;;  %v737_v29 = vmul.f32 0.5, %v3853_v53  ;;  %v743_v58 = vadd.f32 0.5, %v735_v55  ;;  %v5047_v19 = vmul.f32 %v741_v21, %v4926_v22  ;;  %3874 = vtanh.f32 %v885_v42 }
 0x139   :  { %v3857_v40 = vpop.eup %3856  ;;  %v738_v63 = vmul.f32 0.5, %v3855_v44  ;;  %v744_v10 = vadd.f32 0.5, %v736_v16  ;;  %v5050_v59 = vmul.f32 %v742_v3, %v4928_v25  ;;  %3876 = vtanh.f32 %v886_v17 }
 0x13a   :  { %v3859_v15 = vpop.eup %3858  ;;  %v745_v46 = vadd.f32 0.5, %v737_v29  ;;  %v5053_v0 = vmul.f32 %v743_v58, %v4930_v61  ;;  %v816_v57 = vmul.f32 0.5, %v3857_v40  ;;  %3878 = vtanh.f32 %v887_v20 }
 0x13b   :  { %v3861_v9 = vpop.eup %3860  ;;  %v746_v55 = vadd.f32 0.5, %v738_v63  ;;  %v5056_v22 = vmul.f32 %v744_v10, %v4934_v7  ;;  %v817_v21 = vmul.f32 0.5, %v3859_v15  ;;  %3880 = vtanh.f32 %v888_v23 }
 0x13c   :  { %v3863_v42 = vpop.eup %3862  ;;  %v5059_v8 = vmul.f32 %v745_v46, %v4936_v49  ;;  %v818_v25 = vmul.f32 0.5, %v3861_v9  ;;  %v824_v17 = vadd.f32 0.5, %v816_v57  ;;  %3882 = vtanh.f32 %v5000_v30 }
 0x13d   :  { %v3865_v12 = vpop.eup %3864  ;;  %v5063_v61 = vmul.f32 %v746_v55, %v4940_v5  ;;  %v819_v20 = vmul.f32 0.5, %v3863_v42  ;;  %v825_v53 = vadd.f32 0.5, %v817_v21  ;;  %3884 = vtanh.f32 %v5003_v43 }
 0x13e   :  { %v3867_v7 = vpop.eup %3866  ;;  %v820_v10 = vmul.f32 0.5, %v3865_v12  ;;  %v826_v16 = vadd.f32 0.5, %v818_v25  ;;  %v5067_v23 = vmul.f32 %v824_v17, %v4944_v31  ;;  %3886 = vtanh.f32 %v5010_v38 }
 0x13f   :  { %v3869_v49 = vpop.eup %3868  ;;  %v821_v3 = vmul.f32 0.5, %v3867_v7  ;;  %v827_v44 = vadd.f32 0.5, %v819_v20  ;;  %v5071_v30 = vmul.f32 %v825_v53, %v4947_v1  ;;  %3888 = vtanh.f32 %v5015_v52 }
 0x140   :  { %v3871_v5 = vpop.eup %3870  ;;  %v822_v29 = vmul.f32 0.5, %v3869_v49  ;;  %v828_v58 = vadd.f32 0.5, %v820_v10  ;;  %v5075_v43 = vmul.f32 %v826_v16, %v4949_v13  ;;  %3890 = vtanh.f32 %v5018_v51 }
 0x141   :  { %v3873_v31 = vpop.eup %3872  ;;  %v823_v40 = vmul.f32 0.5, %v3871_v5  ;;  %v829_v63 = vadd.f32 0.5, %v821_v3  ;;  %v5079_v38 = vmul.f32 %v827_v44, %v4952_v41  ;;  %3892 = vtanh.f32 %v5023_v33 }
 0x142   :  { %v3875_v1 = vpop.eup %3874  ;;  %v830_v15 = vadd.f32 0.5, %v822_v29  ;;  %v5083_v52 = vmul.f32 %v828_v58, %v4954_v32  ;;  %v900_v46 = vmul.f32 0.5, %v3873_v31  ;;  %3894 = vtanh.f32 %v5026_v50 }
 0x143   :  { %v3877_v13 = vpop.eup %3876  ;;  %v831_v57 = vadd.f32 0.5, %v823_v40  ;;  %v5087_v51 = vmul.f32 %v829_v63, %v4956_v48  ;;  %v901_v9 = vmul.f32 0.5, %v3875_v1  ;;  %3896 = vtanh.f32 %v5029_v24 }
 0x144   :  { %v3879_v41 = vpop.eup %3878  ;;  %v5091_v55 = vmul.f32 %v830_v15, %v4958_v54  ;;  %v902_v33 = vmul.f32 0.5, %v3877_v13  ;;  %v908_v21 = vadd.f32 0.5, %v900_v46  ;;  %3898 = vtanh.f32 %v5032_v47 }
 0x145   :  { %v3881_v32 = vpop.eup %3880  ;;  %v5095_v42 = vmul.f32 %v831_v57, %v4960_v11  ;;  %v903_v50 = vmul.f32 0.5, %v3879_v41  ;;  %v909_v25 = vadd.f32 0.5, %v901_v9  ;;  %3900 = vtanh.f32 %v5035_v18 }
 0x146   :  { %v3883_v48 = vpop.eup %3882  ;;  %v904_v17 = vmul.f32 0.5, %v3881_v32  ;;  %v910_v12 = vadd.f32 0.5, %v902_v33  ;;  %v5099_v24 = vmul.f32 %v908_v21, %v4963_v26  ;;  %3902 = vtanh.f32 %v5038_v45 }
 0x147   :  { %v3885_v54 = vpop.eup %3884  ;;  %v905_v20 = vmul.f32 0.5, %v3883_v48  ;;  %v911_v53 = vadd.f32 0.5, %v903_v50  ;;  %v5103_v47 = vmul.f32 %v909_v25, %v4967_v4 }
 0x148   :  { %v3887_v11 = vpop.eup %3886  ;;  %v906_v7 = vmul.f32 0.5, %v3885_v54  ;;  %v912_v10 = vadd.f32 0.5, %v904_v17  ;;  %v5106_v16 = vmul.f32 %v910_v12, %v4969_v2 }
 0x149   :  { %v3889_v18 = vpop.eup %3888  ;;  %v907_v49 = vmul.f32 0.5, %v3887_v11  ;;  %v913_v3 = vadd.f32 0.5, %v905_v20  ;;  %v5109_v26 = vmul.f32 %v911_v53, %v4971_v36  ;;  %v5847_v11 = vld [vmem:[#allocation312_spill] sm:$0xff] }
 0x14a   :  { %v3891_v44 = vpop.eup %3890  ;;  %v914_v45 = vadd.f32 0.5, %v906_v7  ;;  %v5112_v5 = vmul.f32 %v912_v10, %v4976_v28  ;;  %v984_v29 = vmul.f32 0.5, %v3889_v18  ;;  %v5849_v18 = vld [vmem:[#allocation314_spill] sm:$0xff] }
 0x14b   :  { %v3893_v4 = vpop.eup %3892  ;;  %v915_v58 = vadd.f32 0.5, %v907_v49  ;;  %v5115_v31 = vmul.f32 %v913_v3, %v4978_v14  ;;  %v985_v40 = vmul.f32 0.5, %v3891_v44 }
 0x14c   :  { %v3895_v2 = vpop.eup %3894  ;;  %v5118_v63 = vmul.f32 %v914_v45, %v4980_v60  ;;  %v986_v1 = vmul.f32 0.5, %v3893_v4  ;;  %v992_v15 = vadd.f32 0.5, %v984_v29 }
 0x14d   :  { %v3897_v36 = vpop.eup %3896  ;;  %v5121_v46 = vmul.f32 %v915_v58, %v4984_v34  ;;  %v987_v13 = vmul.f32 0.5, %v3895_v2  ;;  %v993_v28 = vadd.f32 0.5, %v985_v40 }
 0x14e   :  { %v3899_v57 = vpop.eup %3898  ;;  %v988_v9 = vmul.f32 0.5, %v3897_v36  ;;  %v994_v41 = vadd.f32 0.5, %v986_v1  ;;  %v5124_v33 = vmul.f32 %v992_v15, %v4987_v62 }
 0x14f   :  { %v3901_v14 = vpop.eup %3900  ;;  %v989_v21 = vmul.f32 0.5, %v3899_v57  ;;  %v995_v32 = vadd.f32 0.5, %v987_v13  ;;  %v5127_v60 = vmul.f32 %v993_v28, %v4989_v6  ;;  %v5848_v6 = vld [vmem:[#allocation313_spill] sm:$0xff] }
 0x150   :  { %v3903_v50 = vpop.eup %3902  ;;  %v990_v25 = vmul.f32 0.5, %v3901_v14  ;;  %v996_v48 = vadd.f32 0.5, %v988_v9  ;;  %v5130_v34 = vmul.f32 %v994_v41, %v4994_v56 }
 0x151   :  { %v991_v17 = vmul.f32 0.5, %v3903_v50  ;;  %v997_v12 = vadd.f32 0.5, %v989_v21  ;;  %v5133_v54 = vmul.f32 %v995_v32, %v4996_v27 }
 0x152   :  { %v998_v20 = vadd.f32 0.5, %v990_v25  ;;  %v5136_v62 = vmul.f32 %v996_v48, %v5005_v39 }
 0x153   :  { %v999_v53 = vadd.f32 0.5, %v991_v17  ;;  %v5139_v7 = vmul.f32 %v997_v12, %v5847_v11 }
 0x154   :  { %v5142_v10 = vmul.f32 %v998_v20, %v5848_v6 }
 0x155   :  { %v5145_v49 = vmul.f32 %v999_v53, %v5849_v18 }
 0x156   :  { %4049 = dma.done.wait [#allocation4 + $0x1], 32768 }
 0x157   :  { %4050 = vsyncadd [#allocation4 + $0x1], 4294934528  ;;  %v3003_v27 = vpack.c.bf16 %v5044_v35, %v5044_v35  ;;  %v3005_v56 = vpack.c.bf16 %v5050_v59, %v5050_v59  ;;  %v1070_v39 = vld [vmem:[#allocation2 + $0x840] sm:$0xff]  ;;  %v1071_v29 = vld [vmem:[#allocation2 + $0x848] sm:$0xff]  ;;  %vm2848_vm0 = vcmask 7168  }
 0x158   :  { %v1086_v3 = vld [vmem:[#allocation2 + $0x8c0] sm:$0xff]  ;;  %3066 = vmatprep.subr.bf16.mxu0 %v1070_v39  ;;  %v1087_v4 = vld [vmem:[#allocation2 + $0x8c8] sm:$0xff]  ;;  %v1072_v35 = vld [vmem:[#allocation2 + $0x850] sm:$0xff]  ;;  %v3002_v39 = vpack.c.bf16 %v5041_v37, %v5041_v37 }
 0x159   :  { %1462 = vmatprep.mubr.bf16.mxu0 %v3003_v27  ;;  %1502 = vmatprep.mubr.bf16.mxu1 %v3005_v56  ;;  %v1062_v44 = vld [vmem:[#allocation2 + $0x800] sm:$0xff]  ;;  %v1063_v58 = vld [vmem:[#allocation2 + $0x808] sm:$0xff]  ;;  %v1088_v2 = vld [vmem:[#allocation2 + $0x8d0] sm:$0xff] }
 0x15a   :  { %3088 = vmatprep.subr.bf16.mxu1 %v1086_v3  ;;  %v1078_v45 = vld [vmem:[#allocation2 + $0x880] sm:$0xff]  ;;  %3067 = vmatpush3.bf16.msra.mxu0 %v1062_v44  ;;  %v1079_v40 = vld [vmem:[#allocation2 + $0x888] sm:$0xff]  ;;  %v1064_v59 = vld [vmem:[#allocation2 + $0x810] sm:$0xff]  ;;  %v3004_v3 = vpack.c.bf16 %v5047_v19, %v5047_v19 }
 0x15b   :  { %3089 = vmatpush3.bf16.msra.mxu1 %v1078_v45  ;;  %3068 = vmatprep.subr.bf16.mxu0 %v1071_v29  ;;  %v1080_v1 = vld [vmem:[#allocation2 + $0x890] sm:$0xff]  ;;  %v1073_v15 = vld [vmem:[#allocation2 + $0x858] sm:$0xff]  ;;  %v1074_v57 = vld [vmem:[#allocation2 + $0x860] sm:$0xff] }
 0x15c   :  { %3090 = vmatprep.subr.bf16.mxu1 %v1087_v4  ;;  %v1089_v36 = vld [vmem:[#allocation2 + $0x8d8] sm:$0xff]  ;;  %v1090_v9 = vld [vmem:[#allocation2 + $0x8e0] sm:$0xff]  ;;  %v1075_v21 = vld [vmem:[#allocation2 + $0x868] sm:$0xff] }
 0x15d   :  { %v1065_v13 = vld [vmem:[#allocation2 + $0x818] sm:$0xff]  ;;  %v1066_v41 = vld [vmem:[#allocation2 + $0x820] sm:$0xff]  ;;  %v1091_v32 = vld [vmem:[#allocation2 + $0x8e8] sm:$0xff] }
 0x15e   :  { %3069 = vmatpush3.bf16.msra.mxu0 %v1063_v58  ;;  %v1081_v28 = vld [vmem:[#allocation2 + $0x898] sm:$0xff]  ;;  %v1082_v14 = vld [vmem:[#allocation2 + $0x8a0] sm:$0xff]  ;;  %v1067_v50 = vld [vmem:[#allocation2 + $0x828] sm:$0xff]  ;;  %v3007_v58 = vpack.c.bf16 %v5056_v22, %v5056_v22 }
 0x15f   :  { %3091 = vmatpush3.bf16.msra.mxu1 %v1079_v40  ;;  %3070 = vmatprep.subr.bf16.mxu0 %v1072_v35  ;;  %v1083_v25 = vld [vmem:[#allocation2 + $0x8a8] sm:$0xff]  ;;  %v1076_v48 = vld [vmem:[#allocation2 + $0x870] sm:$0xff]  ;;  %v1077_v53 = vld [vmem:[#allocation2 + $0x878] sm:$0xff]  ;;  %v3009_v40 = vpack.c.bf16 %v5063_v61, %v5063_v61 }
 0x160   :  { %3092 = vmatprep.subr.bf16.mxu1 %v1088_v2  ;;  %v1092_v17 = vld [vmem:[#allocation2 + $0x8f0] sm:$0xff]  ;;  %v1093_v11 = vld [vmem:[#allocation2 + $0x8f8] sm:$0xff]  ;;  %v1102_v27 = vld [vmem:[#allocation2 + $0x940] sm:$0xff] }
 0x161   :  { %v1068_v12 = vld [vmem:[#allocation2 + $0x830] sm:$0xff]  ;;  %v1069_v6 = vld [vmem:[#allocation2 + $0x838] sm:$0xff]  ;;  %v1118_v56 = vld [vmem:[#allocation2 + $0x9c0] sm:$0xff] }
 0x162   :  { %3071 = vmatpush3.bf16.msra.mxu0 %v1064_v59  ;;  %v1084_v20 = vld [vmem:[#allocation2 + $0x8b0] sm:$0xff]  ;;  %v1085_v18 = vld [vmem:[#allocation2 + $0x8b8] sm:$0xff]  ;;  %v1094_v44 = vld [vmem:[#allocation2 + $0x900] sm:$0xff] }
 0x163   :  { %3093 = vmatpush3.bf16.msra.mxu1 %v1080_v1  ;;  %3072 = vmatprep.subr.bf16.mxu0 %v1073_v15  ;;  %v1110_v45 = vld [vmem:[#allocation2 + $0x980] sm:$0xff]  ;;  %v1103_v29 = vld [vmem:[#allocation2 + $0x948] sm:$0xff]  ;;  %v1104_v35 = vld [vmem:[#allocation2 + $0x950] sm:$0xff] }
 0x164   :  { %3094 = vmatprep.subr.bf16.mxu1 %v1089_v36  ;;  %v1119_v4 = vld [vmem:[#allocation2 + $0x9c8] sm:$0xff]  ;;  %v1120_v2 = vld [vmem:[#allocation2 + $0x9d0] sm:$0xff]  ;;  %v1105_v1 = vld [vmem:[#allocation2 + $0x958] sm:$0xff] }
 0x165   :  { %v1095_v37 = vld [vmem:[#allocation2 + $0x908] sm:$0xff]  ;;  %v1096_v22 = vld [vmem:[#allocation2 + $0x910] sm:$0xff]  ;;  %v1121_v61 = vld [vmem:[#allocation2 + $0x9d8] sm:$0xff] }
 0x166   :  { %3073 = vmatpush3.bf16.msra.mxu0 %v1065_v13  ;;  %v1111_v19 = vld [vmem:[#allocation2 + $0x988] sm:$0xff]  ;;  %v1112_v59 = vld [vmem:[#allocation2 + $0x990] sm:$0xff]  ;;  %v1097_v15 = vld [vmem:[#allocation2 + $0x918] sm:$0xff] }
 0x167   :  { %3095 = vmatpush3.bf16.msra.mxu1 %v1081_v28  ;;  %3074 = vmatprep.subr.bf16.mxu0 %v1074_v57  ;;  %v1113_v36 = vld [vmem:[#allocation2 + $0x998] sm:$0xff]  ;;  %v1106_v13 = vld [vmem:[#allocation2 + $0x960] sm:$0xff] }
 0x168   :  { %3096 = vmatprep.subr.bf16.mxu1 %v1090_v9  ;;  %v1122_v28 = vld [vmem:[#allocation2 + $0x9e0] sm:$0xff] }
 0x169   :  { %v1098_v57 = vld [vmem:[#allocation2 + $0x920] sm:$0xff] }
 0x16a   :  { %3075 = vmatpush3.bf16.msra.mxu0 %v1066_v41  ;;  %v1114_v9 = vld [vmem:[#allocation2 + $0x9a0] sm:$0xff]  ;;  %v1107_v41 = vld [vmem:[#allocation2 + $0x968] sm:$0xff] }
 0x16b   :  { %3097 = vmatpush3.bf16.msra.mxu1 %v1082_v14  ;;  %3076 = vmatprep.subr.bf16.mxu0 %v1075_v21  ;;  %v1123_v14 = vld [vmem:[#allocation2 + $0x9e8] sm:$0xff] }
 0x16c   :  { %3098 = vmatprep.subr.bf16.mxu1 %v1091_v32  ;;  %v1099_v21 = vld [vmem:[#allocation2 + $0x928] sm:$0xff] }
 0x16d   :  { %v1115_v32 = vld [vmem:[#allocation2 + $0x9a8] sm:$0xff] }
 0x16e   :  { %3077 = vmatpush3.bf16.msra.mxu0 %v1067_v50  ;;  %v1108_v50 = vld [vmem:[#allocation2 + $0x970] sm:$0xff] }
 0x16f   :  { %3099 = vmatpush3.bf16.msra.mxu1 %v1083_v25  ;;  %3078 = vmatprep.subr.bf16.mxu0 %v1076_v48  ;;  %v1124_v25 = vld [vmem:[#allocation2 + $0x9f0] sm:$0xff] }
 0x170   :  { %3100 = vmatprep.subr.bf16.mxu1 %v1092_v17  ;;  %v1100_v48 = vld [vmem:[#allocation2 + $0x930] sm:$0xff] }
 0x171   :  { %v1116_v17 = vld [vmem:[#allocation2 + $0x9b0] sm:$0xff] }
 0x172   :  { %3079 = vmatpush3.bf16.msra.mxu0 %v1068_v12  ;;  %v1109_v12 = vld [vmem:[#allocation2 + $0x978] sm:$0xff] }
 0x173   :  { %3101 = vmatpush3.bf16.msra.mxu1 %v1084_v20  ;;  %3080 = vmatprep.subr.bf16.mxu0 %v1077_v53  ;;  %v1125_v20 = vld [vmem:[#allocation2 + $0x9f8] sm:$0xff] }
 0x174   :  { %3102 = vmatprep.subr.bf16.mxu1 %v1093_v11  ;;  %v1101_v53 = vld [vmem:[#allocation2 + $0x938] sm:$0xff] }
 0x175   :  { %v1117_v11 = vld [vmem:[#allocation2 + $0x9b8] sm:$0xff] }
 0x176   :  { %3081 = vmatpush3.bf16.msra.mxu0 %v1069_v6  ;;  %v1134_v6 = vld [vmem:[#allocation2 + $0xa40] sm:$0xff] }
 0x177   :  { %3103 = vmatpush3.bf16.msra.mxu1 %v1085_v18  ;;  %3110 = vmatprep.subr.bf16.mxu0 %v1102_v27  ;;  %v1150_v18 = vld [vmem:[#allocation2 + $0xac0] sm:$0xff]  ;;  %v3006_v27 = vpack.c.bf16 %v5053_v0, %v5053_v0  ;;  %v1127_v0 = vld [vmem:[#allocation2 + $0xa08] sm:$0xff] }
 0x178   :  { %3132 = vmatprep.subr.bf16.mxu1 %v1118_v56  ;;  %v3008_v56 = vpack.c.bf16 %v5059_v8, %v5059_v8  ;;  %v1143_v8 = vld [vmem:[#allocation2 + $0xa88] sm:$0xff] }
 0x179   :  { %1463 = vmatmul.mubr.bf16.vlgmr.msra.gmra.mrb[0].mxu0 %v3002_v39  ;;  %v1126_v39 = vld [vmem:[#allocation2 + $0xa00] sm:$0xff] }
 0x17a   :  { %1503 = vmatmul.mubr.bf16.vlgmr.msra.gmra.mrb[0].mxu1 %v3004_v3  ;;  %3111 = vmatpush3.bf16.msra.mxu0 %v1094_v44  ;;  %v1142_v3 = vld [vmem:[#allocation2 + $0xa80] sm:$0xff]  ;;  %v1135_v44 = vld [vmem:[#allocation2 + $0xa48] sm:$0xff] }
 0x17b   :  { %3133 = vmatpush3.bf16.msra.mxu1 %v1110_v45  ;;  %3112 = vmatprep.subr.bf16.mxu0 %v1103_v29  ;;  %v1151_v45 = vld [vmem:[#allocation2 + $0xac8] sm:$0xff]  ;;  %v3011_v29 = vpack.c.bf16 %v5071_v30, %v5071_v30  ;;  %v1128_v30 = vld [vmem:[#allocation2 + $0xa10] sm:$0xff] }
 0x17c   :  { %3134 = vmatprep.subr.bf16.mxu1 %v1119_v4  ;;  %1542 = vmatprep.mubr.bf16.mxu0 %v3007_v58  ;;  %v3013_v4 = vpack.c.bf16 %v5079_v38, %v5079_v38  ;;  %v1136_v58 = vld [vmem:[#allocation2 + $0xa50] sm:$0xff]  ;;  %v1153_v38 = vld [vmem:[#allocation2 + $0xad8] sm:$0xff] }
 0x17d   :  { %1582 = vmatprep.mubr.bf16.mxu1 %v3009_v40  ;;  %v1152_v40 = vld [vmem:[#allocation2 + $0xad0] sm:$0xff] }
 0x17e   :  { %3113 = vmatpush3.bf16.msra.mxu0 %v1095_v37  ;;  %v1144_v37 = vld [vmem:[#allocation2 + $0xa90] sm:$0xff] }
 0x17f   :  { %3135 = vmatpush3.bf16.msra.mxu1 %v1111_v19  ;;  %3114 = vmatprep.subr.bf16.mxu0 %v1104_v35  ;;  %v1137_v19 = vld [vmem:[#allocation2 + $0xa58] sm:$0xff] }
 0x180   :  { %3136 = vmatprep.subr.bf16.mxu1 %v1120_v2  ;;  %v1129_v35 = vld [vmem:[#allocation2 + $0xa18] sm:$0xff] }
 0x181   :  { %v1145_v2 = vld [vmem:[#allocation2 + $0xa98] sm:$0xff] }
 0x182   :  { %3115 = vmatpush3.bf16.msra.mxu0 %v1096_v22  ;;  %v1138_v22 = vld [vmem:[#allocation2 + $0xa60] sm:$0xff] }
 0x183   :  { %3137 = vmatpush3.bf16.msra.mxu1 %v1112_v59  ;;  %3116 = vmatprep.subr.bf16.mxu0 %v1105_v1  ;;  %v1154_v59 = vld [vmem:[#allocation2 + $0xae0] sm:$0xff] }
 0x184   :  { %3138 = vmatprep.subr.bf16.mxu1 %v1121_v61  ;;  %v1130_v1 = vld [vmem:[#allocation2 + $0xa20] sm:$0xff] }
 0x185   :  { %v1146_v61 = vld [vmem:[#allocation2 + $0xaa0] sm:$0xff] }
 0x186   :  { %3117 = vmatpush3.bf16.msra.mxu0 %v1097_v15  ;;  %v1139_v15 = vld [vmem:[#allocation2 + $0xa68] sm:$0xff] }
 0x187   :  { %3139 = vmatpush3.bf16.msra.mxu1 %v1113_v36  ;;  %3118 = vmatprep.subr.bf16.mxu0 %v1106_v13  ;;  %v1155_v36 = vld [vmem:[#allocation2 + $0xae8] sm:$0xff] }
 0x188   :  { %3140 = vmatprep.subr.bf16.mxu1 %v1122_v28  ;;  %v1131_v13 = vld [vmem:[#allocation2 + $0xa28] sm:$0xff] }
 0x189   :  { %v1147_v28 = vld [vmem:[#allocation2 + $0xaa8] sm:$0xff] }
 0x18a   :  { %3119 = vmatpush3.bf16.msra.mxu0 %v1098_v57  ;;  %v1140_v57 = vld [vmem:[#allocation2 + $0xa70] sm:$0xff] }
 0x18b   :  { %3141 = vmatpush3.bf16.msra.mxu1 %v1114_v9  ;;  %3120 = vmatprep.subr.bf16.mxu0 %v1107_v41  ;;  %v1156_v9 = vld [vmem:[#allocation2 + $0xaf0] sm:$0xff] }
 0x18c   :  { %3142 = vmatprep.subr.bf16.mxu1 %v1123_v14  ;;  %v1132_v41 = vld [vmem:[#allocation2 + $0xa30] sm:$0xff] }
 0x18d   :  { %v1148_v14 = vld [vmem:[#allocation2 + $0xab0] sm:$0xff] }
 0x18e   :  { %3121 = vmatpush3.bf16.msra.mxu0 %v1099_v21  ;;  %v1141_v21 = vld [vmem:[#allocation2 + $0xa78] sm:$0xff] }
 0x18f   :  { %3143 = vmatpush3.bf16.msra.mxu1 %v1115_v32  ;;  %3122 = vmatprep.subr.bf16.mxu0 %v1108_v50  ;;  %v1157_v32 = vld [vmem:[#allocation2 + $0xaf8] sm:$0xff] }
 0x190   :  { %3144 = vmatprep.subr.bf16.mxu1 %v1124_v25  ;;  %v1133_v50 = vld [vmem:[#allocation2 + $0xa38] sm:$0xff] }
 0x191   :  { %v1149_v25 = vld [vmem:[#allocation2 + $0xab8] sm:$0xff] }
 0x192   :  { %3123 = vmatpush3.bf16.msra.mxu0 %v1100_v48  ;;  %v1166_v48 = vld [vmem:[#allocation2 + $0xb40] sm:$0xff] }
 0x193   :  { %3145 = vmatpush3.bf16.msra.mxu1 %v1116_v17  ;;  %3124 = vmatprep.subr.bf16.mxu0 %v1109_v12  ;;  %v1182_v17 = vld [vmem:[#allocation2 + $0xbc0] sm:$0xff]  ;;  %v3010_v12 = vpack.c.bf16 %v5067_v23, %v5067_v23  ;;  %v1159_v23 = vld [vmem:[#allocation2 + $0xb08] sm:$0xff] }
 0x194   :  { %3146 = vmatprep.subr.bf16.mxu1 %v1125_v20  ;;  %v3012_v20 = vpack.c.bf16 %v5075_v43, %v5075_v43  ;;  %v1175_v43 = vld [vmem:[#allocation2 + $0xb88] sm:$0xff] }
 0x196   :  { %3125 = vmatpush3.bf16.msra.mxu0 %v1101_v53  ;;  %v1158_v53 = vld [vmem:[#allocation2 + $0xb00] sm:$0xff] }
 0x197   :  { %3147 = vmatpush3.bf16.msra.mxu1 %v1117_v11  ;;  %3154 = vmatprep.subr.bf16.mxu0 %v1134_v6  ;;  %v1174_v11 = vld [vmem:[#allocation2 + $0xb80] sm:$0xff]  ;;  %v1167_v6 = vld [vmem:[#allocation2 + $0xb48] sm:$0xff] }
 0x198   :  { %3176 = vmatprep.subr.bf16.mxu1 %v1150_v18  ;;  %v1183_v18 = vld [vmem:[#allocation2 + $0xbc8] sm:$0xff] }
 0x199   :  { %1543 = vmatmul.mubr.bf16.vlgmr.msra.gmra.mrb[4].mxu0 %v3006_v27  ;;  %v3015_v27 = vpack.c.bf16 %v5087_v51, %v5087_v51  ;;  %v1160_v51 = vld [vmem:[#allocation2 + $0xb10] sm:$0xff] }
 0x19a   :  { %1583 = vmatmul.mubr.bf16.vlgmr.msra.gmra.mrb[4].mxu1 %v3008_v56  ;;  %3155 = vmatpush3.bf16.msra.mxu0 %v1126_v39  ;;  %v3017_v56 = vpack.c.bf16 %v5095_v42, %v5095_v42  ;;  %v1168_v39 = vld [vmem:[#allocation2 + $0xb50] sm:$0xff]  ;;  %v1185_v42 = vld [vmem:[#allocation2 + $0xbd8] sm:$0xff] }
 0x19b   :  { %3177 = vmatpush3.bf16.msra.mxu1 %v1142_v3  ;;  %3156 = vmatprep.subr.bf16.mxu0 %v1135_v44  ;;  %v1184_v3 = vld [vmem:[#allocation2 + $0xbd0] sm:$0xff] }
 0x19c   :  { %3178 = vmatprep.subr.bf16.mxu1 %v1151_v45  ;;  %1622 = vmatprep.mubr.bf16.mxu0 %v3011_v29  ;;  %v1176_v44 = vld [vmem:[#allocation2 + $0xb90] sm:$0xff]  ;;  %v1169_v45 = vld [vmem:[#allocation2 + $0xb58] sm:$0xff] }
 0x19d   :  { %1662 = vmatprep.mubr.bf16.mxu1 %v3013_v4  ;;  %v1161_v29 = vld [vmem:[#allocation2 + $0xb18] sm:$0xff] }
 0x19e   :  { %3157 = vmatpush3.bf16.msra.mxu0 %v1127_v0  ;;  %v1177_v4 = vld [vmem:[#allocation2 + $0xb98] sm:$0xff]  ;;  %v1170_v0 = vld [vmem:[#allocation2 + $0xb60] sm:$0xff] }
 0x19f   :  { %3179 = vmatpush3.bf16.msra.mxu1 %v1143_v8  ;;  %3158 = vmatprep.subr.bf16.mxu0 %v1136_v58  ;;  %v1186_v8 = vld [vmem:[#allocation2 + $0xbe0] sm:$0xff] }
 0x1a0   :  { %3180 = vmatprep.subr.bf16.mxu1 %v1152_v40  ;;  %v1162_v58 = vld [vmem:[#allocation2 + $0xb20] sm:$0xff] }
 0x1a1   :  { %v1178_v40 = vld [vmem:[#allocation2 + $0xba0] sm:$0xff] }
 0x1a2   :  { %3159 = vmatpush3.bf16.msra.mxu0 %v1128_v30  ;;  %v1171_v30 = vld [vmem:[#allocation2 + $0xb68] sm:$0xff] }
 0x1a3   :  { %3181 = vmatpush3.bf16.msra.mxu1 %v1144_v37  ;;  %3160 = vmatprep.subr.bf16.mxu0 %v1137_v19  ;;  %v1187_v37 = vld [vmem:[#allocation2 + $0xbe8] sm:$0xff] }
 0x1a4   :  { %3182 = vmatprep.subr.bf16.mxu1 %v1153_v38  ;;  %v1163_v19 = vld [vmem:[#allocation2 + $0xb28] sm:$0xff] }
 0x1a5   :  { %v1179_v38 = vld [vmem:[#allocation2 + $0xba8] sm:$0xff] }
 0x1a6   :  { %3161 = vmatpush3.bf16.msra.mxu0 %v1129_v35  ;;  %v1172_v35 = vld [vmem:[#allocation2 + $0xb70] sm:$0xff] }
 0x1a7   :  { %3183 = vmatpush3.bf16.msra.mxu1 %v1145_v2  ;;  %3162 = vmatprep.subr.bf16.mxu0 %v1138_v22  ;;  %v1188_v2 = vld [vmem:[#allocation2 + $0xbf0] sm:$0xff] }
 0x1a8   :  { %3184 = vmatprep.subr.bf16.mxu1 %v1154_v59  ;;  %v1164_v22 = vld [vmem:[#allocation2 + $0xb30] sm:$0xff] }
 0x1a9   :  { %v1180_v59 = vld [vmem:[#allocation2 + $0xbb0] sm:$0xff] }
 0x1aa   :  { %3163 = vmatpush3.bf16.msra.mxu0 %v1130_v1  ;;  %v1173_v1 = vld [vmem:[#allocation2 + $0xb78] sm:$0xff] }
 0x1ab   :  { %3185 = vmatpush3.bf16.msra.mxu1 %v1146_v61  ;;  %3164 = vmatprep.subr.bf16.mxu0 %v1139_v15  ;;  %v1189_v61 = vld [vmem:[#allocation2 + $0xbf8] sm:$0xff] }
 0x1ac   :  { %3186 = vmatprep.subr.bf16.mxu1 %v1155_v36  ;;  %v1165_v15 = vld [vmem:[#allocation2 + $0xb38] sm:$0xff] }
 0x1ad   :  { %v1181_v36 = vld [vmem:[#allocation2 + $0xbb8] sm:$0xff] }
 0x1ae   :  { %3165 = vmatpush3.bf16.msra.mxu0 %v1131_v13  ;;  %v1198_v13 = vld [vmem:[#allocation2 + $0xc40] sm:$0xff] }
 0x1af   :  { %3187 = vmatpush3.bf16.msra.mxu1 %v1147_v28  ;;  %3166 = vmatprep.subr.bf16.mxu0 %v1140_v57  ;;  %v1214_v28 = vld [vmem:[#allocation2 + $0xcc0] sm:$0xff]  ;;  %v3014_v57 = vpack.c.bf16 %v5083_v52, %v5083_v52  ;;  %v1191_v52 = vld [vmem:[#allocation2 + $0xc08] sm:$0xff] }
 0x1b0   :  { %3188 = vmatprep.subr.bf16.mxu1 %v1156_v9  ;;  %v3016_v9 = vpack.c.bf16 %v5091_v55, %v5091_v55  ;;  %v1207_v55 = vld [vmem:[#allocation2 + $0xc88] sm:$0xff] }
 0x1b2   :  { %3167 = vmatpush3.bf16.msra.mxu0 %v1132_v41  ;;  %v1190_v41 = vld [vmem:[#allocation2 + $0xc00] sm:$0xff] }
 0x1b3   :  { %3189 = vmatpush3.bf16.msra.mxu1 %v1148_v14  ;;  %3168 = vmatprep.subr.bf16.mxu0 %v1141_v21  ;;  %v1206_v14 = vld [vmem:[#allocation2 + $0xc80] sm:$0xff]  ;;  %v1199_v21 = vld [vmem:[#allocation2 + $0xc48] sm:$0xff] }
 0x1b4   :  { %3190 = vmatprep.subr.bf16.mxu1 %v1157_v32  ;;  %v1215_v32 = vld [vmem:[#allocation2 + $0xcc8] sm:$0xff] }
 0x1b6   :  { %3169 = vmatpush3.bf16.msra.mxu0 %v1133_v50  ;;  %v3019_v50 = vpack.c.bf16 %v5103_v47, %v5103_v47  ;;  %v1192_v47 = vld [vmem:[#allocation2 + $0xc10] sm:$0xff] }
 0x1b7   :  { %3191 = vmatpush3.bf16.msra.mxu1 %v1149_v25  ;;  %3198 = vmatprep.subr.bf16.mxu0 %v1166_v48  ;;  %v3021_v25 = vpack.c.bf16 %v5109_v26, %v5109_v26  ;;  %v1200_v48 = vld [vmem:[#allocation2 + $0xc50] sm:$0xff]  ;;  %v1217_v26 = vld [vmem:[#allocation2 + $0xcd8] sm:$0xff] }
 0x1b8   :  { %3220 = vmatprep.subr.bf16.mxu1 %v1182_v17  ;;  %v1216_v17 = vld [vmem:[#allocation2 + $0xcd0] sm:$0xff] }
 0x1b9   :  { %1623 = vmatmul.mubr.bf16.vlgmr.msra.gmra.mrb[8].mxu0 %v3010_v12  ;;  %v1208_v12 = vld [vmem:[#allocation2 + $0xc90] sm:$0xff] }
 0x1ba   :  { %1663 = vmatmul.mubr.bf16.vlgmr.msra.gmra.mrb[8].mxu1 %v3012_v20  ;;  %3199 = vmatpush3.bf16.msra.mxu0 %v1158_v53  ;;  %v1201_v20 = vld [vmem:[#allocation2 + $0xc58] sm:$0xff] }
 0x1bb   :  { %3221 = vmatpush3.bf16.msra.mxu1 %v1174_v11  ;;  %3200 = vmatprep.subr.bf16.mxu0 %v1167_v6  ;;  %v1193_v53 = vld [vmem:[#allocation2 + $0xc18] sm:$0xff]  ;;  %v1202_v6 = vld [vmem:[#allocation2 + $0xc60] sm:$0xff] }
 0x1bc   :  { %3222 = vmatprep.subr.bf16.mxu1 %v1183_v18  ;;  %1702 = vmatprep.mubr.bf16.mxu0 %v3015_v27  ;;  %v1209_v11 = vld [vmem:[#allocation2 + $0xc98] sm:$0xff]  ;;  %v1218_v18 = vld [vmem:[#allocation2 + $0xce0] sm:$0xff] }
 0x1bd   :  { %1742 = vmatprep.mubr.bf16.mxu1 %v3017_v56  ;;  %v1194_v27 = vld [vmem:[#allocation2 + $0xc20] sm:$0xff] }
 0x1be   :  { %3201 = vmatpush3.bf16.msra.mxu0 %v1159_v23  ;;  %v1210_v56 = vld [vmem:[#allocation2 + $0xca0] sm:$0xff]  ;;  %v1203_v23 = vld [vmem:[#allocation2 + $0xc68] sm:$0xff] }
 0x1bf   :  { %3223 = vmatpush3.bf16.msra.mxu1 %v1175_v43  ;;  %3202 = vmatprep.subr.bf16.mxu0 %v1168_v39  ;;  %v1219_v43 = vld [vmem:[#allocation2 + $0xce8] sm:$0xff] }
 0x1c0   :  { %3224 = vmatprep.subr.bf16.mxu1 %v1184_v3  ;;  %v1195_v39 = vld [vmem:[#allocation2 + $0xc28] sm:$0xff] }
 0x1c1   :  { %v1211_v3 = vld [vmem:[#allocation2 + $0xca8] sm:$0xff] }
 0x1c2   :  { %3203 = vmatpush3.bf16.msra.mxu0 %v1160_v51  ;;  %v1204_v51 = vld [vmem:[#allocation2 + $0xc70] sm:$0xff] }
 0x1c3   :  { %3225 = vmatpush3.bf16.msra.mxu1 %v1176_v44  ;;  %3204 = vmatprep.subr.bf16.mxu0 %v1169_v45  ;;  %v1220_v44 = vld [vmem:[#allocation2 + $0xcf0] sm:$0xff] }
 0x1c4   :  { %3226 = vmatprep.subr.bf16.mxu1 %v1185_v42  ;;  %v1196_v45 = vld [vmem:[#allocation2 + $0xc30] sm:$0xff] }
 0x1c5   :  { %v1212_v42 = vld [vmem:[#allocation2 + $0xcb0] sm:$0xff] }
 0x1c6   :  { %3205 = vmatpush3.bf16.msra.mxu0 %v1161_v29  ;;  %v1205_v29 = vld [vmem:[#allocation2 + $0xc78] sm:$0xff] }
 0x1c7   :  { %3227 = vmatpush3.bf16.msra.mxu1 %v1177_v4  ;;  %3206 = vmatprep.subr.bf16.mxu0 %v1170_v0  ;;  %v1221_v4 = vld [vmem:[#allocation2 + $0xcf8] sm:$0xff] }
 0x1c8   :  { %3228 = vmatprep.subr.bf16.mxu1 %v1186_v8  ;;  %v1197_v0 = vld [vmem:[#allocation2 + $0xc38] sm:$0xff] }
 0x1c9   :  { %v1213_v8 = vld [vmem:[#allocation2 + $0xcb8] sm:$0xff] }
 0x1ca   :  { %3207 = vmatpush3.bf16.msra.mxu0 %v1162_v58  ;;  %v1230_v58 = vld [vmem:[#allocation2 + $0xd40] sm:$0xff] }
 0x1cb   :  { %3229 = vmatpush3.bf16.msra.mxu1 %v1178_v40  ;;  %3208 = vmatprep.subr.bf16.mxu0 %v1171_v30  ;;  %v1246_v40 = vld [vmem:[#allocation2 + $0xdc0] sm:$0xff]  ;;  %v3018_v30 = vpack.c.bf16 %v5099_v24, %v5099_v24  ;;  %v1223_v24 = vld [vmem:[#allocation2 + $0xd08] sm:$0xff] }
 0x1cc   :  { %3230 = vmatprep.subr.bf16.mxu1 %v1187_v37  ;;  %v3020_v37 = vpack.c.bf16 %v5106_v16, %v5106_v16  ;;  %v1239_v16 = vld [vmem:[#allocation2 + $0xd88] sm:$0xff] }
 0x1ce   :  { %3209 = vmatpush3.bf16.msra.mxu0 %v1163_v19  ;;  %v1222_v19 = vld [vmem:[#allocation2 + $0xd00] sm:$0xff] }
 0x1cf   :  { %3231 = vmatpush3.bf16.msra.mxu1 %v1179_v38  ;;  %3210 = vmatprep.subr.bf16.mxu0 %v1172_v35  ;;  %v1238_v38 = vld [vmem:[#allocation2 + $0xd80] sm:$0xff]  ;;  %v1231_v35 = vld [vmem:[#allocation2 + $0xd48] sm:$0xff] }
 0x1d0   :  { %3232 = vmatprep.subr.bf16.mxu1 %v1188_v2  ;;  %v1247_v2 = vld [vmem:[#allocation2 + $0xdc8] sm:$0xff] }
 0x1d2   :  { %3211 = vmatpush3.bf16.msra.mxu0 %v1164_v22  ;;  %v3023_v22 = vpack.c.bf16 %v5115_v31, %v5115_v31  ;;  %v1224_v31 = vld [vmem:[#allocation2 + $0xd10] sm:$0xff] }
 0x1d3   :  { %3233 = vmatpush3.bf16.msra.mxu1 %v1180_v59  ;;  %3212 = vmatprep.subr.bf16.mxu0 %v1173_v1  ;;  %v3025_v59 = vpack.c.bf16 %v5121_v46, %v5121_v46  ;;  %v1232_v1 = vld [vmem:[#allocation2 + $0xd50] sm:$0xff]  ;;  %v1249_v46 = vld [vmem:[#allocation2 + $0xdd8] sm:$0xff] }
 0x1d4   :  { %3234 = vmatprep.subr.bf16.mxu1 %v1189_v61  ;;  %v1248_v61 = vld [vmem:[#allocation2 + $0xdd0] sm:$0xff] }
 0x1d6   :  { %3213 = vmatpush3.bf16.msra.mxu0 %v1165_v15  ;;  %v1240_v15 = vld [vmem:[#allocation2 + $0xd90] sm:$0xff] }
 0x1d7   :  { %3235 = vmatpush3.bf16.msra.mxu1 %v1181_v36  ;;  %3242 = vmatprep.subr.bf16.mxu0 %v1198_v13  ;;  %v1233_v36 = vld [vmem:[#allocation2 + $0xd58] sm:$0xff] }
 0x1d8   :  { %3264 = vmatprep.subr.bf16.mxu1 %v1214_v28  ;;  %v1225_v13 = vld [vmem:[#allocation2 + $0xd18] sm:$0xff] }
 0x1d9   :  { %1703 = vmatmul.mubr.bf16.vlgmr.msra.gmra.mrb[12].mxu0 %v3014_v57  ;;  %v1241_v28 = vld [vmem:[#allocation2 + $0xd98] sm:$0xff]  ;;  %v1234_v57 = vld [vmem:[#allocation2 + $0xd60] sm:$0xff] }
 0x1da   :  { %1743 = vmatmul.mubr.bf16.vlgmr.msra.gmra.mrb[12].mxu1 %v3016_v9  ;;  %3243 = vmatpush3.bf16.msra.mxu0 %v1190_v41  ;;  %v1250_v9 = vld [vmem:[#allocation2 + $0xde0] sm:$0xff] }
 0x1db   :  { %3265 = vmatpush3.bf16.msra.mxu1 %v1206_v14  ;;  %3244 = vmatprep.subr.bf16.mxu0 %v1199_v21  ;;  %v1226_v41 = vld [vmem:[#allocation2 + $0xd20] sm:$0xff]  ;;  %v1235_v21 = vld [vmem:[#allocation2 + $0xd68] sm:$0xff] }
 0x1dc   :  { %3266 = vmatprep.subr.bf16.mxu1 %v1215_v32  ;;  %1782 = vmatprep.mubr.bf16.mxu0 %v3019_v50  ;;  %v1242_v14 = vld [vmem:[#allocation2 + $0xda0] sm:$0xff]  ;;  %v1251_v32 = vld [vmem:[#allocation2 + $0xde8] sm:$0xff] }
 0x1dd   :  { %1822 = vmatprep.mubr.bf16.mxu1 %v3021_v25  ;;  %v1227_v50 = vld [vmem:[#allocation2 + $0xd28] sm:$0xff] }
 0x1de   :  { %3245 = vmatpush3.bf16.msra.mxu0 %v1191_v52  ;;  %v1243_v25 = vld [vmem:[#allocation2 + $0xda8] sm:$0xff]  ;;  %v1236_v52 = vld [vmem:[#allocation2 + $0xd70] sm:$0xff] }
 0x1df   :  { %3267 = vmatpush3.bf16.msra.mxu1 %v1207_v55  ;;  %3246 = vmatprep.subr.bf16.mxu0 %v1200_v48  ;;  %v1252_v55 = vld [vmem:[#allocation2 + $0xdf0] sm:$0xff] }
 0x1e0   :  { %3268 = vmatprep.subr.bf16.mxu1 %v1216_v17  ;;  %v1228_v48 = vld [vmem:[#allocation2 + $0xd30] sm:$0xff] }
 0x1e1   :  { %v1244_v17 = vld [vmem:[#allocation2 + $0xdb0] sm:$0xff] }
 0x1e2   :  { %3247 = vmatpush3.bf16.msra.mxu0 %v1192_v47  ;;  %v1237_v47 = vld [vmem:[#allocation2 + $0xd78] sm:$0xff] }
 0x1e3   :  { %3269 = vmatpush3.bf16.msra.mxu1 %v1208_v12  ;;  %3248 = vmatprep.subr.bf16.mxu0 %v1201_v20  ;;  %v1253_v12 = vld [vmem:[#allocation2 + $0xdf8] sm:$0xff] }
 0x1e4   :  { %3270 = vmatprep.subr.bf16.mxu1 %v1217_v26  ;;  %v1229_v20 = vld [vmem:[#allocation2 + $0xd38] sm:$0xff] }
 0x1e5   :  { %v1245_v26 = vld [vmem:[#allocation2 + $0xdb8] sm:$0xff] }
 0x1e6   :  { %3249 = vmatpush3.bf16.msra.mxu0 %v1193_v53  ;;  %v1262_v53 = vld [vmem:[#allocation2 + $0xe40] sm:$0xff] }
 0x1e7   :  { %3271 = vmatpush3.bf16.msra.mxu1 %v1209_v11  ;;  %3250 = vmatprep.subr.bf16.mxu0 %v1202_v6  ;;  %v1278_v11 = vld [vmem:[#allocation2 + $0xec0] sm:$0xff]  ;;  %v3022_v6 = vpack.c.bf16 %v5112_v5, %v5112_v5  ;;  %v1255_v5 = vld [vmem:[#allocation2 + $0xe08] sm:$0xff] }
 0x1e8   :  { %3272 = vmatprep.subr.bf16.mxu1 %v1218_v18  ;;  %v3024_v18 = vpack.c.bf16 %v5118_v63, %v5118_v63  ;;  %v1271_v63 = vld [vmem:[#allocation2 + $0xe88] sm:$0xff] }
 0x1ea   :  { %3251 = vmatpush3.bf16.msra.mxu0 %v1194_v27  ;;  %v1254_v27 = vld [vmem:[#allocation2 + $0xe00] sm:$0xff] }
 0x1eb   :  { %3273 = vmatpush3.bf16.msra.mxu1 %v1210_v56  ;;  %3252 = vmatprep.subr.bf16.mxu0 %v1203_v23  ;;  %v1270_v56 = vld [vmem:[#allocation2 + $0xe80] sm:$0xff]  ;;  %v1263_v23 = vld [vmem:[#allocation2 + $0xe48] sm:$0xff] }
 0x1ec   :  { %3274 = vmatprep.subr.bf16.mxu1 %v1219_v43  ;;  %v1279_v43 = vld [vmem:[#allocation2 + $0xec8] sm:$0xff] }
 0x1ee   :  { %3253 = vmatpush3.bf16.msra.mxu0 %v1195_v39  ;;  %v3027_v39 = vpack.c.bf16 %v5127_v60, %v5127_v60  ;;  %v1256_v60 = vld [vmem:[#allocation2 + $0xe10] sm:$0xff] }
 0x1ef   :  { %3275 = vmatpush3.bf16.msra.mxu1 %v1211_v3  ;;  %3254 = vmatprep.subr.bf16.mxu0 %v1204_v51  ;;  %v3029_v3 = vpack.c.bf16 %v5133_v54, %v5133_v54  ;;  %v1264_v51 = vld [vmem:[#allocation2 + $0xe50] sm:$0xff]  ;;  %v1281_v54 = vld [vmem:[#allocation2 + $0xed8] sm:$0xff] }
 0x1f0   :  { %3276 = vmatprep.subr.bf16.mxu1 %v1220_v44  ;;  %v1280_v44 = vld [vmem:[#allocation2 + $0xed0] sm:$0xff] }
 0x1f2   :  { %3255 = vmatpush3.bf16.msra.mxu0 %v1196_v45  ;;  %v1272_v45 = vld [vmem:[#allocation2 + $0xe90] sm:$0xff] }
 0x1f3   :  { %3277 = vmatpush3.bf16.msra.mxu1 %v1212_v42  ;;  %3256 = vmatprep.subr.bf16.mxu0 %v1205_v29  ;;  %v1265_v42 = vld [vmem:[#allocation2 + $0xe58] sm:$0xff] }
 0x1f4   :  { %3278 = vmatprep.subr.bf16.mxu1 %v1221_v4  ;;  %v1257_v29 = vld [vmem:[#allocation2 + $0xe18] sm:$0xff] }
 0x1f5   :  { %v1273_v4 = vld [vmem:[#allocation2 + $0xe98] sm:$0xff] }
 0x1f6   :  { %3257 = vmatpush3.bf16.msra.mxu0 %v1197_v0  ;;  %v1266_v0 = vld [vmem:[#allocation2 + $0xe60] sm:$0xff] }
 0x1f7   :  { %3279 = vmatpush3.bf16.msra.mxu1 %v1213_v8  ;;  %3286 = vmatprep.subr.bf16.mxu0 %v1230_v58  ;;  %v1282_v8 = vld [vmem:[#allocation2 + $0xee0] sm:$0xff] }
 0x1f8   :  { %3308 = vmatprep.subr.bf16.mxu1 %v1246_v40  ;;  %v1258_v58 = vld [vmem:[#allocation2 + $0xe20] sm:$0xff] }
 0x1f9   :  { %1783 = vmatmul.mubr.bf16.vlgmr.msra.gmra.mrb[16].mxu0 %v3018_v30  ;;  %v1274_v40 = vld [vmem:[#allocation2 + $0xea0] sm:$0xff]  ;;  %v1267_v30 = vld [vmem:[#allocation2 + $0xe68] sm:$0xff] }
 0x1fa   :  { %1823 = vmatmul.mubr.bf16.vlgmr.msra.gmra.mrb[16].mxu1 %v3020_v37  ;;  %3287 = vmatpush3.bf16.msra.mxu0 %v1222_v19  ;;  %v1283_v37 = vld [vmem:[#allocation2 + $0xee8] sm:$0xff] }
 0x1fb   :  { %3309 = vmatpush3.bf16.msra.mxu1 %v1238_v38  ;;  %3288 = vmatprep.subr.bf16.mxu0 %v1231_v35  ;;  %v1259_v19 = vld [vmem:[#allocation2 + $0xe28] sm:$0xff]  ;;  %v1268_v35 = vld [vmem:[#allocation2 + $0xe70] sm:$0xff] }
 0x1fc   :  { %3310 = vmatprep.subr.bf16.mxu1 %v1247_v2  ;;  %1862 = vmatprep.mubr.bf16.mxu0 %v3023_v22  ;;  %v1275_v38 = vld [vmem:[#allocation2 + $0xea8] sm:$0xff]  ;;  %v1284_v2 = vld [vmem:[#allocation2 + $0xef0] sm:$0xff] }
 0x1fd   :  { %1902 = vmatprep.mubr.bf16.mxu1 %v3025_v59  ;;  %v1260_v22 = vld [vmem:[#allocation2 + $0xe30] sm:$0xff] }
 0x1fe   :  { %3289 = vmatpush3.bf16.msra.mxu0 %v1223_v24  ;;  %v1276_v59 = vld [vmem:[#allocation2 + $0xeb0] sm:$0xff]  ;;  %v1269_v24 = vld [vmem:[#allocation2 + $0xe78] sm:$0xff] }
 0x1ff   :  { %3311 = vmatpush3.bf16.msra.mxu1 %v1239_v16  ;;  %3290 = vmatprep.subr.bf16.mxu0 %v1232_v1  ;;  %v1285_v16 = vld [vmem:[#allocation2 + $0xef8] sm:$0xff] }
 0x200   :  { %3312 = vmatprep.subr.bf16.mxu1 %v1248_v61  ;;  %v1261_v1 = vld [vmem:[#allocation2 + $0xe38] sm:$0xff] }
 0x201   :  { %v1277_v61 = vld [vmem:[#allocation2 + $0xeb8] sm:$0xff] }
 0x202   :  { %3291 = vmatpush3.bf16.msra.mxu0 %v1224_v31  ;;  %v1294_v31 = vld [vmem:[#allocation2 + $0xf40] sm:$0xff] }
 0x203   :  { %3313 = vmatpush3.bf16.msra.mxu1 %v1240_v15  ;;  %3292 = vmatprep.subr.bf16.mxu0 %v1233_v36  ;;  %v1310_v15 = vld [vmem:[#allocation2 + $0xfc0] sm:$0xff]  ;;  %v3026_v36 = vpack.c.bf16 %v5124_v33, %v5124_v33  ;;  %v1287_v33 = vld [vmem:[#allocation2 + $0xf08] sm:$0xff] }
 0x204   :  { %3314 = vmatprep.subr.bf16.mxu1 %v1249_v46  ;;  %v3028_v46 = vpack.c.bf16 %v5130_v34, %v5130_v34  ;;  %v1303_v34 = vld [vmem:[#allocation2 + $0xf88] sm:$0xff] }
 0x206   :  { %3293 = vmatpush3.bf16.msra.mxu0 %v1225_v13  ;;  %v1286_v13 = vld [vmem:[#allocation2 + $0xf00] sm:$0xff] }
 0x207   :  { %3315 = vmatpush3.bf16.msra.mxu1 %v1241_v28  ;;  %3294 = vmatprep.subr.bf16.mxu0 %v1234_v57  ;;  %v1302_v28 = vld [vmem:[#allocation2 + $0xf80] sm:$0xff]  ;;  %v1295_v57 = vld [vmem:[#allocation2 + $0xf48] sm:$0xff] }
 0x208   :  { %3316 = vmatprep.subr.bf16.mxu1 %v1250_v9  ;;  %v1311_v9 = vld [vmem:[#allocation2 + $0xfc8] sm:$0xff] }
 0x20a   :  { %3295 = vmatpush3.bf16.msra.mxu0 %v1226_v41  ;;  %v3031_v41 = vpack.c.bf16 %v5139_v7, %v5139_v7  ;;  %v1288_v7 = vld [vmem:[#allocation2 + $0xf10] sm:$0xff] }
 0x20b   :  { %3317 = vmatpush3.bf16.msra.mxu1 %v1242_v14  ;;  %3296 = vmatprep.subr.bf16.mxu0 %v1235_v21  ;;  %v3033_v14 = vpack.c.bf16 %v5145_v49, %v5145_v49  ;;  %v1296_v21 = vld [vmem:[#allocation2 + $0xf50] sm:$0xff]  ;;  %v1313_v49 = vld [vmem:[#allocation2 + $0xfd8] sm:$0xff] }
 0x20c   :  { %3318 = vmatprep.subr.bf16.mxu1 %v1251_v32  ;;  %v1312_v32 = vld [vmem:[#allocation2 + $0xfd0] sm:$0xff] }
 0x20e   :  { %3297 = vmatpush3.bf16.msra.mxu0 %v1227_v50  ;;  %v1304_v50 = vld [vmem:[#allocation2 + $0xf90] sm:$0xff] }
 0x20f   :  { %3319 = vmatpush3.bf16.msra.mxu1 %v1243_v25  ;;  %3298 = vmatprep.subr.bf16.mxu0 %v1236_v52  ;;  %v1297_v25 = vld [vmem:[#allocation2 + $0xf58] sm:$0xff] }
 0x210   :  { %3320 = vmatprep.subr.bf16.mxu1 %v1252_v55  ;;  %v1289_v52 = vld [vmem:[#allocation2 + $0xf18] sm:$0xff] }
 0x211   :  { %v1305_v55 = vld [vmem:[#allocation2 + $0xf98] sm:$0xff] }
 0x212   :  { %3299 = vmatpush3.bf16.msra.mxu0 %v1228_v48  ;;  %v1298_v48 = vld [vmem:[#allocation2 + $0xf60] sm:$0xff] }
 0x213   :  { %3321 = vmatpush3.bf16.msra.mxu1 %v1244_v17  ;;  %3300 = vmatprep.subr.bf16.mxu0 %v1237_v47  ;;  %v1314_v17 = vld [vmem:[#allocation2 + $0xfe0] sm:$0xff] }
 0x214   :  { %3322 = vmatprep.subr.bf16.mxu1 %v1253_v12  ;;  %v1290_v47 = vld [vmem:[#allocation2 + $0xf20] sm:$0xff] }
 0x215   :  { %v1306_v12 = vld [vmem:[#allocation2 + $0xfa0] sm:$0xff] }
 0x216   :  { %3301 = vmatpush3.bf16.msra.mxu0 %v1229_v20  ;;  %v1299_v20 = vld [vmem:[#allocation2 + $0xf68] sm:$0xff] }
 0x217   :  { %3323 = vmatpush3.bf16.msra.mxu1 %v1245_v26  ;;  %3330 = vmatprep.subr.bf16.mxu0 %v1262_v53  ;;  %v1315_v26 = vld [vmem:[#allocation2 + $0xfe8] sm:$0xff] }
 0x218   :  { %3352 = vmatprep.subr.bf16.mxu1 %v1278_v11  ;;  %v1291_v53 = vld [vmem:[#allocation2 + $0xf28] sm:$0xff] }
 0x219   :  { %1863 = vmatmul.mubr.bf16.vlgmr.msra.gmra.mrb[20].mxu0 %v3022_v6  ;;  %v1307_v11 = vld [vmem:[#allocation2 + $0xfa8] sm:$0xff] }
 0x21a   :  { %1903 = vmatmul.mubr.bf16.vlgmr.msra.gmra.mrb[20].mxu1 %v3024_v18  ;;  %3331 = vmatpush3.bf16.msra.mxu0 %v1254_v27  ;;  %v1300_v27 = vld [vmem:[#allocation2 + $0xf70] sm:$0xff] }
 0x21b   :  { %3353 = vmatpush3.bf16.msra.mxu1 %v1270_v56  ;;  %3332 = vmatprep.subr.bf16.mxu0 %v1263_v23  ;;  %v1316_v56 = vld [vmem:[#allocation2 + $0xff0] sm:$0xff] }
 0x21c   :  { %3354 = vmatprep.subr.bf16.mxu1 %v1279_v43  ;;  %1942 = vmatprep.mubr.bf16.mxu0 %v3027_v39 }
 0x21d   :  { %1982 = vmatprep.mubr.bf16.mxu1 %v3029_v3 }
 0x21e   :  { %3333 = vmatpush3.bf16.msra.mxu0 %v1255_v5 }
 0x21f   :  { %3355 = vmatpush3.bf16.msra.mxu1 %v1271_v63  ;;  %3334 = vmatprep.subr.bf16.mxu0 %v1264_v51 }
 0x220   :  { %3356 = vmatprep.subr.bf16.mxu1 %v1280_v44 }
 0x222   :  { %3335 = vmatpush3.bf16.msra.mxu0 %v1256_v60  ;;  %v1292_v60 = vld [vmem:[#allocation2 + $0xf30] sm:$0xff] }
 0x223   :  { %3357 = vmatpush3.bf16.msra.mxu1 %v1272_v45  ;;  %3336 = vmatprep.subr.bf16.mxu0 %v1265_v42  ;;  %v1308_v45 = vld [vmem:[#allocation2 + $0xfb0] sm:$0xff] }
 0x224   :  { %3358 = vmatprep.subr.bf16.mxu1 %v1281_v54  ;;  %v1301_v54 = vld [vmem:[#allocation2 + $0xf78] sm:$0xff] }
 0x226   :  { %3337 = vmatpush3.bf16.msra.mxu0 %v1257_v29  ;;  %v1317_v29 = vld [vmem:[#allocation2 + $0xff8] sm:$0xff] }
 0x227   :  { %3359 = vmatpush3.bf16.msra.mxu1 %v1273_v4  ;;  %3338 = vmatprep.subr.bf16.mxu0 %v1266_v0  ;;  %v1293_v4 = vld [vmem:[#allocation2 + $0xf38] sm:$0xff] }
 0x228   :  { %3360 = vmatprep.subr.bf16.mxu1 %v1282_v8  ;;  %v1309_v0 = vld [vmem:[#allocation2 + $0xfb8] sm:$0xff]  ;;  %v3030_v8 = vpack.c.bf16 %v5136_v62, %v5136_v62  ;;  %v5855_v62 = vld [vmem:[#allocation72_spill] sm:$0xff] }
 0x22a   :  { %3339 = vmatpush3.bf16.msra.mxu0 %v1258_v58  ;;  %v3032_v58 = vpack.c.bf16 %v5142_v10, %v5142_v10  ;;  %v5857_v10 = vld [vmem:[#allocation81_spill] sm:$0xff] }
 0x22b   :  { %3361 = vmatpush3.bf16.msra.mxu1 %v1274_v40  ;;  %3340 = vmatprep.subr.bf16.mxu0 %v1267_v30  ;;  %v5850_v40 = vld [vmem:[#allocation64_spill] sm:$0xff] }
 0x22c   :  { %3362 = vmatprep.subr.bf16.mxu1 %v1283_v37  ;;  %v5851_v30 = vld [vmem:[#allocation80_spill] sm:$0xff] }
 0x22d   :  { %v5852_v37 = vld [vmem:[#allocation28_spill] sm:$0xff] }
 0x22e   :  { %3341 = vmatpush3.bf16.msra.mxu0 %v1259_v19  ;;  %v3035_v19 = vpack.c.bf16 %v5852_v37, %v5852_v37  ;;  %v5898_v37 = vld [vmem:[#allocation90_spill] sm:$0xff] }
 0x22f   :  { %3363 = vmatpush3.bf16.msra.mxu1 %v1275_v38  ;;  %3342 = vmatprep.subr.bf16.mxu0 %v1268_v35  ;;  %v5853_v38 = vld [vmem:[#allocation30_spill] sm:$0xff] }
 0x230   :  { %3364 = vmatprep.subr.bf16.mxu1 %v1284_v2  ;;  %v3037_v35 = vpack.c.bf16 %v5853_v38, %v5853_v38  ;;  %v5854_v2 = vld [vmem:[#allocation56_spill] sm:$0xff]  ;;  %v5900_v38 = vld [vmem:[#allocation99_spill] sm:$0xff] }
 0x232   :  { %3343 = vmatpush3.bf16.msra.mxu0 %v1260_v22  ;;  %v5856_v22 = vld [vmem:[#allocation65_spill] sm:$0xff] }
 0x233   :  { %3365 = vmatpush3.bf16.msra.mxu1 %v1276_v59  ;;  %3344 = vmatprep.subr.bf16.mxu0 %v1269_v24  ;;  %v5858_v59 = vld [vmem:[#allocation57_spill] sm:$0xff] }
 0x234   :  { %3366 = vmatprep.subr.bf16.mxu1 %v1285_v16  ;;  %v5859_v24 = vld [vmem:[#allocation73_spill] sm:$0xff]  ;;  %v5860_v16 = vld [vmem:[#allocation66_spill] sm:$0xff] }
 0x236   :  { %3345 = vmatpush3.bf16.msra.mxu0 %v1261_v1  ;;  %v5861_v1 = vld [vmem:[#allocation82_spill] sm:$0xff] }
 0x237   :  { %3367 = vmatpush3.bf16.msra.mxu1 %v1277_v61  ;;  %3374 = vmatprep.subr.bf16.mxu0 %v1294_v31  ;;  %v5862_v61 = vld [vmem:[#allocation58_spill] sm:$0xff] }
 0x238   :  { %3396 = vmatprep.subr.bf16.mxu1 %v1310_v15  ;;  %v5863_v31 = vld [vmem:[#allocation74_spill] sm:$0xff]  ;;  %v5864_v15 = vld [vmem:[#allocation67_spill] sm:$0xff] }
 0x239   :  { %1943 = vmatmul.mubr.bf16.vlgmr.msra.gmra.mrb[24].mxu0 %v3026_v36  ;;  %v5865_v36 = vld [vmem:[#allocation83_spill] sm:$0xff] }
 0x23a   :  { %1983 = vmatmul.mubr.bf16.vlgmr.msra.gmra.mrb[24].mxu1 %v3028_v46  ;;  %3375 = vmatpush3.bf16.msra.mxu0 %v1286_v13  ;;  %v5866_v46 = vld [vmem:[#allocation59_spill] sm:$0xff] }
 0x23b   :  { %3397 = vmatpush3.bf16.msra.mxu1 %v1302_v28  ;;  %3376 = vmatprep.subr.bf16.mxu0 %v1295_v57  ;;  %v5867_v13 = vld [vmem:[#allocation75_spill] sm:$0xff]  ;;  %v5868_v28 = vld [vmem:[#allocation68_spill] sm:$0xff] }
 0x23c   :  { %3398 = vmatprep.subr.bf16.mxu1 %v1311_v9  ;;  %2022 = vmatprep.mubr.bf16.mxu0 %v3031_v41  ;;  %v5869_v57 = vld [vmem:[#allocation84_spill] sm:$0xff] }
 0x23d   :  { %2062 = vmatprep.mubr.bf16.mxu1 %v3033_v14  ;;  %v5870_v9 = vld [vmem:[#allocation60_spill] sm:$0xff]  ;;  %v5872_v14 = vld [vmem:[#allocation69_spill] sm:$0xff] }
 0x23e   :  { %3377 = vmatpush3.bf16.msra.mxu0 %v1287_v33  ;;  %v5871_v41 = vld [vmem:[#allocation76_spill] sm:$0xff]  ;;  %v5873_v33 = vld [vmem:[#allocation85_spill] sm:$0xff] }
 0x23f   :  { %3399 = vmatpush3.bf16.msra.mxu1 %v1303_v34  ;;  %3378 = vmatprep.subr.bf16.mxu0 %v1296_v21 }
 0x240   :  { %3400 = vmatprep.subr.bf16.mxu1 %v1312_v32 }
 0x242   :  { %3379 = vmatpush3.bf16.msra.mxu0 %v1288_v7 }
 0x243   :  { %3401 = vmatpush3.bf16.msra.mxu1 %v1304_v50  ;;  %3380 = vmatprep.subr.bf16.mxu0 %v1297_v25 }
 0x244   :  { %3402 = vmatprep.subr.bf16.mxu1 %v1313_v49 }
 0x246   :  { %3381 = vmatpush3.bf16.msra.mxu0 %v1289_v52 }
 0x247   :  { %3403 = vmatpush3.bf16.msra.mxu1 %v1305_v55  ;;  %3382 = vmatprep.subr.bf16.mxu0 %v1298_v48  ;;  %v5874_v55 = vld [vmem:[#allocation61_spill] sm:$0xff] }
 0x248   :  { %3404 = vmatprep.subr.bf16.mxu1 %v1314_v17  ;;  %v5875_v48 = vld [vmem:[#allocation77_spill] sm:$0xff] }
 0x24a   :  { %3383 = vmatpush3.bf16.msra.mxu0 %v1290_v47 }
 0x24b   :  { %3405 = vmatpush3.bf16.msra.mxu1 %v1306_v12  ;;  %3384 = vmatprep.subr.bf16.mxu0 %v1299_v20  ;;  %v5876_v12 = vld [vmem:[#allocation70_spill] sm:$0xff] }
 0x24c   :  { %3406 = vmatprep.subr.bf16.mxu1 %v1315_v26  ;;  %v3082_v6 = vpop.f32.mrb[0].mxu0  ;;  %v5877_v20 = vld [vmem:[#allocation86_spill] sm:$0xff] }
 0x24d   :  { %v3104_v18 = vpop.f32.mrb[0].mxu1  ;;  %v3083_v23 = vpop.f32.mrb[1].mxu0 }
 0x24e   :  { %v3105_v43 = vpop.f32.mrb[1].mxu1  ;;  %v3084_v39 = vadd.f32 %v3083_v23, %v3082_v6  ;;  %v3085_v5 = vpop.f32.mrb[2].mxu0  ;;  %3385 = vmatpush3.bf16.msra.mxu0 %v1291_v53  ;;  %v5879_v6 = vld [vmem:[#allocation78_spill] sm:$0xff] }
 0x24f   :  { %v3106_v3 = vadd.f32 %v3105_v43, %v3104_v18  ;;  %v3107_v63 = vpop.f32.mrb[2].mxu1  ;;  %3407 = vmatpush3.bf16.msra.mxu1 %v1307_v11  ;;  %v3086_v51 = vpop.f32.mrb[3].mxu0  ;;  %3386 = vmatprep.subr.bf16.mxu0 %v1300_v27  ;;  %v5878_v11 = vld [vmem:[#allocation62_spill] sm:$0xff]  ;;  %v5880_v18 = vld [vmem:[#allocation71_spill] sm:$0xff]  ;;  %v5883_v43 = vld [vmem:[#allocation29_spill] sm:$0xff] }
 0x250   :  { %v3108_v44 = vpop.f32.mrb[3].mxu1  ;;  %3408 = vmatprep.subr.bf16.mxu1 %v1316_v56  ;;  %v5881_v27 = vld [vmem:[#allocation87_spill] sm:$0xff]  ;;  %v5886_v63 = vld [vmem:[#allocation96_spill] sm:$0xff] }
 0x251   :  { %v1505_v42 = vadd.f32 %v3106_v3, %v3084_v39  ;;  %v5882_v56 = vld [vmem:[#allocation27_spill] sm:$0xff]  ;;  %v3036_v39 = vpack.c.bf16 %v5883_v43, %v5883_v43  ;;  %v5887_v51 = vld [vmem:[#allocation112_spill] sm:$0xff]  ;;  %v5928_v43 = vld [vmem:[#allocation129_spill] sm:$0xff] }
 0x252   :  { %3387 = vmatpush3.bf16.msra.mxu0 %v1292_v60  ;;  %v3034_v23 = vpack.c.bf16 %v5882_v56, %v5882_v56  ;;  %v5884_v3 = vld [vmem:[#allocation63_spill] sm:$0xff]  ;;  %v5888_v44 = vld [vmem:[#allocation32_spill] sm:$0xff] }
 0x253   :  { %3409 = vmatpush3.bf16.msra.mxu1 %v1308_v45  ;;  %3388 = vmatprep.subr.bf16.mxu0 %v1301_v54  ;;  %v5885_v5 = vld [vmem:[#allocation79_spill] sm:$0xff]  ;;  %v3039_v60 = vpack.c.bf16 %v5888_v44, %v5888_v44  ;;  %v5889_v45 = vld [vmem:[#allocation34_spill] sm:$0xff]  ;;  %v5890_v54 = vld [vmem:[#allocation88_spill] sm:$0xff] }
 0x254   :  { %3410 = vmatprep.subr.bf16.mxu1 %v1317_v29  ;;  %v5891_v29 = vld [vmem:[#allocation104_spill] sm:$0xff]  ;;  %v5934_v44 = vld [vmem:[#allocation122_spill] sm:$0xff] }
 0x255   :  { %v5926_v56 = vld [vmem:[#allocation120_spill] sm:$0xff] }
 0x256   :  { %3389 = vmatpush3.bf16.msra.mxu0 %v1293_v4  ;;  %v5892_v4 = vld [vmem:[#allocation97_spill] sm:$0xff] }
 0x257   :  { %3411 = vmatpush3.bf16.msra.mxu1 %v1309_v0  ;;  %3418 = vmatprep.subr.bf16.mxu0 %v5850_v40  ;;  %v5893_v0 = vld [vmem:[#allocation113_spill] sm:$0xff]  ;;  %v5896_v40 = vld [vmem:[#allocation98_spill] sm:$0xff] }
 0x258   :  { %3440 = vmatprep.subr.bf16.mxu1 %v5851_v30  ;;  %v5897_v30 = vld [vmem:[#allocation114_spill] sm:$0xff] }
 0x259   :  { %2023 = vmatmul.mubr.bf16.vlgmr.msra.gmra.mrb[28].mxu0 %v3030_v8  ;;  %v5894_v8 = vld [vmem:[#allocation89_spill] sm:$0xff] }
 0x25a   :  { %2063 = vmatmul.mubr.bf16.vlgmr.msra.gmra.mrb[28].mxu1 %v3032_v58  ;;  %3419 = vmatpush3.bf16.msra.mxu0 %v5854_v2  ;;  %v5895_v58 = vld [vmem:[#allocation105_spill] sm:$0xff]  ;;  %v5902_v2 = vld [vmem:[#allocation91_spill] sm:$0xff] }
 0x25b   :  { %3441 = vmatpush3.bf16.msra.mxu1 %v5855_v62  ;;  %3420 = vmatprep.subr.bf16.mxu0 %v5856_v22  ;;  %v5903_v62 = vld [vmem:[#allocation107_spill] sm:$0xff]  ;;  %v5904_v22 = vld [vmem:[#allocation100_spill] sm:$0xff] }
 0x25c   :  { %3442 = vmatprep.subr.bf16.mxu1 %v5857_v10  ;;  %2214 = vmatprep.mubr.bf16.mxu0 %v3035_v19  ;;  %v5899_v19 = vld [vmem:[#allocation106_spill] sm:$0xff]  ;;  %v5905_v10 = vld [vmem:[#allocation116_spill] sm:$0xff] }
 0x25d   :  { %2254 = vmatprep.mubr.bf16.mxu1 %v3037_v35  ;;  %v5901_v35 = vld [vmem:[#allocation115_spill] sm:$0xff] }
 0x25e   :  { %3421 = vmatpush3.bf16.msra.mxu0 %v5858_v59  ;;  %v5906_v59 = vld [vmem:[#allocation92_spill] sm:$0xff] }
 0x25f   :  { %3443 = vmatpush3.bf16.msra.mxu1 %v5859_v24  ;;  %3422 = vmatprep.subr.bf16.mxu0 %v5860_v16  ;;  %v5907_v24 = vld [vmem:[#allocation108_spill] sm:$0xff]  ;;  %v5908_v16 = vld [vmem:[#allocation101_spill] sm:$0xff] }
 0x260   :  { %3444 = vmatprep.subr.bf16.mxu1 %v5861_v1  ;;  %v5909_v1 = vld [vmem:[#allocation117_spill] sm:$0xff] }
 0x262   :  { %3423 = vmatpush3.bf16.msra.mxu0 %v5862_v61 }
 0x263   :  { %3445 = vmatpush3.bf16.msra.mxu1 %v5863_v31  ;;  %3424 = vmatprep.subr.bf16.mxu0 %v5864_v15 }
 0x264   :  { %3446 = vmatprep.subr.bf16.mxu1 %v5865_v36 }
 0x266   :  { %3425 = vmatpush3.bf16.msra.mxu0 %v5866_v46 }
 0x267   :  { %3447 = vmatpush3.bf16.msra.mxu1 %v5867_v13  ;;  %3426 = vmatprep.subr.bf16.mxu0 %v5868_v28 }
 0x268   :  { %3448 = vmatprep.subr.bf16.mxu1 %v5869_v57 }
 0x26a   :  { %3427 = vmatpush3.bf16.msra.mxu0 %v5870_v9  ;;  %v5910_v9 = vld [vmem:[#allocation93_spill] sm:$0xff] }
 0x26b   :  { %3449 = vmatpush3.bf16.msra.mxu1 %v5871_v41  ;;  %3428 = vmatprep.subr.bf16.mxu0 %v5872_v14  ;;  %v5911_v41 = vld [vmem:[#allocation109_spill] sm:$0xff] }
 0x26c   :  { %3450 = vmatprep.subr.bf16.mxu1 %v5873_v33  ;;  %v3126_v34 = vpop.f32.mrb[4].mxu0 }
 0x26d   :  { %v3148_v21 = vpop.f32.mrb[4].mxu1  ;;  %v3127_v32 = vpop.f32.mrb[5].mxu0 }
 0x26e   :  { %v3149_v7 = vpop.f32.mrb[5].mxu1  ;;  %v3128_v50 = vadd.f32 %v3127_v32, %v3126_v34  ;;  %v3129_v49 = vpop.f32.mrb[6].mxu0  ;;  %3429 = vmatpush3.bf16.msra.mxu0 %v5874_v55  ;;  %v5912_v34 = vld [vmem:[#allocation102_spill] sm:$0xff]  ;;  %v5918_v55 = vld [vmem:[#allocation31_spill] sm:$0xff] }
 0x26f   :  { %v3150_v25 = vadd.f32 %v3149_v7, %v3148_v21  ;;  %v3151_v52 = vpop.f32.mrb[6].mxu1  ;;  %3451 = vmatpush3.bf16.msra.mxu1 %v5875_v48  ;;  %v3130_v17 = vpop.f32.mrb[7].mxu0  ;;  %3430 = vmatprep.subr.bf16.mxu0 %v5876_v12  ;;  %v5913_v21 = vld [vmem:[#allocation118_spill] sm:$0xff]  ;;  %v5916_v49 = vld [vmem:[#allocation103_spill] sm:$0xff]  ;;  %v3038_v48 = vpack.c.bf16 %v5918_v55, %v5918_v55  ;;  %v5962_v55 = vld [vmem:[#allocation152_spill] sm:$0xff] }
 0x270   :  { %v3152_v47 = vpop.f32.mrb[7].mxu1  ;;  %3452 = vmatprep.subr.bf16.mxu1 %v5877_v20  ;;  %v1545_v26 = vadd.f32 %v3128_v50, %v1505_v42  ;;  %v3041_v42 = vpack.c.bf16 %v5889_v45, %v5889_v45  ;;  %v5914_v50 = vld [vmem:[#allocation94_spill] sm:$0xff]  ;;  %v5917_v52 = vld [vmem:[#allocation119_spill] sm:$0xff]  ;;  %v5919_v17 = vld [vmem:[#allocation33_spill] sm:$0xff] }
 0x271   :  { %v3040_v47 = vpack.c.bf16 %v5919_v17, %v5919_v17  ;;  %v5920_v12 = vld [vmem:[#allocation95_spill] sm:$0xff]  ;;  %v5964_v17 = vld [vmem:[#allocation161_spill] sm:$0xff] }
 0x272   :  { %v1585_v53 = vadd.f32 %v3150_v25, %v1545_v26  ;;  %3431 = vmatpush3.bf16.msra.mxu0 %v5878_v11  ;;  %v5915_v25 = vld [vmem:[#allocation110_spill] sm:$0xff]  ;;  %v5921_v20 = vld [vmem:[#allocation111_spill] sm:$0xff]  ;;  %v5922_v26 = vld [vmem:[#allocation128_spill] sm:$0xff] }
 0x273   :  { %3453 = vmatpush3.bf16.msra.mxu1 %v5879_v6  ;;  %3432 = vmatprep.subr.bf16.mxu0 %v5880_v18  ;;  %v5924_v11 = vld [vmem:[#allocation36_spill] sm:$0xff]  ;;  %v5925_v18 = vld [vmem:[#allocation38_spill] sm:$0xff]  ;;  %v5936_v45 = vld [vmem:[#allocation131_spill] sm:$0xff] }
 0x274   :  { %3454 = vmatprep.subr.bf16.mxu1 %v5881_v27  ;;  %v3043_v6 = vpack.c.bf16 %v5924_v11, %v5924_v11  ;;  %v3045_v27 = vpack.c.bf16 %v5925_v18, %v5925_v18  ;;  %v5970_v11 = vld [vmem:[#allocation154_spill] sm:$0xff]  ;;  %v5972_v18 = vld [vmem:[#allocation163_spill] sm:$0xff] }
 0x276   :  { %3433 = vmatpush3.bf16.msra.mxu0 %v5884_v3  ;;  %v5930_v3 = vld [vmem:[#allocation121_spill] sm:$0xff] }
 0x277   :  { %3455 = vmatpush3.bf16.msra.mxu1 %v5885_v5  ;;  %3462 = vmatprep.subr.bf16.mxu0 %v5886_v63  ;;  %v5931_v5 = vld [vmem:[#allocation137_spill] sm:$0xff]  ;;  %v5932_v63 = vld [vmem:[#allocation130_spill] sm:$0xff] }
 0x278   :  { %3484 = vmatprep.subr.bf16.mxu1 %v5887_v51  ;;  %v5933_v51 = vld [vmem:[#allocation146_spill] sm:$0xff] }
 0x279   :  { %2215 = vmatmul.mubr.bf16.vlgmr.msra.gmra.mrb[32].mxu0 %v3034_v23  ;;  %v5927_v23 = vld [vmem:[#allocation136_spill] sm:$0xff] }
 0x27a   :  { %2255 = vmatmul.mubr.bf16.vlgmr.msra.gmra.mrb[32].mxu1 %v3036_v39  ;;  %3463 = vmatpush3.bf16.msra.mxu0 %v5890_v54  ;;  %v5929_v39 = vld [vmem:[#allocation145_spill] sm:$0xff]  ;;  %v5938_v54 = vld [vmem:[#allocation123_spill] sm:$0xff] }
 0x27b   :  { %3485 = vmatpush3.bf16.msra.mxu1 %v5891_v29  ;;  %3464 = vmatprep.subr.bf16.mxu0 %v5892_v4  ;;  %v5939_v29 = vld [vmem:[#allocation139_spill] sm:$0xff]  ;;  %v5940_v4 = vld [vmem:[#allocation132_spill] sm:$0xff] }
 0x27c   :  { %3486 = vmatprep.subr.bf16.mxu1 %v5893_v0  ;;  %2294 = vmatprep.mubr.bf16.mxu0 %v3039_v60  ;;  %v5935_v60 = vld [vmem:[#allocation138_spill] sm:$0xff]  ;;  %v5941_v0 = vld [vmem:[#allocation148_spill] sm:$0xff] }
 0x27d   :  { %2334 = vmatprep.mubr.bf16.mxu1 %v3041_v42  ;;  %v5937_v42 = vld [vmem:[#allocation147_spill] sm:$0xff] }
 0x27e   :  { %3465 = vmatpush3.bf16.msra.mxu0 %v5894_v8  ;;  %v5942_v8 = vld [vmem:[#allocation124_spill] sm:$0xff] }
 0x27f   :  { %3487 = vmatpush3.bf16.msra.mxu1 %v5895_v58  ;;  %3466 = vmatprep.subr.bf16.mxu0 %v5896_v40  ;;  %v5943_v58 = vld [vmem:[#allocation140_spill] sm:$0xff]  ;;  %v5944_v40 = vld [vmem:[#allocation133_spill] sm:$0xff] }
 0x280   :  { %3488 = vmatprep.subr.bf16.mxu1 %v5897_v30  ;;  %v5945_v30 = vld [vmem:[#allocation149_spill] sm:$0xff] }
 0x282   :  { %3467 = vmatpush3.bf16.msra.mxu0 %v5898_v37 }
 0x283   :  { %3489 = vmatpush3.bf16.msra.mxu1 %v5899_v19  ;;  %3468 = vmatprep.subr.bf16.mxu0 %v5900_v38 }
 0x284   :  { %3490 = vmatprep.subr.bf16.mxu1 %v5901_v35 }
 0x286   :  { %3469 = vmatpush3.bf16.msra.mxu0 %v5902_v2 }
 0x287   :  { %3491 = vmatpush3.bf16.msra.mxu1 %v5903_v62  ;;  %3470 = vmatprep.subr.bf16.mxu0 %v5904_v22 }
 0x288   :  { %3492 = vmatprep.subr.bf16.mxu1 %v5905_v10 }
 0x28a   :  { %3471 = vmatpush3.bf16.msra.mxu0 %v5906_v59  ;;  %v5946_v59 = vld [vmem:[#allocation125_spill] sm:$0xff] }
 0x28b   :  { %3493 = vmatpush3.bf16.msra.mxu1 %v5907_v24  ;;  %3472 = vmatprep.subr.bf16.mxu0 %v5908_v16  ;;  %v5947_v24 = vld [vmem:[#allocation141_spill] sm:$0xff] }
 0x28c   :  { %3494 = vmatprep.subr.bf16.mxu1 %v5909_v1  ;;  %v3170_v61 = vpop.f32.mrb[8].mxu0 }
 0x28d   :  { %v3192_v31 = vpop.f32.mrb[8].mxu1  ;;  %v3171_v15 = vpop.f32.mrb[9].mxu0 }
 0x28e   :  { %v3193_v36 = vpop.f32.mrb[9].mxu1  ;;  %v3172_v46 = vadd.f32 %v3171_v15, %v3170_v61  ;;  %v3173_v28 = vpop.f32.mrb[10].mxu0  ;;  %3473 = vmatpush3.bf16.msra.mxu0 %v5910_v9  ;;  %v5948_v61 = vld [vmem:[#allocation134_spill] sm:$0xff]  ;;  %v5954_v9 = vld [vmem:[#allocation35_spill] sm:$0xff] }
 0x28f   :  { %v3194_v13 = vadd.f32 %v3193_v36, %v3192_v31  ;;  %v3195_v57 = vpop.f32.mrb[10].mxu1  ;;  %3495 = vmatpush3.bf16.msra.mxu1 %v5911_v41  ;;  %v3174_v14 = vpop.f32.mrb[11].mxu0  ;;  %3474 = vmatprep.subr.bf16.mxu0 %v5912_v34  ;;  %v5949_v31 = vld [vmem:[#allocation150_spill] sm:$0xff]  ;;  %v5952_v28 = vld [vmem:[#allocation135_spill] sm:$0xff]  ;;  %v3042_v41 = vpack.c.bf16 %v5954_v9, %v5954_v9  ;;  %v5998_v9 = vld [vmem:[#allocation184_spill] sm:$0xff] }
 0x290   :  { %v3196_v33 = vpop.f32.mrb[11].mxu1  ;;  %3496 = vmatprep.subr.bf16.mxu1 %v5913_v21  ;;  %v1625_v32 = vadd.f32 %v3172_v46, %v1585_v53  ;;  %v5923_v53 = vld [vmem:[#allocation144_spill] sm:$0xff]  ;;  %v5950_v46 = vld [vmem:[#allocation126_spill] sm:$0xff]  ;;  %v5953_v57 = vld [vmem:[#allocation151_spill] sm:$0xff] }
 0x291   :  { %v5955_v14 = vld [vmem:[#allocation37_spill] sm:$0xff]  ;;  %v5956_v34 = vld [vmem:[#allocation127_spill] sm:$0xff] }
 0x292   :  { %v1665_v7 = vadd.f32 %v3194_v13, %v1625_v32  ;;  %3475 = vmatpush3.bf16.msra.mxu0 %v5914_v50  ;;  %v5951_v13 = vld [vmem:[#allocation142_spill] sm:$0xff]  ;;  %v3044_v33 = vpack.c.bf16 %v5955_v14, %v5955_v14  ;;  %v5957_v21 = vld [vmem:[#allocation143_spill] sm:$0xff]  ;;  %v5958_v32 = vld [vmem:[#allocation160_spill] sm:$0xff] }
 0x293   :  { %3497 = vmatpush3.bf16.msra.mxu1 %v5915_v25  ;;  %3476 = vmatprep.subr.bf16.mxu0 %v5916_v49  ;;  %v5960_v50 = vld [vmem:[#allocation40_spill] sm:$0xff]  ;;  %v5961_v49 = vld [vmem:[#allocation42_spill] sm:$0xff]  ;;  %v6000_v14 = vld [vmem:[#allocation193_spill] sm:$0xff] }
 0x294   :  { %3498 = vmatprep.subr.bf16.mxu1 %v5917_v52  ;;  %v3047_v25 = vpack.c.bf16 %v5960_v50, %v5960_v50  ;;  %v3049_v52 = vpack.c.bf16 %v5961_v49, %v5961_v49  ;;  %v6006_v50 = vld [vmem:[#allocation186_spill] sm:$0xff]  ;;  %v6008_v49 = vld [vmem:[#allocation195_spill] sm:$0xff] }
 0x296   :  { %3477 = vmatpush3.bf16.msra.mxu0 %v5920_v12  ;;  %v5966_v12 = vld [vmem:[#allocation153_spill] sm:$0xff] }
 0x297   :  { %3499 = vmatpush3.bf16.msra.mxu1 %v5921_v20  ;;  %3506 = vmatprep.subr.bf16.mxu0 %v5922_v26  ;;  %v5967_v20 = vld [vmem:[#allocation169_spill] sm:$0xff]  ;;  %v5968_v26 = vld [vmem:[#allocation162_spill] sm:$0xff] }
 0x298   :  { %3528 = vmatprep.subr.bf16.mxu1 %v5923_v53  ;;  %v5969_v53 = vld [vmem:[#allocation178_spill] sm:$0xff] }
 0x299   :  { %2295 = vmatmul.mubr.bf16.vlgmr.msra.gmra.mrb[36].mxu0 %v3038_v48  ;;  %v5963_v48 = vld [vmem:[#allocation168_spill] sm:$0xff] }
 0x29a   :  { %2335 = vmatmul.mubr.bf16.vlgmr.msra.gmra.mrb[36].mxu1 %v3040_v47  ;;  %3507 = vmatpush3.bf16.msra.mxu0 %v5926_v56  ;;  %v5965_v47 = vld [vmem:[#allocation177_spill] sm:$0xff]  ;;  %v5974_v56 = vld [vmem:[#allocation155_spill] sm:$0xff] }
 0x29b   :  { %3529 = vmatpush3.bf16.msra.mxu1 %v5927_v23  ;;  %3508 = vmatprep.subr.bf16.mxu0 %v5928_v43  ;;  %v5975_v23 = vld [vmem:[#allocation171_spill] sm:$0xff]  ;;  %v5976_v43 = vld [vmem:[#allocation164_spill] sm:$0xff] }
 0x29c   :  { %3530 = vmatprep.subr.bf16.mxu1 %v5929_v39  ;;  %2374 = vmatprep.mubr.bf16.mxu0 %v3043_v6  ;;  %v5971_v6 = vld [vmem:[#allocation170_spill] sm:$0xff]  ;;  %v5977_v39 = vld [vmem:[#allocation180_spill] sm:$0xff] }
 0x29d   :  { %2414 = vmatprep.mubr.bf16.mxu1 %v3045_v27  ;;  %v5973_v27 = vld [vmem:[#allocation179_spill] sm:$0xff] }
 0x29e   :  { %3509 = vmatpush3.bf16.msra.mxu0 %v5930_v3  ;;  %v5978_v3 = vld [vmem:[#allocation156_spill] sm:$0xff] }
 0x29f   :  { %3531 = vmatpush3.bf16.msra.mxu1 %v5931_v5  ;;  %3510 = vmatprep.subr.bf16.mxu0 %v5932_v63  ;;  %v5979_v5 = vld [vmem:[#allocation172_spill] sm:$0xff]  ;;  %v5980_v63 = vld [vmem:[#allocation165_spill] sm:$0xff] }
 0x2a0   :  { %3532 = vmatprep.subr.bf16.mxu1 %v5933_v51  ;;  %v5981_v51 = vld [vmem:[#allocation181_spill] sm:$0xff] }
 0x2a2   :  { %3511 = vmatpush3.bf16.msra.mxu0 %v5934_v44 }
 0x2a3   :  { %3533 = vmatpush3.bf16.msra.mxu1 %v5935_v60  ;;  %3512 = vmatprep.subr.bf16.mxu0 %v5936_v45 }
 0x2a4   :  { %3534 = vmatprep.subr.bf16.mxu1 %v5937_v42 }
 0x2a6   :  { %3513 = vmatpush3.bf16.msra.mxu0 %v5938_v54 }
 0x2a7   :  { %3535 = vmatpush3.bf16.msra.mxu1 %v5939_v29  ;;  %3514 = vmatprep.subr.bf16.mxu0 %v5940_v4 }
 0x2a8   :  { %3536 = vmatprep.subr.bf16.mxu1 %v5941_v0 }
 0x2aa   :  { %3515 = vmatpush3.bf16.msra.mxu0 %v5942_v8  ;;  %v5982_v8 = vld [vmem:[#allocation157_spill] sm:$0xff] }
 0x2ab   :  { %3537 = vmatpush3.bf16.msra.mxu1 %v5943_v58  ;;  %3516 = vmatprep.subr.bf16.mxu0 %v5944_v40  ;;  %v5983_v58 = vld [vmem:[#allocation173_spill] sm:$0xff] }
 0x2ac   :  { %3538 = vmatprep.subr.bf16.mxu1 %v5945_v30  ;;  %v3214_v37 = vpop.f32.mrb[12].mxu0 }
 0x2ad   :  { %v3236_v19 = vpop.f32.mrb[12].mxu1  ;;  %v3215_v38 = vpop.f32.mrb[13].mxu0 }
 0x2ae   :  { %v3237_v35 = vpop.f32.mrb[13].mxu1  ;;  %v3216_v2 = vadd.f32 %v3215_v38, %v3214_v37  ;;  %v3217_v22 = vpop.f32.mrb[14].mxu0  ;;  %3517 = vmatpush3.bf16.msra.mxu0 %v5946_v59  ;;  %v5984_v37 = vld [vmem:[#allocation166_spill] sm:$0xff]  ;;  %v5990_v59 = vld [vmem:[#allocation39_spill] sm:$0xff] }
 0x2af   :  { %v3238_v62 = vadd.f32 %v3237_v35, %v3236_v19  ;;  %v3239_v10 = vpop.f32.mrb[14].mxu1  ;;  %3539 = vmatpush3.bf16.msra.mxu1 %v5947_v24  ;;  %v3218_v16 = vpop.f32.mrb[15].mxu0  ;;  %3518 = vmatprep.subr.bf16.mxu0 %v5948_v61  ;;  %v5985_v19 = vld [vmem:[#allocation182_spill] sm:$0xff]  ;;  %v5988_v22 = vld [vmem:[#allocation167_spill] sm:$0xff]  ;;  %v3046_v24 = vpack.c.bf16 %v5990_v59, %v5990_v59  ;;  %v6034_v59 = vld [vmem:[#allocation216_spill] sm:$0xff] }
 0x2b0   :  { %v3240_v1 = vpop.f32.mrb[15].mxu1  ;;  %3540 = vmatprep.subr.bf16.mxu1 %v5949_v31  ;;  %v1705_v15 = vadd.f32 %v3216_v2, %v1665_v7  ;;  %v5959_v7 = vld [vmem:[#allocation176_spill] sm:$0xff]  ;;  %v5986_v2 = vld [vmem:[#allocation158_spill] sm:$0xff]  ;;  %v5989_v10 = vld [vmem:[#allocation183_spill] sm:$0xff] }
 0x2b1   :  { %v5991_v16 = vld [vmem:[#allocation41_spill] sm:$0xff]  ;;  %v5992_v61 = vld [vmem:[#allocation159_spill] sm:$0xff] }
 0x2b2   :  { %v1745_v36 = vadd.f32 %v3238_v62, %v1705_v15  ;;  %3519 = vmatpush3.bf16.msra.mxu0 %v5950_v46  ;;  %v5987_v62 = vld [vmem:[#allocation174_spill] sm:$0xff]  ;;  %v3048_v1 = vpack.c.bf16 %v5991_v16, %v5991_v16  ;;  %v5993_v31 = vld [vmem:[#allocation175_spill] sm:$0xff]  ;;  %v5994_v15 = vld [vmem:[#allocation192_spill] sm:$0xff] }
 0x2b3   :  { %3541 = vmatpush3.bf16.msra.mxu1 %v5951_v13  ;;  %3520 = vmatprep.subr.bf16.mxu0 %v5952_v28  ;;  %v5996_v46 = vld [vmem:[#allocation44_spill] sm:$0xff]  ;;  %v5997_v28 = vld [vmem:[#allocation46_spill] sm:$0xff]  ;;  %v6036_v16 = vld [vmem:[#allocation225_spill] sm:$0xff] }
 0x2b4   :  { %3542 = vmatprep.subr.bf16.mxu1 %v5953_v57  ;;  %v3051_v13 = vpack.c.bf16 %v5996_v46, %v5996_v46  ;;  %v3053_v57 = vpack.c.bf16 %v5997_v28, %v5997_v28  ;;  %v6042_v46 = vld [vmem:[#allocation218_spill] sm:$0xff]  ;;  %v6044_v28 = vld [vmem:[#allocation227_spill] sm:$0xff] }
 0x2b6   :  { %3521 = vmatpush3.bf16.msra.mxu0 %v5956_v34  ;;  %v6002_v34 = vld [vmem:[#allocation185_spill] sm:$0xff] }
 0x2b7   :  { %3543 = vmatpush3.bf16.msra.mxu1 %v5957_v21  ;;  %3550 = vmatprep.subr.bf16.mxu0 %v5958_v32  ;;  %v6003_v21 = vld [vmem:[#allocation201_spill] sm:$0xff]  ;;  %v6004_v32 = vld [vmem:[#allocation194_spill] sm:$0xff] }
 0x2b8   :  { %3572 = vmatprep.subr.bf16.mxu1 %v5959_v7  ;;  %v6005_v7 = vld [vmem:[#allocation210_spill] sm:$0xff] }
 0x2b9   :  { %2375 = vmatmul.mubr.bf16.vlgmr.msra.gmra.mrb[40].mxu0 %v3042_v41  ;;  %v5999_v41 = vld [vmem:[#allocation200_spill] sm:$0xff] }
 0x2ba   :  { %2415 = vmatmul.mubr.bf16.vlgmr.msra.gmra.mrb[40].mxu1 %v3044_v33  ;;  %3551 = vmatpush3.bf16.msra.mxu0 %v5962_v55  ;;  %v6001_v33 = vld [vmem:[#allocation209_spill] sm:$0xff]  ;;  %v6010_v55 = vld [vmem:[#allocation187_spill] sm:$0xff] }
 0x2bb   :  { %3573 = vmatpush3.bf16.msra.mxu1 %v5963_v48  ;;  %3552 = vmatprep.subr.bf16.mxu0 %v5964_v17  ;;  %v6011_v48 = vld [vmem:[#allocation203_spill] sm:$0xff]  ;;  %v6012_v17 = vld [vmem:[#allocation196_spill] sm:$0xff] }
 0x2bc   :  { %3574 = vmatprep.subr.bf16.mxu1 %v5965_v47  ;;  %2454 = vmatprep.mubr.bf16.mxu0 %v3047_v25  ;;  %v6007_v25 = vld [vmem:[#allocation202_spill] sm:$0xff]  ;;  %v6013_v47 = vld [vmem:[#allocation212_spill] sm:$0xff] }
 0x2bd   :  { %2494 = vmatprep.mubr.bf16.mxu1 %v3049_v52  ;;  %v6009_v52 = vld [vmem:[#allocation211_spill] sm:$0xff] }
 0x2be   :  { %3553 = vmatpush3.bf16.msra.mxu0 %v5966_v12  ;;  %v6014_v12 = vld [vmem:[#allocation188_spill] sm:$0xff] }
 0x2bf   :  { %3575 = vmatpush3.bf16.msra.mxu1 %v5967_v20  ;;  %3554 = vmatprep.subr.bf16.mxu0 %v5968_v26  ;;  %v6015_v20 = vld [vmem:[#allocation204_spill] sm:$0xff]  ;;  %v6016_v26 = vld [vmem:[#allocation197_spill] sm:$0xff] }
 0x2c0   :  { %3576 = vmatprep.subr.bf16.mxu1 %v5969_v53  ;;  %v6017_v53 = vld [vmem:[#allocation213_spill] sm:$0xff] }
 0x2c2   :  { %3555 = vmatpush3.bf16.msra.mxu0 %v5970_v11 }
 0x2c3   :  { %3577 = vmatpush3.bf16.msra.mxu1 %v5971_v6  ;;  %3556 = vmatprep.subr.bf16.mxu0 %v5972_v18 }
 0x2c4   :  { %3578 = vmatprep.subr.bf16.mxu1 %v5973_v27 }
 0x2c6   :  { %3557 = vmatpush3.bf16.msra.mxu0 %v5974_v56 }
 0x2c7   :  { %3579 = vmatpush3.bf16.msra.mxu1 %v5975_v23  ;;  %3558 = vmatprep.subr.bf16.mxu0 %v5976_v43 }
 0x2c8   :  { %3580 = vmatprep.subr.bf16.mxu1 %v5977_v39 }
 0x2ca   :  { %3559 = vmatpush3.bf16.msra.mxu0 %v5978_v3  ;;  %v6018_v3 = vld [vmem:[#allocation189_spill] sm:$0xff] }
 0x2cb   :  { %3581 = vmatpush3.bf16.msra.mxu1 %v5979_v5  ;;  %3560 = vmatprep.subr.bf16.mxu0 %v5980_v63  ;;  %v6019_v5 = vld [vmem:[#allocation205_spill] sm:$0xff] }
 0x2cc   :  { %3582 = vmatprep.subr.bf16.mxu1 %v5981_v51  ;;  %v3258_v44 = vpop.f32.mrb[16].mxu0 }
 0x2cd   :  { %v3280_v60 = vpop.f32.mrb[16].mxu1  ;;  %v3259_v45 = vpop.f32.mrb[17].mxu0 }
 0x2ce   :  { %v3281_v42 = vpop.f32.mrb[17].mxu1  ;;  %v3260_v54 = vadd.f32 %v3259_v45, %v3258_v44  ;;  %v3261_v4 = vpop.f32.mrb[18].mxu0  ;;  %3561 = vmatpush3.bf16.msra.mxu0 %v5982_v8  ;;  %v6020_v44 = vld [vmem:[#allocation198_spill] sm:$0xff]  ;;  %v6026_v8 = vld [vmem:[#allocation43_spill] sm:$0xff] }
 0x2cf   :  { %v3282_v29 = vadd.f32 %v3281_v42, %v3280_v60  ;;  %v3283_v0 = vpop.f32.mrb[18].mxu1  ;;  %3583 = vmatpush3.bf16.msra.mxu1 %v5983_v58  ;;  %v3262_v40 = vpop.f32.mrb[19].mxu0  ;;  %3562 = vmatprep.subr.bf16.mxu0 %v5984_v37  ;;  %v6021_v60 = vld [vmem:[#allocation214_spill] sm:$0xff]  ;;  %v6024_v4 = vld [vmem:[#allocation199_spill] sm:$0xff]  ;;  %v3050_v58 = vpack.c.bf16 %v6026_v8, %v6026_v8  ;;  %v6070_v8 = vld [vmem:[#allocation248_spill] sm:$0xff] }
 0x2d0   :  { %v3284_v30 = vpop.f32.mrb[19].mxu1  ;;  %3584 = vmatprep.subr.bf16.mxu1 %v5985_v19  ;;  %v1785_v38 = vadd.f32 %v3260_v54, %v1745_v36  ;;  %v5995_v36 = vld [vmem:[#allocation208_spill] sm:$0xff]  ;;  %v6022_v54 = vld [vmem:[#allocation190_spill] sm:$0xff]  ;;  %v6025_v0 = vld [vmem:[#allocation215_spill] sm:$0xff] }
 0x2d1   :  { %v6027_v40 = vld [vmem:[#allocation45_spill] sm:$0xff]  ;;  %v6028_v37 = vld [vmem:[#allocation191_spill] sm:$0xff] }
 0x2d2   :  { %v1825_v35 = vadd.f32 %v3282_v29, %v1785_v38  ;;  %3563 = vmatpush3.bf16.msra.mxu0 %v5986_v2  ;;  %v6023_v29 = vld [vmem:[#allocation206_spill] sm:$0xff]  ;;  %v3052_v30 = vpack.c.bf16 %v6027_v40, %v6027_v40  ;;  %v6029_v19 = vld [vmem:[#allocation207_spill] sm:$0xff]  ;;  %v6030_v38 = vld [vmem:[#allocation224_spill] sm:$0xff] }
 0x2d3   :  { %3585 = vmatpush3.bf16.msra.mxu1 %v5987_v62  ;;  %3564 = vmatprep.subr.bf16.mxu0 %v5988_v22  ;;  %v6032_v2 = vld [vmem:[#allocation48_spill] sm:$0xff]  ;;  %v6033_v22 = vld [vmem:[#allocation50_spill] sm:$0xff]  ;;  %v6072_v40 = vld [vmem:[#allocation257_spill] sm:$0xff] }
 0x2d4   :  { %3586 = vmatprep.subr.bf16.mxu1 %v5989_v10  ;;  %v3055_v62 = vpack.c.bf16 %v6032_v2, %v6032_v2  ;;  %v3057_v10 = vpack.c.bf16 %v6033_v22, %v6033_v22  ;;  %v6078_v2 = vld [vmem:[#allocation250_spill] sm:$0xff]  ;;  %v6080_v22 = vld [vmem:[#allocation259_spill] sm:$0xff] }
 0x2d6   :  { %3565 = vmatpush3.bf16.msra.mxu0 %v5992_v61  ;;  %v6038_v61 = vld [vmem:[#allocation217_spill] sm:$0xff] }
 0x2d7   :  { %3587 = vmatpush3.bf16.msra.mxu1 %v5993_v31  ;;  %3594 = vmatprep.subr.bf16.mxu0 %v5994_v15  ;;  %v6039_v31 = vld [vmem:[#allocation233_spill] sm:$0xff]  ;;  %v6040_v15 = vld [vmem:[#allocation226_spill] sm:$0xff] }
 0x2d8   :  { %3616 = vmatprep.subr.bf16.mxu1 %v5995_v36  ;;  %v6041_v36 = vld [vmem:[#allocation242_spill] sm:$0xff] }
 0x2d9   :  { %2455 = vmatmul.mubr.bf16.vlgmr.msra.gmra.mrb[44].mxu0 %v3046_v24  ;;  %v6035_v24 = vld [vmem:[#allocation232_spill] sm:$0xff] }
 0x2da   :  { %2495 = vmatmul.mubr.bf16.vlgmr.msra.gmra.mrb[44].mxu1 %v3048_v1  ;;  %3595 = vmatpush3.bf16.msra.mxu0 %v5998_v9  ;;  %v6037_v1 = vld [vmem:[#allocation241_spill] sm:$0xff]  ;;  %v6046_v9 = vld [vmem:[#allocation219_spill] sm:$0xff] }
 0x2db   :  { %3617 = vmatpush3.bf16.msra.mxu1 %v5999_v41  ;;  %3596 = vmatprep.subr.bf16.mxu0 %v6000_v14  ;;  %v6047_v41 = vld [vmem:[#allocation235_spill] sm:$0xff]  ;;  %v6048_v14 = vld [vmem:[#allocation228_spill] sm:$0xff] }
 0x2dc   :  { %3618 = vmatprep.subr.bf16.mxu1 %v6001_v33  ;;  %2534 = vmatprep.mubr.bf16.mxu0 %v3051_v13  ;;  %v6043_v13 = vld [vmem:[#allocation234_spill] sm:$0xff]  ;;  %v6049_v33 = vld [vmem:[#allocation244_spill] sm:$0xff] }
 0x2dd   :  { %2574 = vmatprep.mubr.bf16.mxu1 %v3053_v57  ;;  %v6045_v57 = vld [vmem:[#allocation243_spill] sm:$0xff] }
 0x2de   :  { %3597 = vmatpush3.bf16.msra.mxu0 %v6002_v34  ;;  %v6050_v34 = vld [vmem:[#allocation220_spill] sm:$0xff] }
 0x2df   :  { %3619 = vmatpush3.bf16.msra.mxu1 %v6003_v21  ;;  %3598 = vmatprep.subr.bf16.mxu0 %v6004_v32  ;;  %v6051_v21 = vld [vmem:[#allocation236_spill] sm:$0xff]  ;;  %v6052_v32 = vld [vmem:[#allocation229_spill] sm:$0xff] }
 0x2e0   :  { %3620 = vmatprep.subr.bf16.mxu1 %v6005_v7  ;;  %v6053_v7 = vld [vmem:[#allocation245_spill] sm:$0xff] }
 0x2e2   :  { %3599 = vmatpush3.bf16.msra.mxu0 %v6006_v50 }
 0x2e3   :  { %3621 = vmatpush3.bf16.msra.mxu1 %v6007_v25  ;;  %3600 = vmatprep.subr.bf16.mxu0 %v6008_v49 }
 0x2e4   :  { %3622 = vmatprep.subr.bf16.mxu1 %v6009_v52 }
 0x2e6   :  { %3601 = vmatpush3.bf16.msra.mxu0 %v6010_v55 }
 0x2e7   :  { %3623 = vmatpush3.bf16.msra.mxu1 %v6011_v48  ;;  %3602 = vmatprep.subr.bf16.mxu0 %v6012_v17 }
 0x2e8   :  { %3624 = vmatprep.subr.bf16.mxu1 %v6013_v47 }
 0x2ea   :  { %3603 = vmatpush3.bf16.msra.mxu0 %v6014_v12  ;;  %v6054_v12 = vld [vmem:[#allocation221_spill] sm:$0xff] }
 0x2eb   :  { %3625 = vmatpush3.bf16.msra.mxu1 %v6015_v20  ;;  %3604 = vmatprep.subr.bf16.mxu0 %v6016_v26  ;;  %v6055_v20 = vld [vmem:[#allocation237_spill] sm:$0xff] }
 0x2ec   :  { %3626 = vmatprep.subr.bf16.mxu1 %v6017_v53  ;;  %v3302_v11 = vpop.f32.mrb[20].mxu0 }
 0x2ed   :  { %v3324_v6 = vpop.f32.mrb[20].mxu1  ;;  %v3303_v18 = vpop.f32.mrb[21].mxu0 }
 0x2ee   :  { %v3325_v27 = vpop.f32.mrb[21].mxu1  ;;  %v3304_v56 = vadd.f32 %v3303_v18, %v3302_v11  ;;  %v3305_v43 = vpop.f32.mrb[22].mxu0  ;;  %3605 = vmatpush3.bf16.msra.mxu0 %v6018_v3  ;;  %v6056_v11 = vld [vmem:[#allocation230_spill] sm:$0xff]  ;;  %v6062_v3 = vld [vmem:[#allocation47_spill] sm:$0xff] }
 0x2ef   :  { %v3326_v23 = vadd.f32 %v3325_v27, %v3324_v6  ;;  %v3327_v39 = vpop.f32.mrb[22].mxu1  ;;  %3627 = vmatpush3.bf16.msra.mxu1 %v6019_v5  ;;  %v3306_v63 = vpop.f32.mrb[23].mxu0  ;;  %3606 = vmatprep.subr.bf16.mxu0 %v6020_v44  ;;  %v6057_v6 = vld [vmem:[#allocation246_spill] sm:$0xff]  ;;  %v6060_v43 = vld [vmem:[#allocation231_spill] sm:$0xff]  ;;  %v3054_v5 = vpack.c.bf16 %v6062_v3, %v6062_v3  ;;  %v6106_v3 = vld [vmem:[#allocation280_spill] sm:$0xff] }
 0x2f0   :  { %v3328_v51 = vpop.f32.mrb[23].mxu1  ;;  %3628 = vmatprep.subr.bf16.mxu1 %v6021_v60  ;;  %v1865_v45 = vadd.f32 %v3304_v56, %v1825_v35  ;;  %v6031_v35 = vld [vmem:[#allocation240_spill] sm:$0xff]  ;;  %v6058_v56 = vld [vmem:[#allocation222_spill] sm:$0xff]  ;;  %v6061_v39 = vld [vmem:[#allocation247_spill] sm:$0xff] }
 0x2f1   :  { %v6063_v63 = vld [vmem:[#allocation49_spill] sm:$0xff]  ;;  %v6064_v44 = vld [vmem:[#allocation223_spill] sm:$0xff] }
 0x2f2   :  { %v1905_v42 = vadd.f32 %v3326_v23, %v1865_v45  ;;  %3607 = vmatpush3.bf16.msra.mxu0 %v6022_v54  ;;  %v6059_v23 = vld [vmem:[#allocation238_spill] sm:$0xff]  ;;  %v3056_v51 = vpack.c.bf16 %v6063_v63, %v6063_v63  ;;  %v6065_v60 = vld [vmem:[#allocation239_spill] sm:$0xff]  ;;  %v6066_v45 = vld [vmem:[#allocation256_spill] sm:$0xff] }
 0x2f3   :  { %3629 = vmatpush3.bf16.msra.mxu1 %v6023_v29  ;;  %3608 = vmatprep.subr.bf16.mxu0 %v6024_v4  ;;  %v6068_v54 = vld [vmem:[#allocation52_spill] sm:$0xff]  ;;  %v6069_v4 = vld [vmem:[#allocation54_spill] sm:$0xff]  ;;  %v6108_v63 = vld [vmem:[#allocation289_spill] sm:$0xff] }
 0x2f4   :  { %3630 = vmatprep.subr.bf16.mxu1 %v6025_v0  ;;  %v3059_v29 = vpack.c.bf16 %v6068_v54, %v6068_v54  ;;  %v3061_v0 = vpack.c.bf16 %v6069_v4, %v6069_v4  ;;  %v6114_v54 = vld [vmem:[#allocation282_spill] sm:$0xff]  ;;  %v6116_v4 = vld [vmem:[#allocation291_spill] sm:$0xff] }
 0x2f6   :  { %3609 = vmatpush3.bf16.msra.mxu0 %v6028_v37  ;;  %v6074_v37 = vld [vmem:[#allocation249_spill] sm:$0xff] }
 0x2f7   :  { %3631 = vmatpush3.bf16.msra.mxu1 %v6029_v19  ;;  %3638 = vmatprep.subr.bf16.mxu0 %v6030_v38  ;;  %v6075_v19 = vld [vmem:[#allocation265_spill] sm:$0xff]  ;;  %v6076_v38 = vld [vmem:[#allocation258_spill] sm:$0xff] }
 0x2f8   :  { %3660 = vmatprep.subr.bf16.mxu1 %v6031_v35  ;;  %v6077_v35 = vld [vmem:[#allocation274_spill] sm:$0xff] }
 0x2f9   :  { %2535 = vmatmul.mubr.bf16.vlgmr.msra.gmra.mrb[48].mxu0 %v3050_v58  ;;  %v6071_v58 = vld [vmem:[#allocation264_spill] sm:$0xff] }
 0x2fa   :  { %2575 = vmatmul.mubr.bf16.vlgmr.msra.gmra.mrb[48].mxu1 %v3052_v30  ;;  %3639 = vmatpush3.bf16.msra.mxu0 %v6034_v59  ;;  %v6073_v30 = vld [vmem:[#allocation273_spill] sm:$0xff]  ;;  %v6082_v59 = vld [vmem:[#allocation251_spill] sm:$0xff] }
 0x2fb   :  { %3661 = vmatpush3.bf16.msra.mxu1 %v6035_v24  ;;  %3640 = vmatprep.subr.bf16.mxu0 %v6036_v16  ;;  %v6083_v24 = vld [vmem:[#allocation267_spill] sm:$0xff]  ;;  %v6084_v16 = vld [vmem:[#allocation260_spill] sm:$0xff] }
 0x2fc   :  { %3662 = vmatprep.subr.bf16.mxu1 %v6037_v1  ;;  %2614 = vmatprep.mubr.bf16.mxu0 %v3055_v62  ;;  %v6079_v62 = vld [vmem:[#allocation266_spill] sm:$0xff]  ;;  %v6085_v1 = vld [vmem:[#allocation276_spill] sm:$0xff] }
 0x2fd   :  { %2654 = vmatprep.mubr.bf16.mxu1 %v3057_v10  ;;  %v6081_v10 = vld [vmem:[#allocation275_spill] sm:$0xff] }
 0x2fe   :  { %3641 = vmatpush3.bf16.msra.mxu0 %v6038_v61  ;;  %v6086_v61 = vld [vmem:[#allocation252_spill] sm:$0xff] }
 0x2ff   :  { %3663 = vmatpush3.bf16.msra.mxu1 %v6039_v31  ;;  %3642 = vmatprep.subr.bf16.mxu0 %v6040_v15  ;;  %v6087_v31 = vld [vmem:[#allocation268_spill] sm:$0xff]  ;;  %v6088_v15 = vld [vmem:[#allocation261_spill] sm:$0xff] }
 0x300   :  { %3664 = vmatprep.subr.bf16.mxu1 %v6041_v36  ;;  %v6089_v36 = vld [vmem:[#allocation277_spill] sm:$0xff] }
 0x302   :  { %3643 = vmatpush3.bf16.msra.mxu0 %v6042_v46 }
 0x303   :  { %3665 = vmatpush3.bf16.msra.mxu1 %v6043_v13  ;;  %3644 = vmatprep.subr.bf16.mxu0 %v6044_v28 }
 0x304   :  { %3666 = vmatprep.subr.bf16.mxu1 %v6045_v57 }
 0x306   :  { %3645 = vmatpush3.bf16.msra.mxu0 %v6046_v9 }
 0x307   :  { %3667 = vmatpush3.bf16.msra.mxu1 %v6047_v41  ;;  %3646 = vmatprep.subr.bf16.mxu0 %v6048_v14 }
 0x308   :  { %3668 = vmatprep.subr.bf16.mxu1 %v6049_v33 }
 0x30a   :  { %3647 = vmatpush3.bf16.msra.mxu0 %v6050_v34  ;;  %v6090_v34 = vld [vmem:[#allocation253_spill] sm:$0xff] }
 0x30b   :  { %3669 = vmatpush3.bf16.msra.mxu1 %v6051_v21  ;;  %3648 = vmatprep.subr.bf16.mxu0 %v6052_v32  ;;  %v6091_v21 = vld [vmem:[#allocation269_spill] sm:$0xff] }
 0x30c   :  { %3670 = vmatprep.subr.bf16.mxu1 %v6053_v7  ;;  %v3346_v50 = vpop.f32.mrb[24].mxu0 }
 0x30d   :  { %v3368_v25 = vpop.f32.mrb[24].mxu1  ;;  %v3347_v49 = vpop.f32.mrb[25].mxu0 }
 0x30e   :  { %v3369_v52 = vpop.f32.mrb[25].mxu1  ;;  %v3348_v55 = vadd.f32 %v3347_v49, %v3346_v50  ;;  %v3349_v17 = vpop.f32.mrb[26].mxu0  ;;  %3649 = vmatpush3.bf16.msra.mxu0 %v6054_v12  ;;  %v6092_v50 = vld [vmem:[#allocation262_spill] sm:$0xff]  ;;  %v6098_v12 = vld [vmem:[#allocation51_spill] sm:$0xff] }
 0x30f   :  { %v3370_v48 = vadd.f32 %v3369_v52, %v3368_v25  ;;  %v3371_v47 = vpop.f32.mrb[26].mxu1  ;;  %3671 = vmatpush3.bf16.msra.mxu1 %v6055_v20  ;;  %v3350_v26 = vpop.f32.mrb[27].mxu0  ;;  %3650 = vmatprep.subr.bf16.mxu0 %v6056_v11  ;;  %v6093_v25 = vld [vmem:[#allocation278_spill] sm:$0xff]  ;;  %v6096_v17 = vld [vmem:[#allocation263_spill] sm:$0xff]  ;;  %v3058_v20 = vpack.c.bf16 %v6098_v12, %v6098_v12 }
 0x310   :  { %v3372_v53 = vpop.f32.mrb[27].mxu1  ;;  %3672 = vmatprep.subr.bf16.mxu1 %v6057_v6  ;;  %v1945_v18 = vadd.f32 %v3348_v55, %v1905_v42  ;;  %v6067_v42 = vld [vmem:[#allocation272_spill] sm:$0xff]  ;;  %v6094_v55 = vld [vmem:[#allocation254_spill] sm:$0xff]  ;;  %v6097_v47 = vld [vmem:[#allocation279_spill] sm:$0xff] }
 0x311   :  { %v6099_v26 = vld [vmem:[#allocation53_spill] sm:$0xff]  ;;  %v6100_v11 = vld [vmem:[#allocation255_spill] sm:$0xff] }
 0x312   :  { %v1985_v27 = vadd.f32 %v3370_v48, %v1945_v18  ;;  %3651 = vmatpush3.bf16.msra.mxu0 %v6058_v56  ;;  %v6095_v48 = vld [vmem:[#allocation270_spill] sm:$0xff]  ;;  %v3060_v53 = vpack.c.bf16 %v6099_v26, %v6099_v26  ;;  %v6101_v6 = vld [vmem:[#allocation271_spill] sm:$0xff]  ;;  %v6102_v18 = vld [vmem:[#allocation288_spill] sm:$0xff] }
 0x313   :  { %3673 = vmatpush3.bf16.msra.mxu1 %v6059_v23  ;;  %3652 = vmatprep.subr.bf16.mxu0 %v6060_v43  ;;  %v6104_v56 = vld [vmem:[#allocation24_spill] sm:$0xff]  ;;  %v6105_v43 = vld [vmem:[#allocation26_spill] sm:$0xff] }
 0x314   :  { %3674 = vmatprep.subr.bf16.mxu1 %v6061_v39  ;;  %v3063_v23 = vpack.c.bf16 %v6104_v56, %v6104_v56  ;;  %v3065_v39 = vpack.c.bf16 %v6105_v43, %v6105_v43 }
 0x316   :  { %3653 = vmatpush3.bf16.msra.mxu0 %v6064_v44  ;;  %v6110_v44 = vld [vmem:[#allocation281_spill] sm:$0xff] }
 0x317   :  { %3675 = vmatpush3.bf16.msra.mxu1 %v6065_v60  ;;  %3682 = vmatprep.subr.bf16.mxu0 %v6066_v45  ;;  %v6111_v60 = vld [vmem:[#allocation297_spill] sm:$0xff]  ;;  %v6112_v45 = vld [vmem:[#allocation290_spill] sm:$0xff] }
 0x318   :  { %3704 = vmatprep.subr.bf16.mxu1 %v6067_v42  ;;  %v6113_v42 = vld [vmem:[#allocation306_spill] sm:$0xff] }
 0x319   :  { %2615 = vmatmul.mubr.bf16.vlgmr.msra.gmra.mrb[52].mxu0 %v3054_v5  ;;  %v6107_v5 = vld [vmem:[#allocation296_spill] sm:$0xff] }
 0x31a   :  { %2655 = vmatmul.mubr.bf16.vlgmr.msra.gmra.mrb[52].mxu1 %v3056_v51  ;;  %3683 = vmatpush3.bf16.msra.mxu0 %v6070_v8  ;;  %v6109_v51 = vld [vmem:[#allocation305_spill] sm:$0xff]  ;;  %v6118_v8 = vld [vmem:[#allocation283_spill] sm:$0xff] }
 0x31b   :  { %3705 = vmatpush3.bf16.msra.mxu1 %v6071_v58  ;;  %3684 = vmatprep.subr.bf16.mxu0 %v6072_v40  ;;  %v6119_v58 = vld [vmem:[#allocation299_spill] sm:$0xff]  ;;  %v6120_v40 = vld [vmem:[#allocation292_spill] sm:$0xff] }
 0x31c   :  { %3706 = vmatprep.subr.bf16.mxu1 %v6073_v30  ;;  %2694 = vmatprep.mubr.bf16.mxu0 %v3059_v29  ;;  %v6115_v29 = vld [vmem:[#allocation298_spill] sm:$0xff]  ;;  %v6121_v30 = vld [vmem:[#allocation308_spill] sm:$0xff] }
 0x31d   :  { %2734 = vmatprep.mubr.bf16.mxu1 %v3061_v0  ;;  %v6117_v0 = vld [vmem:[#allocation307_spill] sm:$0xff] }
 0x31e   :  { %3685 = vmatpush3.bf16.msra.mxu0 %v6074_v37  ;;  %v6122_v37 = vld [vmem:[#allocation284_spill] sm:$0xff] }
 0x31f   :  { %3707 = vmatpush3.bf16.msra.mxu1 %v6075_v19  ;;  %3686 = vmatprep.subr.bf16.mxu0 %v6076_v38  ;;  %v6123_v19 = vld [vmem:[#allocation300_spill] sm:$0xff]  ;;  %v6124_v38 = vld [vmem:[#allocation293_spill] sm:$0xff] }
 0x320   :  { %3708 = vmatprep.subr.bf16.mxu1 %v6077_v35  ;;  %v6125_v35 = vld [vmem:[#allocation309_spill] sm:$0xff] }
 0x322   :  { %3687 = vmatpush3.bf16.msra.mxu0 %v6078_v2 }
 0x323   :  { %3709 = vmatpush3.bf16.msra.mxu1 %v6079_v62  ;;  %3688 = vmatprep.subr.bf16.mxu0 %v6080_v22 }
 0x324   :  { %3710 = vmatprep.subr.bf16.mxu1 %v6081_v10 }
 0x326   :  { %3689 = vmatpush3.bf16.msra.mxu0 %v6082_v59 }
 0x327   :  { %3711 = vmatpush3.bf16.msra.mxu1 %v6083_v24  ;;  %3690 = vmatprep.subr.bf16.mxu0 %v6084_v16 }
 0x328   :  { %3712 = vmatprep.subr.bf16.mxu1 %v6085_v1 }
 0x32a   :  { %3691 = vmatpush3.bf16.msra.mxu0 %v6086_v61  ;;  %v6126_v61 = vld [vmem:[#allocation285_spill] sm:$0xff] }
 0x32b   :  { %3713 = vmatpush3.bf16.msra.mxu1 %v6087_v31  ;;  %3692 = vmatprep.subr.bf16.mxu0 %v6088_v15  ;;  %v6127_v31 = vld [vmem:[#allocation301_spill] sm:$0xff] }
 0x32c   :  { %3714 = vmatprep.subr.bf16.mxu1 %v6089_v36  ;;  %v3390_v46 = vpop.f32.mrb[28].mxu0 }
 0x32d   :  { %v3412_v13 = vpop.f32.mrb[28].mxu1  ;;  %v3391_v28 = vpop.f32.mrb[29].mxu0 }
 0x32e   :  { %v3413_v57 = vpop.f32.mrb[29].mxu1  ;;  %v3392_v9 = vadd.f32 %v3391_v28, %v3390_v46  ;;  %v3393_v14 = vpop.f32.mrb[30].mxu0  ;;  %3693 = vmatpush3.bf16.msra.mxu0 %v6090_v34  ;;  %v6128_v46 = vld [vmem:[#allocation294_spill] sm:$0xff]  ;;  %v6134_v34 = vld [vmem:[#allocation55_spill] sm:$0xff] }
 0x32f   :  { %v3414_v41 = vadd.f32 %v3413_v57, %v3412_v13  ;;  %v3415_v33 = vpop.f32.mrb[30].mxu1  ;;  %3715 = vmatpush3.bf16.msra.mxu1 %v6091_v21  ;;  %v3394_v32 = vpop.f32.mrb[31].mxu0  ;;  %3694 = vmatprep.subr.bf16.mxu0 %v6092_v50  ;;  %v6129_v13 = vld [vmem:[#allocation310_spill] sm:$0xff]  ;;  %v6132_v14 = vld [vmem:[#allocation295_spill] sm:$0xff]  ;;  %v3062_v21 = vpack.c.bf16 %v6134_v34, %v6134_v34 }
 0x330   :  { %v3416_v7 = vpop.f32.mrb[31].mxu1  ;;  %3716 = vmatprep.subr.bf16.mxu1 %v6093_v25  ;;  %v2025_v49 = vadd.f32 %v3392_v9, %v1985_v27  ;;  %v6103_v27 = vld [vmem:[#allocation304_spill] sm:$0xff]  ;;  %v6130_v9 = vld [vmem:[#allocation286_spill] sm:$0xff]  ;;  %v6133_v33 = vld [vmem:[#allocation311_spill] sm:$0xff] }
 0x331   :  { %v6135_v32 = vld [vmem:[#allocation25_spill] sm:$0xff]  ;;  %v6136_v50 = vld [vmem:[#allocation287_spill] sm:$0xff] }
 0x332   :  { %v2065_v52 = vadd.f32 %v3414_v41, %v2025_v49  ;;  %3695 = vmatpush3.bf16.msra.mxu0 %v6094_v55  ;;  %v6131_v41 = vld [vmem:[#allocation302_spill] sm:$0xff]  ;;  %v3064_v7 = vpack.c.bf16 %v6135_v32, %v6135_v32  ;;  %v6137_v25 = vld [vmem:[#allocation303_spill] sm:$0xff] }
 0x333   :  { %3717 = vmatpush3.bf16.msra.mxu1 %v6095_v48  ;;  %3696 = vmatprep.subr.bf16.mxu0 %v6096_v17 }
 0x334   :  { %3718 = vmatprep.subr.bf16.mxu1 %v6097_v47 }
 0x336   :  { %3697 = vmatpush3.bf16.msra.mxu0 %v6100_v11 }
 0x337   :  { %3719 = vmatpush3.bf16.msra.mxu1 %v6101_v6  ;;  %3726 = vmatprep.subr.bf16.mxu0 %v6102_v18 }
 0x338   :  { %3748 = vmatprep.subr.bf16.mxu1 %v6103_v27 }
 0x339   :  { %2695 = vmatmul.mubr.bf16.vlgmr.msra.gmra.mrb[56].mxu0 %v3058_v20 }
 0x33a   :  { %2735 = vmatmul.mubr.bf16.vlgmr.msra.gmra.mrb[56].mxu1 %v3060_v53  ;;  %3727 = vmatpush3.bf16.msra.mxu0 %v6106_v3 }
 0x33b   :  { %3749 = vmatpush3.bf16.msra.mxu1 %v6107_v5  ;;  %3728 = vmatprep.subr.bf16.mxu0 %v6108_v63 }
 0x33c   :  { %3750 = vmatprep.subr.bf16.mxu1 %v6109_v51  ;;  %2774 = vmatprep.mubr.bf16.mxu0 %v3063_v23 }
 0x33d   :  { %2814 = vmatprep.mubr.bf16.mxu1 %v3065_v39 }
 0x33e   :  { %3729 = vmatpush3.bf16.msra.mxu0 %v6110_v44 }
 0x33f   :  { %3751 = vmatpush3.bf16.msra.mxu1 %v6111_v60  ;;  %3730 = vmatprep.subr.bf16.mxu0 %v6112_v45 }
 0x340   :  { %3752 = vmatprep.subr.bf16.mxu1 %v6113_v42 }
 0x342   :  { %3731 = vmatpush3.bf16.msra.mxu0 %v6114_v54 }
 0x343   :  { %3753 = vmatpush3.bf16.msra.mxu1 %v6115_v29  ;;  %3732 = vmatprep.subr.bf16.mxu0 %v6116_v4 }
 0x344   :  { %3754 = vmatprep.subr.bf16.mxu1 %v6117_v0 }
 0x346   :  { %3733 = vmatpush3.bf16.msra.mxu0 %v6118_v8 }
 0x347   :  { %3755 = vmatpush3.bf16.msra.mxu1 %v6119_v58  ;;  %3734 = vmatprep.subr.bf16.mxu0 %v6120_v40 }
 0x348   :  { %3756 = vmatprep.subr.bf16.mxu1 %v6121_v30 }
 0x34a   :  { %3735 = vmatpush3.bf16.msra.mxu0 %v6122_v37 }
 0x34b   :  { %3757 = vmatpush3.bf16.msra.mxu1 %v6123_v19  ;;  %3736 = vmatprep.subr.bf16.mxu0 %v6124_v38 }
 0x34c   :  { %3758 = vmatprep.subr.bf16.mxu1 %v6125_v35  ;;  %v3434_v2 = vpop.f32.mrb[32].mxu0 }
 0x34d   :  { %v3456_v62 = vpop.f32.mrb[32].mxu1  ;;  %v3435_v22 = vpop.f32.mrb[33].mxu0 }
 0x34e   :  { %v3457_v10 = vpop.f32.mrb[33].mxu1  ;;  %v3436_v59 = vadd.f32 %v3435_v22, %v3434_v2  ;;  %v3437_v16 = vpop.f32.mrb[34].mxu0  ;;  %3737 = vmatpush3.bf16.msra.mxu0 %v6126_v61 }
 0x34f   :  { %v3458_v24 = vadd.f32 %v3457_v10, %v3456_v62  ;;  %v3459_v1 = vpop.f32.mrb[34].mxu1  ;;  %3759 = vmatpush3.bf16.msra.mxu1 %v6127_v31  ;;  %v3438_v15 = vpop.f32.mrb[35].mxu0  ;;  %3738 = vmatprep.subr.bf16.mxu0 %v6128_v46 }
 0x350   :  { %v3460_v36 = vpop.f32.mrb[35].mxu1  ;;  %3760 = vmatprep.subr.bf16.mxu1 %v6129_v13  ;;  %v2217_v28 = vadd.f32 %v3436_v59, %v2065_v52 }
 0x352   :  { %v2257_v57 = vadd.f32 %v3458_v24, %v2217_v28  ;;  %3739 = vmatpush3.bf16.msra.mxu0 %v6130_v9 }
 0x353   :  { %3761 = vmatpush3.bf16.msra.mxu1 %v6131_v41  ;;  %3740 = vmatprep.subr.bf16.mxu0 %v6132_v14 }
 0x354   :  { %3762 = vmatprep.subr.bf16.mxu1 %v6133_v33 }
 0x356   :  { %3741 = vmatpush3.bf16.msra.mxu0 %v6136_v50 }
 0x357   :  { %3763 = vmatpush3.bf16.msra.mxu1 %v6137_v25 }
 0x359   :  { %2775 = vmatmul.mubr.bf16.vlgmr.msra.gmra.mrb[60].mxu0 %v3062_v21 }
 0x35a   :  { %2815 = vmatmul.mubr.bf16.vlgmr.msra.gmra.mrb[60].mxu1 %v3064_v7 }
 0x36c   :  { %v3478_v49 = vpop.f32.mrb[36].mxu0 }
 0x36d   :  { %v3500_v52 = vpop.f32.mrb[36].mxu1  ;;  %v3479_v55 = vpop.f32.mrb[37].mxu0 }
 0x36e   :  { %v3501_v48 = vpop.f32.mrb[37].mxu1  ;;  %v3480_v17 = vadd.f32 %v3479_v55, %v3478_v49  ;;  %v3481_v12 = vpop.f32.mrb[38].mxu0 }
 0x36f   :  { %v3502_v47 = vadd.f32 %v3501_v48, %v3500_v52  ;;  %v3503_v20 = vpop.f32.mrb[38].mxu1  ;;  %v3482_v26 = vpop.f32.mrb[39].mxu0 }
 0x370   :  { %v3504_v53 = vpop.f32.mrb[39].mxu1  ;;  %v2297_v11 = vadd.f32 %v3480_v17, %v2257_v57 }
 0x372   :  { %v2337_v6 = vadd.f32 %v3502_v47, %v2297_v11 }
 0x38c   :  { %v3522_v18 = vpop.f32.mrb[40].mxu0 }
 0x38d   :  { %v3544_v27 = vpop.f32.mrb[40].mxu1  ;;  %v3523_v56 = vpop.f32.mrb[41].mxu0 }
 0x38e   :  { %v3545_v23 = vpop.f32.mrb[41].mxu1  ;;  %v3524_v43 = vadd.f32 %v3523_v56, %v3522_v18  ;;  %v3525_v3 = vpop.f32.mrb[42].mxu0 }
 0x38f   :  { %v3546_v39 = vadd.f32 %v3545_v23, %v3544_v27  ;;  %v3547_v5 = vpop.f32.mrb[42].mxu1  ;;  %v3526_v63 = vpop.f32.mrb[43].mxu0 }
 0x390   :  { %v3548_v51 = vpop.f32.mrb[43].mxu1  ;;  %v2377_v44 = vadd.f32 %v3524_v43, %v2337_v6  ;;  %v2966_v5 = vld [vmem:[#allocation10] ss:$0 sm:$0xff] }
 0x392   :  { %v2417_v60 = vadd.f32 %v3546_v39, %v2377_v44 }
 0x3ac   :  { %v3566_v45 = vpop.f32.mrb[44].mxu0 }
 0x3ad   :  { %v3588_v42 = vpop.f32.mrb[44].mxu1  ;;  %v3567_v54 = vpop.f32.mrb[45].mxu0 }
 0x3ae   :  { %v3589_v29 = vpop.f32.mrb[45].mxu1  ;;  %v3568_v4 = vadd.f32 %v3567_v54, %v3566_v45  ;;  %v3569_v8 = vpop.f32.mrb[46].mxu0  ;;  %v2967_v54 = vld [vmem:[#allocation11] ss:$0 sm:$0xff] }
 0x3af   :  { %v3590_v0 = vadd.f32 %v3589_v29, %v3588_v42  ;;  %v3591_v58 = vpop.f32.mrb[46].mxu1  ;;  %v3570_v40 = vpop.f32.mrb[47].mxu0 }
 0x3b0   :  { %v3592_v30 = vpop.f32.mrb[47].mxu1  ;;  %v2457_v37 = vadd.f32 %v3568_v4, %v2417_v60 }
 0x3b2   :  { %v2497_v19 = vadd.f32 %v3590_v0, %v2457_v37  ;;  %v2846_v0 = vstv %s5542_s5 }
 0x3cc   :  { %v3610_v38 = vpop.f32.mrb[48].mxu0 }
 0x3cd   :  { %v3632_v35 = vpop.f32.mrb[48].mxu1  ;;  %v3611_v2 = vpop.f32.mrb[49].mxu0 }
 0x3ce   :  { %v3633_v62 = vpop.f32.mrb[49].mxu1  ;;  %v3612_v22 = vadd.f32 %v3611_v2, %v3610_v38  ;;  %v3613_v59 = vpop.f32.mrb[50].mxu0 }
 0x3cf   :  { %v3634_v10 = vadd.f32 %v3633_v62, %v3632_v35  ;;  %v3635_v24 = vpop.f32.mrb[50].mxu1  ;;  %v3614_v16 = vpop.f32.mrb[51].mxu0 }
 0x3d0   :  { %v3636_v1 = vpop.f32.mrb[51].mxu1  ;;  %v2537_v61 = vadd.f32 %v3612_v22, %v2497_v19 }
 0x3d2   :  { %v2577_v31 = vadd.f32 %v3634_v10, %v2537_v61 }
 0x3ec   :  { %v3654_v15 = vpop.f32.mrb[52].mxu0 }
 0x3ed   :  { %v3676_v36 = vpop.f32.mrb[52].mxu1  ;;  %v3655_v46 = vpop.f32.mrb[53].mxu0 }
 0x3ee   :  { %v3677_v13 = vpop.f32.mrb[53].mxu1  ;;  %v3656_v28 = vadd.f32 %v3655_v46, %v3654_v15  ;;  %v3657_v9 = vpop.f32.mrb[54].mxu0 }
 0x3ef   :  { %v3678_v57 = vadd.f32 %v3677_v13, %v3676_v36  ;;  %v3679_v41 = vpop.f32.mrb[54].mxu1  ;;  %v3658_v14 = vpop.f32.mrb[55].mxu0 }
 0x3f0   :  { %v3680_v33 = vpop.f32.mrb[55].mxu1  ;;  %v2617_v34 = vadd.f32 %v3656_v28, %v2577_v31 }
 0x3f2   :  { %v2657_v21 = vadd.f32 %v3678_v57, %v2617_v34 }
 0x40c   :  { %v3698_v32 = vpop.f32.mrb[56].mxu0 }
 0x40d   :  { %v3720_v7 = vpop.f32.mrb[56].mxu1  ;;  %v3699_v50 = vpop.f32.mrb[57].mxu0 }
 0x40e   :  { %v3721_v25 = vpop.f32.mrb[57].mxu1  ;;  %v3700_v49 = vadd.f32 %v3699_v50, %v3698_v32  ;;  %v3701_v55 = vpop.f32.mrb[58].mxu0 }
 0x40f   :  { %v3722_v52 = vadd.f32 %v3721_v25, %v3720_v7  ;;  %v3723_v48 = vpop.f32.mrb[58].mxu1  ;;  %v3702_v17 = vpop.f32.mrb[59].mxu0 }
 0x410   :  { %v3724_v47 = vpop.f32.mrb[59].mxu1  ;;  %v2697_v12 = vadd.f32 %v3700_v49, %v2657_v21 }
 0x412   :  { %v2737_v20 = vadd.f32 %v3722_v52, %v2697_v12 }
 0x42c   :  { %v3742_v26 = vpop.f32.mrb[60].mxu0 }
 0x42d   :  { %v3764_v53 = vpop.f32.mrb[60].mxu1  ;;  %v3743_v11 = vpop.f32.mrb[61].mxu0 }
 0x42e   :  { %v3765_v6 = vpop.f32.mrb[61].mxu1  ;;  %v3744_v18 = vadd.f32 %v3743_v11, %v3742_v26  ;;  %v3745_v56 = vpop.f32.mrb[62].mxu0 }
 0x42f   :  { %v3766_v27 = vadd.f32 %v3765_v6, %v3764_v53  ;;  %v3767_v23 = vpop.f32.mrb[62].mxu1  ;;  %v3746_v43 = vpop.f32.mrb[63].mxu0 }
 0x430   :  { %v3768_v39 = vpop.f32.mrb[63].mxu1  ;;  %v2777_v3 = vadd.f32 %v3744_v18, %v2737_v20 }
 0x432   :  { %v2817_v63 = vadd.f32 %v3766_v27, %v2777_v3 }
 0x434   :  { %v2829_v51 = vadd.f32 %v2966_v5, %v2817_v63 }
 0x436   :  { %v2830_v44 = vmul.f32 0.5, %v2829_v51 }
 0x438   :  { %3904 = vtanh.f32 %v2830_v44 }
 0x442   :  { %v3905_v60 = vpop.eup %3904 }
 0x443   :  { %v2832_v45 = vmul.f32 0.5, %v3905_v60 }
 0x445   :  { %v2833_v42 = vadd.f32 0.5, %v2832_v45 }
 0x447   :  { %v2834_v29 = vmul.f32 %v2833_v42, %v2829_v51 }
 0x449   :  { %v2842_v4 = vmul.f32 %v2967_v54, %v2834_v29 }
 0x44b   :  { %2843 = vadd.xlane.f32.xlu0 %v2842_v4 }
 0x4d8   :  { %v2844_v8 = vpop.xlane.xlu0 %2843 }
 0x4d9   :  { %v2847_v58 = vadd.f32 %v2846_v0, %v2844_v8 }
 0x4db   :  { %2849 = vst.msk [vmem:[%s5543_s6] sm:$0xff] %vm2848_vm0, %v2847_v58 }
 0x4dc   :  { %2854 = vsyncpa [#allocation7], 1 }
 0x4dd   :  { %2855 = vsyncpa [#allocation9], 1 }
 0x4de   :  { %2856 = vsyncpa [#allocation12], 1 }
 0x4df   :  { %2857 = vsyncmov [#allocation4] }
 0x4e2   :  { %s2858_s3 = vpop.sfrf %2857 }
 0x4e3   :  { %p2968_p5 = scmp.ne.s32.totalorder %s2858_s3, 0 }
 0x4e5   :  { %2862 = shalt.err (%p2968_p5)  }
 0x4e6   :  { %2864 = vsyncmov [#allocation4 + $0x1] }
 0x4e9   :  { %s2865_s1 = vpop.sfrf %2864 }
 0x4ea   :  { %p2969_p6 = scmp.ne.s32.totalorder %s2865_s1, 0 }
 0x4ec   :  { %2869 = shalt.err (%p2969_p6)  }

</bundles_post_ra>
